<compile_context>
chip_gen: v5e
topology: v5e:2x2
jax: 0.10.0
libtpu: 0.0.40
codegen_flags: <defaults>
</compile_context>

<pallas_src>
import jax
import jax.numpy as jnp
from jax.experimental import pallas as pl
from jax.experimental.pallas import tpu as pltpu

EPS = 1e-5
CP = 128   # channels padded to the TPU lane width


# --------------------------------------------------------------------------- #
# In-kernel helpers
# --------------------------------------------------------------------------- #
def _conv3x3_taps(src_ref, w_ref, H, W):
    """3x3 same-conv of one (1, H+2, W+2, CP) spatially padded bf16 tile.

    w_ref is (9*CP, CP) bf16, rows ordered (ky, kx, cin).  Nine accumulated
    per-tap MXU matmuls with an f32 accumulator; returns (H*W, CP) f32.
    """
    acc = jnp.zeros((H * W, CP), jnp.float32)
    for t in range(9):
        dy, dx = divmod(t, 3)
        patch = src_ref[:, dy:dy + H, dx:dx + W, :].reshape(H * W, CP)
        acc = acc + jnp.dot(patch, w_ref[t * CP:(t + 1) * CP, :],
                            preferred_element_type=jnp.float32)
    return acc


# --------------------------------------------------------------------------- #
# Pass 1: conv1 per batch tile + partial bn1 statistics
# --------------------------------------------------------------------------- #
def conv1_stats_kernel(xpad_ref, w1_ref, y1_ref, s_ref, ss_ref):
    _, Hp, Wp, _ = xpad_ref.shape
    H, W = Hp - 2, Wp - 2
    acc = _conv3x3_taps(xpad_ref, w1_ref, H, W)
    y1_ref[...] = acc.astype(jnp.bfloat16).reshape(1, H, W, CP)
    s_ref[...] = jnp.sum(acc, axis=0, keepdims=True).reshape(1, 1, CP)
    ss_ref[...] = jnp.sum(acc * acc, axis=0, keepdims=True).reshape(1, 1, CP)


# --------------------------------------------------------------------------- #
# Pass 2: bn1 (folded scale/shift) + relu + conv2 per tile + partial bn2 stats
# --------------------------------------------------------------------------- #
def bn1_conv2_stats_kernel(y1_ref, sc1_ref, sh1_ref, w2_ref,
                           y2_ref, s_ref, ss_ref, zpad_ref):
    _, H, W, _ = y1_ref.shape
    sc = sc1_ref[...].reshape(1, 1, 1, CP)
    sh = sh1_ref[...].reshape(1, 1, 1, CP)
    z = jnp.maximum(y1_ref[...].astype(jnp.float32) * sc + sh,
                    0.0).astype(jnp.bfloat16)

    # Spatially pad z for conv2: interior write + halo-only zeroing.
    zpad_ref[:, 1:H + 1, 1:W + 1, :] = z
    zrow = jnp.zeros((1, 1, W + 2, CP), jnp.bfloat16)
    zcol = jnp.zeros((1, H, 1, CP), jnp.bfloat16)
    zpad_ref[:, 0:1, :, :] = zrow
    zpad_ref[:, H + 1:H + 2, :, :] = zrow
    zpad_ref[:, 1:H + 1, 0:1, :] = zcol
    zpad_ref[:, 1:H + 1, W + 1:W + 2, :] = zcol

    acc = _conv3x3_taps(zpad_ref, w2_ref, H, W)
    y2_ref[...] = acc.astype(jnp.bfloat16).reshape(1, H, W, CP)
    s_ref[...] = jnp.sum(acc, axis=0, keepdims=True).reshape(1, 1, CP)
    ss_ref[...] = jnp.sum(acc * acc, axis=0, keepdims=True).reshape(1, 1, CP)


# --------------------------------------------------------------------------- #
# Pass 3: bn2 (folded scale/shift) + identity residual + final relu
# --------------------------------------------------------------------------- #
def bn2_residual_kernel(y2_ref, x_ref, sc2_ref, sh2_ref, o_ref):
    sc = sc2_ref[...].reshape(1, 1, 1, CP)
    sh = sh2_ref[...].reshape(1, 1, 1, CP)
    y2 = y2_ref[...].astype(jnp.float32)
    res = x_ref[...].astype(jnp.float32)
    o_ref[...] = jnp.maximum(y2 * sc + sh + res, 0.0)


# --------------------------------------------------------------------------- #
# Wrapper
# --------------------------------------------------------------------------- #
def _vmem_limit_bytes():
    cap = 128 * 1024 * 1024
    try:
        cap = int(getattr(pltpu.get_tpu_info(), "vmem_capacity_bytes", cap))
    except Exception:
        pass
    # Leave headroom below the physical capacity: ~96 MiB on v5e/v6e (128 MiB),
    # ~48 MiB on v7x (64 MiB).
    return min(cap * 3 // 4, 100 * 1024 * 1024)


def basic_block(x_nchw, params):
    """params = (w1, g1, b1, w2, g2, b2); w* are (3, 3, C_in, C_out) HWIO."""
    w1, g1, b1, w2, g2, b2 = params
    N, C, H, W = x_nchw.shape
    assert C <= CP  # TODO(synk): Cin/Cout tiling for planes > 128.
    cnt = float(N * H * W)

    # NHWC, channel-padded to 128 lanes, bf16 activations end-to-end.
    x_nhwc = jnp.transpose(x_nchw, (0, 2, 3, 1)).astype(jnp.bfloat16)
    x_cp = jnp.pad(x_nhwc, ((0, 0), (0, 0), (0, 0), (0, CP - C)))
    xpad = jnp.pad(x_cp, ((0, 0), (1, 1), (1, 1), (0, 0)))

    def pack_w(w):
        # HWIO (3,3,C,C) -> channel-pad -> (9*CP, CP) bf16, rows = (ky, kx, cin)
        wp = jnp.pad(w, ((0, 0), (0, 0), (0, CP - C), (0, CP - C)))
        return wp.reshape(9 * CP, CP).astype(jnp.bfloat16)

    w1p, w2p = pack_w(w1), pack_w(w2)

    cparams = pltpu.CompilerParams(
        dimension_semantics=("parallel",),
        vmem_limit_bytes=_vmem_limit_bytes())

    # ---- pass 1: conv1 + partial bn1 stats ----------------------------------
    y1, s1, ss1 = pl.pallas_call(
        conv1_stats_kernel,
        grid=(N,),
        out_shape=(
            jax.ShapeDtypeStruct((N, H, W, CP), jnp.bfloat16),
            jax.ShapeDtypeStruct((N, 1, CP), jnp.float32),
            jax.ShapeDtypeStruct((N, 1, CP), jnp.float32),
        ),
        in_specs=[
            pl.BlockSpec((1, H + 2, W + 2, CP), lambda i: (i, 0, 0, 0)),
            pl.BlockSpec((9 * CP, CP), lambda i: (0, 0)),
        ],
        out_specs=[
            pl.BlockSpec((1, H, W, CP), lambda i: (i, 0, 0, 0)),
            pl.BlockSpec((1, 1, CP), lambda i: (i, 0, 0)),
            pl.BlockSpec((1, 1, CP), lambda i: (i, 0, 0)),
        ],
        compiler_params=cparams,
    )(xpad, w1p)

    def fold_bn(s, ss, g, b):
        # Biased variance (torch training-mode BN), clamped; gamma folded in.
        mean = jnp.sum(s, axis=0) / cnt                               # (1, CP)
        var = jnp.maximum(jnp.sum(ss, axis=0) / cnt - mean * mean, 0.0)
        gp = jnp.pad(g, (0, CP - C)).reshape(1, CP).astype(jnp.float32)
        bp = jnp.pad(b, (0, CP - C)).reshape(1, CP).astype(jnp.float32)
        scale = gp * jax.lax.rsqrt(var + EPS)
        shift = bp - mean * scale
        return scale, shift

    sc1, sh1 = fold_bn(s1, ss1, g1, b1)

    # ---- pass 2: bn1 + relu + conv2 + partial bn2 stats ----------------------
    y2, s2, ss2 = pl.pallas_call(
        bn1_conv2_stats_kernel,
        grid=(N,),
        out_shape=(
            jax.ShapeDtypeStruct((N, H, W, CP), jnp.bfloat16),
            jax.ShapeDtypeStruct((N, 1, CP), jnp.float32),
            jax.ShapeDtypeStruct((N, 1, CP), jnp.float32),
        ),
        in_specs=[
            pl.BlockSpec((1, H, W, CP), lambda i: (i, 0, 0, 0)),
            pl.BlockSpec((1, CP), lambda i: (0, 0)),
            pl.BlockSpec((1, CP), lambda i: (0, 0)),
            pl.BlockSpec((9 * CP, CP), lambda i: (0, 0)),
        ],
        out_specs=[
            pl.BlockSpec((1, H, W, CP), lambda i: (i, 0, 0, 0)),
            pl.BlockSpec((1, 1, CP), lambda i: (i, 0, 0)),
            pl.BlockSpec((1, 1, CP), lambda i: (i, 0, 0)),
        ],
        scratch_shapes=[pltpu.VMEM((1, H + 2, W + 2, CP), jnp.bfloat16)],
        compiler_params=cparams,
    )(y1, sc1, sh1, w2p)

    sc2, sh2 = fold_bn(s2, ss2, g2, b2)

    # ---- pass 3: bn2 + identity residual + final relu ------------------------
    out = pl.pallas_call(
        bn2_residual_kernel,
        grid=(N,),
        out_shape=jax.ShapeDtypeStruct((N, H, W, CP), jnp.float32),
        in_specs=[
            pl.BlockSpec((1, H, W, CP), lambda i: (i, 0, 0, 0)),
            pl.BlockSpec((1, H, W, CP), lambda i: (i, 0, 0, 0)),
            pl.BlockSpec((1, CP), lambda i: (0, 0)),
            pl.BlockSpec((1, CP), lambda i: (0, 0)),
        ],
        out_specs=pl.BlockSpec((1, H, W, CP), lambda i: (i, 0, 0, 0)),
        compiler_params=cparams,
    )(y2, x_cp, sc2, sh2)

    return jnp.transpose(out[..., :C], (0, 3, 1, 2))            # back to NCHW


# ----------------- pure-JAX reference (for correctness check) -----------------
def basic_block_ref(x_nchw, params):
    w1, g1, b1, w2, g2, b2 = params

    def conv(x, w):
        return jax.lax.conv_general_dilated(
            x, w, window_strides=(1, 1), padding=((1, 1), (1, 1)),
            dimension_numbers=('NCHW', 'HWIO', 'NCHW'),
            precision=jax.lax.Precision.HIGHEST)

    def bn(x, g, b):
        mean = jnp.mean(x, axis=(0, 2, 3), keepdims=True)
        var = jnp.mean((x - mean) ** 2, axis=(0, 2, 3), keepdims=True)
        return ((x - mean) * jax.lax.rsqrt(var + EPS)
                * g.reshape(1, -1, 1, 1) + b.reshape(1, -1, 1, 1))

    out = jax.nn.relu(bn(conv(x_nchw, w1), g1, b1))
    out = bn(conv(out, w2), g2, b2)
    return jax.nn.relu(out + x_nchw)


if __name__ == "__main__":
    # Small shapes: BasicBlock(inplanes=8, planes=8, stride=1, downsample=None)
    N, C, H, W = 2, 8, 16, 16

    key = jax.random.PRNGKey(0)
    k_x, k_w1, k_w2, k_g1, k_b1, k_g2, k_b2 = jax.random.split(key, 7)

    x = jax.random.normal(k_x, (N, C, H, W), jnp.float32)
    # conv3x3 weights (bias=False), stored HWIO: (3, 3, C_in, C_out)
    w1 = 0.1 * jax.random.normal(k_w1, (3, 3, C, C), jnp.float32)
    w2 = 0.1 * jax.random.normal(k_w2, (3, 3, C, C), jnp.float32)
    # BatchNorm affine params (non-trivial, to exercise the folded scale/shift)
    g1 = 1.0 + 0.1 * jax.random.normal(k_g1, (C,), jnp.float32)
    b1 = 0.1 * jax.random.normal(k_b1, (C,), jnp.float32)
    g2 = 1.0 + 0.1 * jax.random.normal(k_g2, (C,), jnp.float32)
    b2 = 0.1 * jax.random.normal(k_b2, (C,), jnp.float32)

    params = (w1, g1, b1, w2, g2, b2)

    out = jax.block_until_ready(basic_block(x, params))
    ref = jax.block_until_ready(basic_block_ref(x, params))

    assert out.shape == (N, C, H, W), out.shape
    # Kernel carries activations in bf16 (MXU operands + residual) with f32
    # accumulation / BN stats; the reference is full-f32 HIGHEST, so tolerance
    # is bf16-level.
    assert jnp.allclose(out, ref, atol=5e-2, rtol=5e-2), (
        float(jnp.max(jnp.abs(out - ref))))

    print("KERNEL_OK")
</pallas_src>

<mosaic_0001>
module attributes {stable_mosaic.version = 11 : i64} {
  func.func @conv1_stats_kernel(%arg0: i32, %arg1: memref<1x18x18x128xbf16, #tpu.memory_space<vmem>>, %arg2: memref<1152x128xbf16, #tpu.memory_space<vmem>>, %arg3: memref<1x16x16x128xbf16, #tpu.memory_space<vmem>>, %arg4: memref<1x1x128xf32, #tpu.memory_space<vmem>>, %arg5: memref<1x1x128xf32, #tpu.memory_space<vmem>>) attributes {dimension_semantics = [#tpu.dimension_semantics<parallel>], iteration_bounds = array<i64: 2>, scalar_prefetch = 0 : i64, scratch_operands = 0 : i64, tpu.core_type = #tpu.core_type<tc>, window_params = [{transform_indices = @transform_0, window_bounds = array<i64: 1, 18, 18, 128>}, {pipeline_mode = #tpu.pipeline_mode<synchronous>, transform_indices = @transform_1, window_bounds = array<i64: 1152, 128>}, {transform_indices = @transform_2, window_bounds = array<i64: 1, 16, 16, 128>}, {transform_indices = @transform_3, window_bounds = array<i64: 1, 1, 128>}, {transform_indices = @transform_4, window_bounds = array<i64: 1, 1, 128>}]} {
    %cst = arith.constant 0.000000e+00 : f32
    %0 = vector.broadcast %cst : f32 to vector<256x128xf32>
    %c0 = arith.constant 0 : index
    %c0_0 = arith.constant 0 : index
    %c0_1 = arith.constant 0 : index
    %c0_2 = arith.constant 0 : index
    %1 = vector.load %arg1[%c0, %c0_0, %c0_1, %c0_2] : memref<1x18x18x128xbf16, #tpu.memory_space<vmem>>, vector<1x16x16x128xbf16>
    %2 = vector.shape_cast %1 : vector<1x16x16x128xbf16> to vector<256x128xbf16>
    %c0_3 = arith.constant 0 : index
    %c0_4 = arith.constant 0 : index
    %3 = vector.load %arg2[%c0_3, %c0_4] : memref<1152x128xbf16, #tpu.memory_space<vmem>>, vector<128x128xbf16>
    %cst_5 = arith.constant dense<0.000000e+00> : vector<256x128xf32>
    %4 = tpu.matmul %2, %3, %cst_5 {dimension_numbers = #tpu.dot_dimension_numbers<[1], [0], [0], [1], [0, 0, 1, 1], [], []>} : vector<256x128xbf16>, vector<128x128xbf16>, vector<256x128xf32> -> vector<256x128xf32>
    %5 = arith.addf %0, %4 : vector<256x128xf32>
    %c0_6 = arith.constant 0 : index
    %c0_7 = arith.constant 0 : index
    %c1 = arith.constant 1 : index
    %c0_8 = arith.constant 0 : index
    %6 = vector.load %arg1[%c0_6, %c0_7, %c1, %c0_8] : memref<1x18x18x128xbf16, #tpu.memory_space<vmem>>, vector<1x16x16x128xbf16>
    %7 = vector.shape_cast %6 : vector<1x16x16x128xbf16> to vector<256x128xbf16>
    %c128 = arith.constant 128 : index
    %c0_9 = arith.constant 0 : index
    %8 = vector.load %arg2[%c128, %c0_9] : memref<1152x128xbf16, #tpu.memory_space<vmem>>, vector<128x128xbf16>
    %cst_10 = arith.constant dense<0.000000e+00> : vector<256x128xf32>
    %9 = tpu.matmul %7, %8, %cst_10 {dimension_numbers = #tpu.dot_dimension_numbers<[1], [0], [0], [1], [0, 0, 1, 1], [], []>} : vector<256x128xbf16>, vector<128x128xbf16>, vector<256x128xf32> -> vector<256x128xf32>
    %10 = arith.addf %5, %9 : vector<256x128xf32>
    %c0_11 = arith.constant 0 : index
    %c0_12 = arith.constant 0 : index
    %c2 = arith.constant 2 : index
    %c0_13 = arith.constant 0 : index
    %11 = vector.load %arg1[%c0_11, %c0_12, %c2, %c0_13] : memref<1x18x18x128xbf16, #tpu.memory_space<vmem>>, vector<1x16x16x128xbf16>
    %12 = vector.shape_cast %11 : vector<1x16x16x128xbf16> to vector<256x128xbf16>
    %c256 = arith.constant 256 : index
    %c0_14 = arith.constant 0 : index
    %13 = vector.load %arg2[%c256, %c0_14] : memref<1152x128xbf16, #tpu.memory_space<vmem>>, vector<128x128xbf16>
    %cst_15 = arith.constant dense<0.000000e+00> : vector<256x128xf32>
    %14 = tpu.matmul %12, %13, %cst_15 {dimension_numbers = #tpu.dot_dimension_numbers<[1], [0], [0], [1], [0, 0, 1, 1], [], []>} : vector<256x128xbf16>, vector<128x128xbf16>, vector<256x128xf32> -> vector<256x128xf32>
    %15 = arith.addf %10, %14 : vector<256x128xf32>
    %c0_16 = arith.constant 0 : index
    %c1_17 = arith.constant 1 : index
    %c0_18 = arith.constant 0 : index
    %c0_19 = arith.constant 0 : index
    %16 = vector.load %arg1[%c0_16, %c1_17, %c0_18, %c0_19] : memref<1x18x18x128xbf16, #tpu.memory_space<vmem>>, vector<1x16x16x128xbf16>
    %17 = vector.shape_cast %16 : vector<1x16x16x128xbf16> to vector<256x128xbf16>
    %c384 = arith.constant 384 : index
    %c0_20 = arith.constant 0 : index
    %18 = vector.load %arg2[%c384, %c0_20] : memref<1152x128xbf16, #tpu.memory_space<vmem>>, vector<128x128xbf16>
    %cst_21 = arith.constant dense<0.000000e+00> : vector<256x128xf32>
    %19 = tpu.matmul %17, %18, %cst_21 {dimension_numbers = #tpu.dot_dimension_numbers<[1], [0], [0], [1], [0, 0, 1, 1], [], []>} : vector<256x128xbf16>, vector<128x128xbf16>, vector<256x128xf32> -> vector<256x128xf32>
    %20 = arith.addf %15, %19 : vector<256x128xf32>
    %c0_22 = arith.constant 0 : index
    %c1_23 = arith.constant 1 : index
    %c1_24 = arith.constant 1 : index
    %c0_25 = arith.constant 0 : index
    %21 = vector.load %arg1[%c0_22, %c1_23, %c1_24, %c0_25] : memref<1x18x18x128xbf16, #tpu.memory_space<vmem>>, vector<1x16x16x128xbf16>
    %22 = vector.shape_cast %21 : vector<1x16x16x128xbf16> to vector<256x128xbf16>
    %c512 = arith.constant 512 : index
    %c0_26 = arith.constant 0 : index
    %23 = vector.load %arg2[%c512, %c0_26] : memref<1152x128xbf16, #tpu.memory_space<vmem>>, vector<128x128xbf16>
    %cst_27 = arith.constant dense<0.000000e+00> : vector<256x128xf32>
    %24 = tpu.matmul %22, %23, %cst_27 {dimension_numbers = #tpu.dot_dimension_numbers<[1], [0], [0], [1], [0, 0, 1, 1], [], []>} : vector<256x128xbf16>, vector<128x128xbf16>, vector<256x128xf32> -> vector<256x128xf32>
    %25 = arith.addf %20, %24 : vector<256x128xf32>
    %c0_28 = arith.constant 0 : index
    %c1_29 = arith.constant 1 : index
    %c2_30 = arith.constant 2 : index
    %c0_31 = arith.constant 0 : index
    %26 = vector.load %arg1[%c0_28, %c1_29, %c2_30, %c0_31] : memref<1x18x18x128xbf16, #tpu.memory_space<vmem>>, vector<1x16x16x128xbf16>
    %27 = vector.shape_cast %26 : vector<1x16x16x128xbf16> to vector<256x128xbf16>
    %c640 = arith.constant 640 : index
    %c0_32 = arith.constant 0 : index
    %28 = vector.load %arg2[%c640, %c0_32] : memref<1152x128xbf16, #tpu.memory_space<vmem>>, vector<128x128xbf16>
    %cst_33 = arith.constant dense<0.000000e+00> : vector<256x128xf32>
    %29 = tpu.matmul %27, %28, %cst_33 {dimension_numbers = #tpu.dot_dimension_numbers<[1], [0], [0], [1], [0, 0, 1, 1], [], []>} : vector<256x128xbf16>, vector<128x128xbf16>, vector<256x128xf32> -> vector<256x128xf32>
    %30 = arith.addf %25, %29 : vector<256x128xf32>
    %c0_34 = arith.constant 0 : index
    %c2_35 = arith.constant 2 : index
    %c0_36 = arith.constant 0 : index
    %c0_37 = arith.constant 0 : index
    %31 = vector.load %arg1[%c0_34, %c2_35, %c0_36, %c0_37] : memref<1x18x18x128xbf16, #tpu.memory_space<vmem>>, vector<1x16x16x128xbf16>
    %32 = vector.shape_cast %31 : vector<1x16x16x128xbf16> to vector<256x128xbf16>
    %c768 = arith.constant 768 : index
    %c0_38 = arith.constant 0 : index
    %33 = vector.load %arg2[%c768, %c0_38] : memref<1152x128xbf16, #tpu.memory_space<vmem>>, vector<128x128xbf16>
    %cst_39 = arith.constant dense<0.000000e+00> : vector<256x128xf32>
    %34 = tpu.matmul %32, %33, %cst_39 {dimension_numbers = #tpu.dot_dimension_numbers<[1], [0], [0], [1], [0, 0, 1, 1], [], []>} : vector<256x128xbf16>, vector<128x128xbf16>, vector<256x128xf32> -> vector<256x128xf32>
    %35 = arith.addf %30, %34 : vector<256x128xf32>
    %c0_40 = arith.constant 0 : index
    %c2_41 = arith.constant 2 : index
    %c1_42 = arith.constant 1 : index
    %c0_43 = arith.constant 0 : index
    %36 = vector.load %arg1[%c0_40, %c2_41, %c1_42, %c0_43] : memref<1x18x18x128xbf16, #tpu.memory_space<vmem>>, vector<1x16x16x128xbf16>
    %37 = vector.shape_cast %36 : vector<1x16x16x128xbf16> to vector<256x128xbf16>
    %c896 = arith.constant 896 : index
    %c0_44 = arith.constant 0 : index
    %38 = vector.load %arg2[%c896, %c0_44] : memref<1152x128xbf16, #tpu.memory_space<vmem>>, vector<128x128xbf16>
    %cst_45 = arith.constant dense<0.000000e+00> : vector<256x128xf32>
    %39 = tpu.matmul %37, %38, %cst_45 {dimension_numbers = #tpu.dot_dimension_numbers<[1], [0], [0], [1], [0, 0, 1, 1], [], []>} : vector<256x128xbf16>, vector<128x128xbf16>, vector<256x128xf32> -> vector<256x128xf32>
    %40 = arith.addf %35, %39 : vector<256x128xf32>
    %c0_46 = arith.constant 0 : index
    %c2_47 = arith.constant 2 : index
    %c2_48 = arith.constant 2 : index
    %c0_49 = arith.constant 0 : index
    %41 = vector.load %arg1[%c0_46, %c2_47, %c2_48, %c0_49] : memref<1x18x18x128xbf16, #tpu.memory_space<vmem>>, vector<1x16x16x128xbf16>
    %42 = vector.shape_cast %41 : vector<1x16x16x128xbf16> to vector<256x128xbf16>
    %c1024 = arith.constant 1024 : index
    %c0_50 = arith.constant 0 : index
    %43 = vector.load %arg2[%c1024, %c0_50] : memref<1152x128xbf16, #tpu.memory_space<vmem>>, vector<128x128xbf16>
    %cst_51 = arith.constant dense<0.000000e+00> : vector<256x128xf32>
    %44 = tpu.matmul %42, %43, %cst_51 {dimension_numbers = #tpu.dot_dimension_numbers<[1], [0], [0], [1], [0, 0, 1, 1], [], []>} : vector<256x128xbf16>, vector<128x128xbf16>, vector<256x128xf32> -> vector<256x128xf32>
    %45 = arith.addf %40, %44 : vector<256x128xf32>
    %46 = arith.truncf %45 : vector<256x128xf32> to vector<256x128xbf16>
    %47 = vector.shape_cast %46 : vector<256x128xbf16> to vector<1x16x16x128xbf16>
    %c0_52 = arith.constant 0 : index
    %c0_53 = arith.constant 0 : index
    %c0_54 = arith.constant 0 : index
    %c0_55 = arith.constant 0 : index
    %48 = vector.load %arg3[%c0_52, %c0_53, %c0_54, %c0_55] : memref<1x16x16x128xbf16, #tpu.memory_space<vmem>>, vector<1x16x16x128xbf16>
    tpu.vector_store %arg3[%c0_52, %c0_53, %c0_54, %c0_55], %47 {strides = array<i32>} : memref<1x16x16x128xbf16, #tpu.memory_space<vmem>>, vector<1x16x16x128xbf16>,
    %cst_56 = arith.constant dense<0.000000e+00> : vector<128xf32>
    %49 = vector.multi_reduction <add>, %45, %cst_56 [0] : vector<256x128xf32> to vector<128xf32>
    %50 = vector.shape_cast %49 : vector<128xf32> to vector<1x128xf32>
    %51 = vector.shape_cast %50 : vector<1x128xf32> to vector<1x1x128xf32>
    %c0_57 = arith.constant 0 : index
    %c0_58 = arith.constant 0 : index
    %c0_59 = arith.constant 0 : index
    %52 = vector.load %arg4[%c0_57, %c0_58, %c0_59] : memref<1x1x128xf32, #tpu.memory_space<vmem>>, vector<1x1x128xf32>
    tpu.vector_store %arg4[%c0_57, %c0_58, %c0_59], %51 {strides = array<i32>} : memref<1x1x128xf32, #tpu.memory_space<vmem>>, vector<1x1x128xf32>,
    %53 = arith.mulf %45, %45 : vector<256x128xf32>
    %cst_60 = arith.constant dense<0.000000e+00> : vector<128xf32>
    %54 = vector.multi_reduction <add>, %53, %cst_60 [0] : vector<256x128xf32> to vector<128xf32>
    %55 = vector.shape_cast %54 : vector<128xf32> to vector<1x128xf32>
    %56 = vector.shape_cast %55 : vector<1x128xf32> to vector<1x1x128xf32>
    %c0_61 = arith.constant 0 : index
    %c0_62 = arith.constant 0 : index
    %c0_63 = arith.constant 0 : index
    %57 = vector.load %arg5[%c0_61, %c0_62, %c0_63] : memref<1x1x128xf32, #tpu.memory_space<vmem>>, vector<1x1x128xf32>
    tpu.vector_store %arg5[%c0_61, %c0_62, %c0_63], %56 {strides = array<i32>} : memref<1x1x128xf32, #tpu.memory_space<vmem>>, vector<1x1x128xf32>,
    return
  }
  func.func @transform_0(%arg0: i32) -> (i32, i32, i32, i32) {
    %c0_i32 = arith.constant 0 : i32
    %c0_i32_0 = arith.constant 0 : i32
    %c0_i32_1 = arith.constant 0 : i32
    %c0_i32_2 = arith.constant 0 : i32
    return %arg0, %c0_i32, %c0_i32_0, %c0_i32_1 : i32, i32, i32, i32
  }
  func.func @transform_1(%arg0: i32) -> (i32, i32) {
    %c0_i32 = arith.constant 0 : i32
    %c0_i32_0 = arith.constant 0 : i32
    %c0_i32_1 = arith.constant 0 : i32
    return %c0_i32, %c0_i32_0 : i32, i32
  }
  func.func @transform_2(%arg0: i32) -> (i32, i32, i32, i32) {
    %c0_i32 = arith.constant 0 : i32
    %c0_i32_0 = arith.constant 0 : i32
    %c0_i32_1 = arith.constant 0 : i32
    %c0_i32_2 = arith.constant 0 : i32
    return %arg0, %c0_i32, %c0_i32_0, %c0_i32_1 : i32, i32, i32, i32
  }
  func.func @transform_3(%arg0: i32) -> (i32, i32, i32) {
    %c0_i32 = arith.constant 0 : i32
    %c0_i32_0 = arith.constant 0 : i32
    %c0_i32_1 = arith.constant 0 : i32
    return %arg0, %c0_i32, %c0_i32_0 : i32, i32, i32
  }
  func.func @transform_4(%arg0: i32) -> (i32, i32, i32) {
    %c0_i32 = arith.constant 0 : i32
    %c0_i32_0 = arith.constant 0 : i32
    %c0_i32_1 = arith.constant 0 : i32
    return %arg0, %c0_i32, %c0_i32_0 : i32, i32, i32
  }
}

</mosaic_0001>

<bundles_post_ra>
// kernel: tpu_custom_call.1
= control target key start
LH: loop header
LB: loop body
LE: loop exit
PB: predicated region body
PF: predicated region fallthrough
CT: control target
= control target key end

     0   :  { %10 = vsyncpa [#allocation3], 0  ;;  %s7446_s0 = inlined_call_operand.vmem [shape: bf16[2,18,18,128], index: 0, kind: input, shape index: {}]   ;;  %s7447_s1 = inlined_call_operand.vmem [shape: bf16[1152,128], index: 1, kind: input, shape index: {}]   ;;  %s7448_s2 = inlined_call_operand.hbm [shape: bf16[2,16,16,128], index: 2, kind: output, shape index: {0}]   ;;  %s7449_s3 = inlined_call_operand.hbm [shape: f32[2,1,128], index: 3, kind: output, shape index: {1}]   ;;  %s7450_s4 = inlined_call_operand.hbm [shape: f32[2,1,128], index: 4, kind: output, shape index: {2}]  }
   0x1   :  { %12 = vsyncpa [#allocation3 + $0x1], 0 }
   0x2   :  { %13 = vsyncpa [#allocation5], 0 }
   0x3   :  { %15 = vsyncpa [#allocation5 + $0x1], 0  ;;  %s5929_s15 = smov 0   ;;  %s5931_s16 = smov 0  }
   0x4   :  { %s5933_s17 = smov 0   ;;  %s5935_s18 = smov 0  }
   0x5 LB: > { %s5950_s19 = sadd.s32 4294967295, %s5900_s18   ;;  %s4702_s20 = sadd.s32 4294967294, %s5900_s18   ;;  %s5900_s18 = sphi %s5935_s18, %s7464_s18   ;;  %s5896_s17 = sphi %s5933_s17, %s7463_s17   ;;  %s5892_s16 = sphi %s5931_s16, %s7462_s16   ;;  %s5888_s15 = sphi %s5929_s15, %s7461_s15  }
   0x6   : > { %s5954_s21 = sadd.s32 1, %s5900_s18   ;;  %s75_s22 = sadd.s32 1, %s5896_s17 }
   0x7   : > { %s72_s23 = ssub.s32 %s5900_s18, %s5954_s21  ;;  %p85_p0 = scmp.ne.s32.totalorder %s5896_s17, %s5892_s16 }
   0x8   : > { %p73_p1 = scmp.eq.s32.totalorder %s72_s23, 0  ;;  %p86_p2 = scmp.eq.s32.totalorder %s5950_s19, 1 }
   0x9   : > { %p91_p3 = scmp.ne.s32.totalorder %s5892_s16, %s5888_s15  ;;  %p92_p4 = scmp.eq.s32.totalorder %s4702_s20, 1 }
   0xa   : > { %s5967_s24 = scalar_select %p73_p1, %s5896_s17, %s75_s22  }
   0xb   : > { %p5969_p5 = por %p86_p2, %p85_p0  ;;  %p5973_p6 = por %p92_p4, %p91_p3 }
   0xc   : > { %p4705_p7 = scmp.ge.s32.totalorder %s5900_s18, 1  ;;  %p173_p8 = scmp.lt.s32.totalorder %s5900_s18, 3 }
   0xe   : > { %p174_p9 = pnand %p4705_p7, %p173_p8 }
  0x10   : > { %177 = sbr.rel (%p174_p9) target bundleno = 799 (0x31f), region = 28 }
  0x15   : > { %v5464_v0 = vld [vmem:[%s7447_s1 + $0x78] sm:$0xff]  ;;  %p207_p10 = scmp.lt.s32.totalorder %s5950_s19, 1  ;;  %v5463_v1 = vld [vmem:[%s7447_s1 + $0x70] sm:$0xff]  ;;  %v5462_v2 = vld [vmem:[%s7447_s1 + $0x68] sm:$0xff]  ;;  %vm276_vm0 = vsmask.f32 3328 }
  0x16   : > { %5649 = vmatpush.bf16.msra.mxu1 %v5464_v0  ;;  %5650 = vmatpush.bf16.msra.mxu2 %v5464_v0  ;;  %vm277_vm1 = vsmask.f32 7440  ;;  %v5461_v6 = vld [vmem:[%s7447_s1 + $0x60] sm:$0xff]  ;;  %v5460_v35 = vld [vmem:[%s7447_s1 + $0x58] sm:$0xff]  ;;  %v5459_v54 = vld [vmem:[%s7447_s1 + $0x50] sm:$0xff]  ;;  %vm1161_vm3 = vcmask 1042432  }
  0x17   : > { %s208_s5 = scalar_select %p207_p10, %s5950_s19, 1  ;;  %5651 = vmatpush.bf16.msra.mxu3 %v5464_v0  ;;  %791 = vmatpush.bf16.msra.mxu0 %v5464_v0  ;;  %vm6008_vm2 = vmor %vm276_vm0, %vm277_vm1  ;;  %vm1162_vm4 = vcmask 1046532  }
  0x18   : > { %vm6308_vm5 = vmor %vm1161_vm3, %vm1162_vm4  ;;  %s7147_s22 = sand.u32 1, %s5892_s16   ;;  %s5798_s13 = scalar_lea.hbm %s7448_s2, 256 }
  0x19   : > { %s5673_s6 = smul.u32 216, %s208_s5  ;;  %s4706_s23 = sshll.u32 %s7147_s22, 7 }
  0x1a   : > { %5652 = vmatpush.bf16.msra.mxu1 %v5463_v1  ;;  %5653 = vmatpush.bf16.msra.mxu2 %v5463_v1  ;;  %s7166_s27 = scalar_lea.vmem [#allocation2], %s4706_s23  ;;  %s4538_s7 = scalar_lea.sflag [#allocation3], %s7147_s22 }
  0x1b   : > { %s5993_s11 = scalar_lea.vmem %s7446_s0, %s5673_s6  ;;  %5654 = vmatpush.bf16.msra.mxu3 %v5463_v1  ;;  %792 = vmatpush.bf16.msra.mxu0 %v5463_v1  ;;  %s4558_s5 = sshll.u32 %s7166_s27, 4  ;;  %s4559_s5 = int_to_ptr.vmem [resolvable:$true] %s4558_s5 }
  0x1c   : > { %v220_v3 = vld [vmem:[%s5993_s11 + $0x30] sm:$0xf]  ;;  %v221_v4 = vld [vmem:[%s5993_s11 + $0x34] sm:$0xf]  ;;  %v264_v5 = vld [vmem:[%s5993_s11 + $0x38] sm:$0x1] }
  0x1d   : > { %v376_v7 = vshrl.u32 %v220_v3, 16  ;;  %v379_v8 = vshll.u32 %v220_v3, 16  ;;  %v385_v9 = vshll.u32 %v221_v4, 16  ;;  %v389_v10 = vshrl.u32 %v221_v4, 16  ;;  %v228_v11 = vld [vmem:[%s5993_s11 + $0x60] sm:$0xf] }
  0x1e   : > { %v395_v12 = vshll.u32 %v264_v5, 16  ;;  %v229_v13 = vld [vmem:[%s5993_s11 + $0x64] sm:$0xf]  ;;  %v268_v14 = vld [vmem:[%s5993_s11 + $0x68] sm:$0x1]  ;;  %v472_v15 = vshrl.u32 %v228_v11, 16  ;;  %5655 = vmatpush.bf16.msra.mxu1 %v5462_v2  ;;  %5656 = vmatpush.bf16.msra.mxu2 %v5462_v2 }
  0x1f   : > { %v378_v16 = vrot.slane %v376_v7, 4  ;;  %v381_v17 = vrot.slane %v379_v8, 5  ;;  %v387_v18 = vrot.slane %v385_v9, 5  ;;  %v391_v19 = vrot.slane %v389_v10, 4  ;;  %v236_v20 = vld [vmem:[%s5993_s11 + $0x90] sm:$0xf]  ;;  %5657 = vmatpush.bf16.msra.mxu3 %v5462_v2  ;;  %793 = vmatpush.bf16.msra.mxu0 %v5462_v2 }
  0x20   : > { %v397_v21 = vrot.slane %v395_v12, 5  ;;  %v474_v22 = vrot.slane %v472_v15, 4  ;;  %v475_v23 = vshll.u32 %v228_v11, 16  ;;  %v481_v24 = vshll.u32 %v229_v13, 16  ;;  %v237_v29 = vld [vmem:[%s5993_s11 + $0x94] sm:$0xf] }
  0x21   : > { %v382_v25 = vor.u32 %v381_v17, %v378_v16  ;;  %v392_v26 = vor.u32 %v391_v19, %v387_v18  ;;  %v485_v27 = vshrl.u32 %v229_v13, 16  ;;  %v491_v28 = vshll.u32 %v268_v14, 16  ;;  %v272_v41 = vld [vmem:[%s5993_s11 + $0x98] sm:$0x1]  ;;  %v212_v49 = vld [vmem:[%s5993_s11] sm:$0xf] }
  0x22   : > { %v477_v31 = vrot.slane %v475_v23, 5  ;;  %v483_v32 = vrot.slane %v481_v24, 5  ;;  %v568_v33 = vshrl.u32 %v236_v20, 16  ;;  %v571_v34 = vshll.u32 %v236_v20, 16  ;;  %5658 = vmatpush.bf16.msra.mxu1 %v5461_v6  ;;  %5659 = vmatpush.bf16.msra.mxu2 %v5461_v6  ;;  %v6033_v62 = vld [vmem:[%s5993_s11 + $0x4] sm:$0xf] }
  0x23   : > { %v383_v36 = vrot.slane %v382_v25, 4  ;;  %v393_v37 = vrot.slane %v392_v26, 4  ;;  %v487_v38 = vrot.slane %v485_v27, 4  ;;  %v493_v39 = vrot.slane %v491_v28, 5  ;;  %5660 = vmatpush.bf16.msra.mxu3 %v5461_v6  ;;  %794 = vmatpush.bf16.msra.mxu0 %v5461_v6  ;;  %v6040_v4 = vld [vmem:[%s5993_s11 + $0x8] sm:$0x1] }
  0x24   : > { %v478_v40 = vor.u32 %v477_v31, %v474_v22  ;;  %v570_v42 = vrot.slane %v568_v33, 4  ;;  %v573_v43 = vrot.slane %v571_v34, 5  ;;  %v577_v44 = vshll.u32 %v237_v29, 16  ;;  %v222_v5 = vld [vmem:[%s5993_s11 + $0x3c] sm:$0xf]  ;;  %v5458_v10 = vld [vmem:[%s7447_s1 + $0x48] sm:$0xff] }
  0x25   : > { %v388_v45 = vsel %vm6008_vm2, %v383_v36, %v387_v18  ;;  %v398_v46 = vsel %vm6008_vm2, %v393_v37, %v397_v21  ;;  %v488_v47 = vor.u32 %v487_v38, %v483_v32  ;;  %v581_v48 = vshrl.u32 %v237_v29, 16  ;;  %v223_v15 = vld [vmem:[%s5993_s11 + $0x40] sm:$0xf]  ;;  %v265_v19 = vld [vmem:[%s5993_s11 + $0x44] sm:$0x1]  ;;  %v5472_v37 = vld [vmem:[%s7447_s1 + $0xb8] sm:$0xff] }
  0x26   : > { %v6021_v50 = vunpack.c.l.b16 %v388_v45  ;;  %v6023_v51 = vunpack.c.l.b16 %v398_v46  ;;  %v479_v52 = vrot.slane %v478_v40, 4  ;;  %v574_v53 = vor.u32 %v573_v43, %v570_v42  ;;  %5661 = vmatpush.bf16.msra.mxu1 %v5460_v35  ;;  %5662 = vmatpush.bf16.msra.mxu2 %v5460_v35  ;;  %v230_v25 = vld [vmem:[%s5993_s11 + $0x6c] sm:$0xf]  ;;  %v5457_v31 = vld [vmem:[%s7447_s1 + $0x40] sm:$0xff]  ;;  %v231_v40 = vld [vmem:[%s5993_s11 + $0x70] sm:$0xf] }
  0x27   : > { %v489_v55 = vrot.slane %v488_v47, 4  ;;  %v579_v56 = vrot.slane %v577_v44, 5  ;;  %v583_v57 = vrot.slane %v581_v48, 4  ;;  %v587_v58 = vshll.u32 %v272_v41, 16  ;;  %5663 = vmatpush.bf16.msra.mxu3 %v5460_v35  ;;  %795 = vmatpush.bf16.msra.mxu0 %v5460_v35  ;;  %v5496_v43 = vld [vmem:[%s7447_s1 + $0xf8] sm:$0xff] }
  0x28   : > { %v715_v59 = vpack.c.b16 %v6023_v51, %v6021_v50  ;;  %v484_v60 = vsel %vm6008_vm2, %v479_v52, %v483_v32  ;;  %v575_v61 = vrot.slane %v574_v53, 4  ;;  %v280_v63 = vshrl.u32 %v212_v49, 16  ;;  %v269_v47 = vld [vmem:[%s5993_s11 + $0x74] sm:$0x1] }
  0x29   : > { %v494_v0 = vsel %vm6008_vm2, %v489_v55, %v493_v39  ;;  %v6037_v1 = vunpack.c.l.b16 %v484_v60  ;;  %v584_v2 = vor.u32 %v583_v57, %v579_v56  ;;  %v589_v3 = vrot.slane %v587_v58, 5  ;;  %v5456_v57 = vld [vmem:[%s7447_s1 + $0x38] sm:$0xff] }
  0x2a   : > { %v6043_v6 = vunpack.c.l.b16 %v494_v0  ;;  %v580_v7 = vsel %vm6008_vm2, %v575_v61, %v579_v56  ;;  %v282_v8 = vrot.slane %v280_v63, 4  ;;  %v283_v9 = vshll.u32 %v212_v49, 16  ;;  %5664 = vmatpush.bf16.msra.mxu1 %v5459_v54  ;;  %5665 = vmatpush.bf16.msra.mxu2 %v5459_v54  ;;  %v5471_v63 = vld [vmem:[%s7447_s1 + $0xb0] sm:$0xff] }
  0x2b   : > { %v585_v11 = vrot.slane %v584_v2, 4  ;;  %v6050_v12 = vunpack.c.l.b16 %v580_v7  ;;  %v289_v13 = vshll.u32 %v6033_v62, 16  ;;  %v293_v14 = vshrl.u32 %v6033_v62, 16  ;;  %5666 = vmatpush.bf16.msra.mxu3 %v5459_v54  ;;  %796 = vmatpush.bf16.msra.mxu0 %v5459_v54  ;;  %v238_v54 = vld [vmem:[%s5993_s11 + $0x9c] sm:$0xf] }
  0x2c   : > { %v719_v16 = vpack.c.b16 %v6043_v6, %v6037_v1  ;;  %v285_v17 = vrot.slane %v283_v9, 5  ;;  %v299_v18 = vshll.u32 %v6040_v4, 16  ;;  %v400_v20 = vshrl.u32 %v222_v5, 16 }
  0x2d   : > { %v590_v21 = vsel %vm6008_vm2, %v585_v11, %v589_v3  ;;  %v291_v22 = vrot.slane %v289_v13, 5  ;;  %v295_v23 = vrot.slane %v293_v14, 4  ;;  %v403_v24 = vshll.u32 %v222_v5, 16  ;;  %v5495_v3 = vld [vmem:[%s7447_s1 + $0xf0] sm:$0xff]  ;;  %v5504_v11 = vld [vmem:[%s7447_s1 + $0x138] sm:$0xff] }
  0x2e   : > { %v704_v26 = vunpack.c.l.b16 %v590_v21  ;;  %v286_v27 = vor.u32 %v285_v17, %v282_v8  ;;  %v301_v28 = vrot.slane %v299_v18, 5  ;;  %v402_v29 = vrot.slane %v400_v20, 4  ;;  %5667 = vmatpush.bf16.msra.mxu1 %v5458_v10  ;;  %5668 = vmatpush.bf16.msra.mxu2 %v5458_v10  ;;  %v239_v8 = vld [vmem:[%s5993_s11 + $0xa0] sm:$0xf]  ;;  %v214_v17 = vld [vmem:[%s5993_s11 + $0xc] sm:$0xf] }
  0x2f   : > { %v296_v32 = vor.u32 %v295_v23, %v291_v22  ;;  %v405_v33 = vrot.slane %v403_v24, 5  ;;  %v409_v34 = vshll.u32 %v223_v15, 16  ;;  %v413_v35 = vshrl.u32 %v223_v15, 16  ;;  %5669 = vmatpush.bf16.msra.mxu3 %v5458_v10  ;;  %797 = vmatpush.bf16.msra.mxu0 %v5458_v10  ;;  %v273_v15 = vld [vmem:[%s5993_s11 + $0xa4] sm:$0x1]  ;;  %v5455_v18 = vld [vmem:[%s7447_s1 + $0x30] sm:$0xff] }
  0x30   : > { %v723_v36 = vpack.c.b16 %v704_v26, %v6050_v12  ;;  %v287_v38 = vrot.slane %v286_v27, 4  ;;  %v419_v39 = vshll.u32 %v265_v19, 16  ;;  %v496_v41 = vshrl.u32 %v230_v25, 16  ;;  %v5470_v23 = vld [vmem:[%s7447_s1 + $0xa8] sm:$0xff]  ;;  %v6112_v27 = vld [vmem:[%s5993_s11 + $0x10] sm:$0xf] }
  0x31   : > { %v297_v42 = vrot.slane %v296_v32, 4  ;;  %v406_v44 = vor.u32 %v405_v33, %v402_v29  ;;  %v411_v45 = vrot.slane %v409_v34, 5  ;;  %v415_v46 = vrot.slane %v413_v35, 4  ;;  %v5494_v29 = vld [vmem:[%s7447_s1 + $0xe8] sm:$0xff]  ;;  %v6122_v35 = vld [vmem:[%s5993_s11 + $0x14] sm:$0x1] }
  0x32   : > { %v292_v48 = vsel %vm6008_vm2, %v287_v38, %v291_v22  ;;  %v421_v49 = vrot.slane %v419_v39, 5  ;;  %v498_v52 = vrot.slane %v496_v41, 4  ;;  %v499_v53 = vshll.u32 %v230_v25, 16  ;;  %5670 = vmatpush.bf16.msra.mxu1 %v5457_v31  ;;  %5671 = vmatpush.bf16.msra.mxu2 %v5457_v31  ;;  %v5454_v41 = vld [vmem:[%s7447_s1 + $0x28] sm:$0xff] }
  0x33   : > { %v302_v55 = vsel %vm6008_vm2, %v297_v42, %v301_v28  ;;  %v679_v56 = vunpack.c.l.b16 %v292_v48  ;;  %v407_v58 = vrot.slane %v406_v44, 4  ;;  %v416_v60 = vor.u32 %v415_v46, %v411_v45  ;;  %5672 = vmatpush.bf16.msra.mxu3 %v5457_v31  ;;  %798 = vmatpush.bf16.msra.mxu0 %v5457_v31  ;;  %v224_v46 = vld [vmem:[%s5993_s11 + $0x48] sm:$0xf] }
  0x34   : > { %v680_v61 = vunpack.c.l.b16 %v302_v55  ;;  %v501_v0 = vrot.slane %v499_v53, 5  ;;  %v505_v1 = vshll.u32 %v231_v40, 16  ;;  %v509_v2 = vshrl.u32 %v231_v40, 16  ;;  %v5469_v53 = vld [vmem:[%s7447_s1 + $0xa0] sm:$0xff] }
  0x35   : > { %v412_v5 = vsel %vm6008_vm2, %v407_v58, %v411_v45  ;;  %v417_v6 = vrot.slane %v416_v60, 4  ;;  %v515_v7 = vshll.u32 %v269_v47, 16  ;;  %v592_v9 = vshrl.u32 %v238_v54, 16  ;;  %819 = vmatmul.bf16.vlgmr.msra.gmra.mxu1 %v715_v59  ;;  %839 = vmatmul.bf16.vlgmr.msra.gmra.mxu2 %v719_v16  ;;  %v5502_v60 = vld [vmem:[%s7447_s1 + $0x128] sm:$0xff] }
  0x36   : > { %1404 = vmatpush.bf16.msrb.mxu2 %v5472_v37  ;;  %v711_v10 = vpack.c.b16 %v680_v61, %v679_v56  ;;  %v6097_v12 = vunpack.c.l.b16 %v412_v5  ;;  %v502_v13 = vor.u32 %v501_v0, %v498_v52  ;;  %v507_v14 = vrot.slane %v505_v1, 5  ;;  %859 = vmatmul.bf16.vlgmr.msra.gmra.mxu3 %v723_v36  ;;  %v5503_v36 = vld [vmem:[%s7447_s1 + $0x130] sm:$0xff]  ;;  %v5453_v61 = vld [vmem:[%s7447_s1 + $0x20] sm:$0xff] }
  0x37   : > { %1718 = vmatpush.bf16.msrb.mxu3 %v5496_v43  ;;  %1024 = vmatpush.bf16.msrb.mxu1 %v5456_v57  ;;  %v422_v50 = vsel %vm6008_vm2, %v417_v6, %v421_v49  ;;  %v511_v51 = vrot.slane %v509_v2, 4  ;;  %v517_v59 = vrot.slane %v515_v7, 5  ;;  %v594_v16 = vrot.slane %v592_v9, 4  ;;  %v6151_v2 = vld [vmem:[%s5993_s11 + $0x4c] sm:$0xf] }
  0x38   : > { %799 = vmatmul.bf16.vlgmr.msra.gmra.mxu0 %v711_v10  ;;  %v6106_v19 = vunpack.c.l.b16 %v422_v50  ;;  %v503_v20 = vrot.slane %v502_v13, 4  ;;  %v595_v21 = vshll.u32 %v238_v54, 16  ;;  %v601_v22 = vshll.u32 %v239_v8, 16  ;;  %v5493_v54 = vld [vmem:[%s7447_s1 + $0xe0] sm:$0xff]  ;;  %v232_v10 = vld [vmem:[%s5993_s11 + $0x78] sm:$0xf] }
  0x39   : > { %v512_v24 = vor.u32 %v511_v51, %v507_v14  ;;  %v605_v25 = vshrl.u32 %v239_v8, 16  ;;  %v611_v26 = vshll.u32 %v273_v15, 16  ;;  %v304_v28 = vshrl.u32 %v214_v17, 16  ;;  %2399 = vmatpush.bf16.msrb.mxu0 %v5504_v11  ;;  %v266_v8 = vld [vmem:[%s5993_s11 + $0x50] sm:$0x1] }
  0x3a   : > { %1405 = vmatpush.bf16.msrb.mxu2 %v5471_v63  ;;  %v716_v31 = vpack.c.b16 %v6106_v19, %v6097_v12  ;;  %v508_v32 = vsel %vm6008_vm2, %v503_v20, %v507_v14  ;;  %v597_v33 = vrot.slane %v595_v21, 5  ;;  %v603_v34 = vrot.slane %v601_v22, 5 }
  0x3b   : > { %1719 = vmatpush.bf16.msrb.mxu3 %v5495_v3  ;;  %1025 = vmatpush.bf16.msrb.mxu1 %v5455_v18  ;;  %v513_v37 = vrot.slane %v512_v24, 4  ;;  %v6127_v38 = vunpack.c.l.b16 %v508_v32  ;;  %v607_v39 = vrot.slane %v605_v25, 4  ;;  %v613_v40 = vrot.slane %v611_v26, 5  ;;  %v5492_v18 = vld [vmem:[%s7447_s1 + $0xd8] sm:$0xff]  ;;  %v5501_v24 = vld [vmem:[%s7447_s1 + $0x120] sm:$0xff] }
  0x3c   : > { %v598_v42 = vor.u32 %v597_v33, %v594_v16  ;;  %v306_v43 = vrot.slane %v304_v28, 4  ;;  %v307_v44 = vshll.u32 %v214_v17, 16  ;;  %v313_v45 = vshll.u32 %v6112_v27, 16  ;;  %v5468_v17 = vld [vmem:[%s7447_s1 + $0x98] sm:$0xff]  ;;  %v270_v33 = vld [vmem:[%s5993_s11 + $0x80] sm:$0x1] }
  0x3d   : > { %v518_v47 = vsel %vm6008_vm2, %v513_v37, %v517_v59  ;;  %v608_v48 = vor.u32 %v607_v39, %v603_v34  ;;  %v317_v49 = vshrl.u32 %v6112_v27, 16  ;;  %v323_v52 = vshll.u32 %v6122_v35, 16  ;;  %2400 = vmatpush.bf16.msrb.mxu0 %v5503_v36  ;;  %v233_v32 = vld [vmem:[%s5993_s11 + $0x7c] sm:$0xf] }
  0x3e   : > { %1406 = vmatpush.bf16.msrb.mxu2 %v5470_v23  ;;  %v698_v55 = vunpack.c.l.b16 %v518_v47  ;;  %v599_v56 = vrot.slane %v598_v42, 4  ;;  %v309_v57 = vrot.slane %v307_v44, 5  ;;  %v315_v58 = vrot.slane %v313_v45, 5  ;;  %v5491_v42 = vld [vmem:[%s7447_s1 + $0xd0] sm:$0xff] }
  0x3f   : > { %1720 = vmatpush.bf16.msrb.mxu3 %v5494_v29  ;;  %v609_v63 = vrot.slane %v608_v48, 4  ;;  %v319_v0 = vrot.slane %v317_v49, 4  ;;  %v325_v1 = vrot.slane %v323_v52, 5  ;;  %1026 = vmatpush.bf16.msrb.mxu1 %v5454_v41  ;;  %v424_v3 = vshrl.u32 %v224_v46, 16  ;;  %v5467_v41 = vld [vmem:[%s7447_s1 + $0x90] sm:$0xff] }
  0x40   : > { %v720_v5 = vpack.c.b16 %v698_v55, %v6127_v38  ;;  %v604_v6 = vsel %vm6008_vm2, %v599_v56, %v603_v34  ;;  %v310_v7 = vor.u32 %v309_v57, %v306_v43  ;;  %v427_v9 = vshll.u32 %v224_v46, 16  ;;  %v5452_v34 = vld [vmem:[%s7447_s1 + $0x18] sm:$0xff]  ;;  %v5451_v56 = vld [vmem:[%s7447_s1 + $0x10] sm:$0xff] }
  0x41   : > { %v614_v11 = vsel %vm6008_vm2, %v609_v63, %v613_v40  ;;  %v705_v13 = vunpack.c.l.b16 %v604_v6  ;;  %v320_v14 = vor.u32 %v319_v0, %v315_v58  ;;  %v426_v15 = vrot.slane %v424_v3, 4  ;;  %2401 = vmatpush.bf16.msrb.mxu0 %v5502_v60  ;;  %v240_v40 = vld [vmem:[%s5993_s11 + $0xa8] sm:$0xf]  ;;  %v274_v63 = vld [vmem:[%s5993_s11 + $0xb0] sm:$0x1] }
  0x42   : > { %1407 = vmatpush.bf16.msrb.mxu2 %v5469_v53  ;;  %v706_v50 = vunpack.c.l.b16 %v614_v11  ;;  %v311_v51 = vrot.slane %v310_v7, 4  ;;  %v429_v59 = vrot.slane %v427_v9, 5  ;;  %v433_v16 = vshll.u32 %v6151_v2, 16  ;;  %v5500_v53 = vld [vmem:[%s7447_s1 + $0x118] sm:$0xff] }
  0x43   : > { %1721 = vmatpush.bf16.msrb.mxu3 %v5493_v54  ;;  %v321_v20 = vrot.slane %v320_v14, 4  ;;  %1027 = vmatpush.bf16.msrb.mxu1 %v5453_v61  ;;  %v437_v21 = vshrl.u32 %v6151_v2, 16  ;;  %v443_v22 = vshll.u32 %v266_v8, 16  ;;  %v520_v23 = vshrl.u32 %v232_v10, 16  ;;  %v216_v6 = vld [vmem:[%s5993_s11 + $0x18] sm:$0xf] }
  0x44   : > { %v724_v25 = vpack.c.b16 %v706_v50, %v705_v13  ;;  %v316_v26 = vsel %vm6008_vm2, %v311_v51, %v315_v58  ;;  %v430_v28 = vor.u32 %v429_v59, %v426_v15  ;;  %v435_v29 = vrot.slane %v433_v16, 5  ;;  %v6209_v59 = vld [vmem:[%s5993_s11 + $0x1c] sm:$0xf] }
  0x45   : > { %v326_v36 = vsel %vm6008_vm2, %v321_v20, %v325_v1  ;;  %v681_v37 = vunpack.c.l.b16 %v316_v26  ;;  %v439_v38 = vrot.slane %v437_v21, 4  ;;  %v445_v39 = vrot.slane %v443_v22, 5  ;;  %824 = vmatmul.bf16.gmra.mxu1 %v716_v31  ;;  %844 = vmatmul.bf16.gmra.mxu2 %v720_v5  ;;  %v241_v31 = vld [vmem:[%s5993_s11 + $0xac] sm:$0xf] }
  0x46   : > { %1408 = vmatpush.bf16.msrb.mxu2 %v5468_v17  ;;  %v682_v43 = vunpack.c.l.b16 %v326_v36  ;;  %v431_v44 = vrot.slane %v430_v28, 4  ;;  %v522_v45 = vrot.slane %v520_v23, 4  ;;  %v523_v46 = vshll.u32 %v232_v10, 16  ;;  %864 = vmatmul.bf16.gmra.mxu3 %v724_v25  ;;  %v5466_v17 = vld [vmem:[%s7447_s1 + $0x88] sm:$0xff]  ;;  %v226_v25 = vld [vmem:[%s5993_s11 + $0x54] sm:$0xf] }
  0x47   : > { %1722 = vmatpush.bf16.msrb.mxu3 %v5492_v18  ;;  %v440_v47 = vor.u32 %v439_v38, %v435_v29  ;;  %v529_v48 = vshll.u32 %v233_v32, 16  ;;  %v533_v49 = vshrl.u32 %v233_v32, 16  ;;  %v539_v52 = vshll.u32 %v270_v33, 16  ;;  %2402 = vmatpush.bf16.msrb.mxu0 %v5501_v24  ;;  %v6215_v24 = vld [vmem:[%s5993_s11 + $0x20] sm:$0x1]  ;;  %v5490_v38 = vld [vmem:[%s7447_s1 + $0xc8] sm:$0xff] }
  0x48   : > { %v712_v54 = vpack.c.b16 %v682_v43, %v681_v37  ;;  %v436_v12 = vsel %vm6008_vm2, %v431_v44, %v435_v29  ;;  %v525_v19 = vrot.slane %v523_v46, 5  ;;  %v616_v55 = vshrl.u32 %v240_v40, 16  ;;  %1028 = vmatpush.bf16.msrb.mxu1 %v5452_v34 }
  0x49   : > { %v441_v57 = vrot.slane %v440_v47, 4  ;;  %v6199_v58 = vunpack.c.l.b16 %v436_v12  ;;  %v531_v60 = vrot.slane %v529_v48, 5  ;;  %v535_v61 = vrot.slane %v533_v49, 4 }
  0x4a   : > { %1409 = vmatpush.bf16.msrb.mxu2 %v5467_v41  ;;  %804 = vmatmul.bf16.gmra.mxu0 %v712_v54  ;;  %v526_v0 = vor.u32 %v525_v19, %v522_v45  ;;  %v541_v1 = vrot.slane %v539_v52, 5  ;;  %v618_v3 = vrot.slane %v616_v55, 4  ;;  %v619_v5 = vshll.u32 %v240_v40, 16  ;;  %v5450_v40 = vld [vmem:[%s7447_s1 + $0x8] sm:$0xff]  ;;  %v5465_v45 = vld [vmem:[%s7447_s1 + $0x80] sm:$0xff] }
  0x4b   : > { %1723 = vmatpush.bf16.msrb.mxu3 %v5491_v42  ;;  %v446_v7 = vsel %vm6008_vm2, %v441_v57, %v445_v39  ;;  %v536_v8 = vor.u32 %v535_v61, %v531_v60  ;;  %v625_v9 = vshll.u32 %v241_v31, 16  ;;  %v629_v10 = vshrl.u32 %v241_v31, 16  ;;  %2403 = vmatpush.bf16.msrb.mxu0 %v5500_v53  ;;  %v5499_v39 = vld [vmem:[%s7447_s1 + $0x110] sm:$0xff]  ;;  %v6238_v52 = vld [vmem:[%s5993_s11 + $0x58] sm:$0xf]  ;;  %v5498_v57 = vld [vmem:[%s7447_s1 + $0x108] sm:$0xff] }
  0x4c   : > { %v692_v11 = vunpack.c.l.b16 %v446_v7  ;;  %v527_v13 = vrot.slane %v526_v0, 4  ;;  %v621_v14 = vrot.slane %v619_v5, 5  ;;  %v635_v15 = vshll.u32 %v274_v63, 16  ;;  %1029 = vmatpush.bf16.msrb.mxu1 %v5451_v56  ;;  %v6241_v53 = vld [vmem:[%s5993_s11 + $0x5c] sm:$0x1]  ;;  %v5489_v56 = vld [vmem:[%s7447_s1 + $0xc0] sm:$0xff] }
  0x4d   : > { %v537_v18 = vrot.slane %v536_v8, 4  ;;  %v627_v50 = vrot.slane %v625_v9, 5  ;;  %v631_v51 = vrot.slane %v629_v10, 4  ;;  %v328_v16 = vshrl.u32 %v216_v6, 16  ;;  %v234_v55 = vld [vmem:[%s5993_s11 + $0x84] sm:$0xf] }
  0x4e   : > { %v717_v20 = vpack.c.b16 %v692_v11, %v6199_v58  ;;  %v532_v21 = vsel %vm6008_vm2, %v527_v13, %v531_v60  ;;  %v622_v22 = vor.u32 %v621_v14, %v618_v3  ;;  %v637_v23 = vrot.slane %v635_v15, 5  ;;  %1410 = vmatpush.bf16.msrb.mxu2 %v5466_v17  ;;  %v5449_v0 = vld [vmem:[%s7447_s1] sm:$0xff]  ;;  %v235_v10 = vld [vmem:[%s5993_s11 + $0x88] sm:$0xf] }
  0x4f   : > { %v542_v26 = vsel %vm6008_vm2, %v537_v18, %v541_v1  ;;  %v699_v28 = vunpack.c.l.b16 %v532_v21  ;;  %v632_v29 = vor.u32 %v631_v51, %v627_v50  ;;  %v330_v32 = vrot.slane %v328_v16, 4  ;;  %1724 = vmatpush.bf16.msrb.mxu3 %v5490_v38  ;;  %2404 = vmatpush.bf16.msrb.mxu0 %v5499_v39  ;;  %v5497_v18 = vld [vmem:[%s7447_s1 + $0x100] sm:$0xff]  ;;  %v271_v16 = vld [vmem:[%s5993_s11 + $0x8c] sm:$0x1]  ;;  %v243_v39 = vld [vmem:[%s5993_s11 + $0xb8] sm:$0xf] }
  0x50   : > { %v700_v33 = vunpack.c.l.b16 %v542_v26  ;;  %v623_v34 = vrot.slane %v622_v22, 4  ;;  %v331_v36 = vshll.u32 %v216_v6, 16  ;;  %v337_v37 = vshll.u32 %v6209_v59, 16  ;;  %1030 = vmatpush.bf16.msrb.mxu1 %v5450_v40  ;;  %v242_v22 = vld [vmem:[%s5993_s11 + $0xb4] sm:$0xf] }
  0x51   : > { %v633_v41 = vrot.slane %v632_v29, 4  ;;  %v341_v42 = vshrl.u32 %v6209_v59, 16  ;;  %v347_v43 = vshll.u32 %v6215_v24, 16  ;;  %v448_v44 = vshrl.u32 %v226_v25, 16 }
  0x52   : > { %v721_v46 = vpack.c.b16 %v700_v33, %v699_v28  ;;  %v628_v47 = vsel %vm6008_vm2, %v623_v34, %v627_v50  ;;  %v333_v48 = vrot.slane %v331_v36, 5  ;;  %v339_v49 = vrot.slane %v337_v37, 5  ;;  %1411 = vmatpush.bf16.msrb.mxu2 %v5465_v45  ;;  %v275_v45 = vld [vmem:[%s5993_s11 + $0xbc] sm:$0x1] }
  0x53   : > { %v638_v54 = vsel %vm6008_vm2, %v633_v41, %v637_v23  ;;  %v707_v12 = vunpack.c.l.b16 %v628_v47  ;;  %v343_v19 = vrot.slane %v341_v42, 4  ;;  %v349_v31 = vrot.slane %v347_v43, 5  ;;  %1725 = vmatpush.bf16.msrb.mxu3 %v5489_v56  ;;  %2405 = vmatpush.bf16.msrb.mxu0 %v5498_v57  ;;  %v5536_v47 = vld [vmem:[%s7447_s1 + $0x1b8] sm:$0xff] }
  0x54   : > { %v708_v58 = vunpack.c.l.b16 %v638_v54  ;;  %v334_v60 = vor.u32 %v333_v48, %v330_v32  ;;  %v450_v61 = vrot.slane %v448_v44, 4  ;;  %v451_v63 = vshll.u32 %v226_v25, 16  ;;  %1031 = vmatpush.bf16.msrb.mxu1 %v5449_v0 }
  0x55   : > { %v344_v1 = vor.u32 %v343_v19, %v339_v49  ;;  %v457_v3 = vshll.u32 %v6238_v52, 16  ;;  %v461_v5 = vshrl.u32 %v6238_v52, 16  ;;  %v467_v6 = vshll.u32 %v6241_v53, 16  ;;  %829 = vmatmul.bf16.gmra.mxu1 %v717_v20  ;;  %849 = vmatmul.bf16.gmra.mxu2 %v721_v46  ;;  %v218_v46 = vld [vmem:[%s5993_s11 + $0x24] sm:$0xf] }
  0x56   : > { %v725_v7 = vpack.c.b16 %v708_v58, %v707_v12  ;;  %v335_v8 = vrot.slane %v334_v60, 4  ;;  %v453_v9 = vrot.slane %v451_v63, 5  ;;  %v544_v11 = vshrl.u32 %v234_v55, 16  ;;  %3138 = vmatpush.bf16.msra.mxu2 %v5536_v47 }
  0x57   : > { %v345_v13 = vrot.slane %v344_v1, 4  ;;  %v459_v14 = vrot.slane %v457_v3, 5  ;;  %v463_v15 = vrot.slane %v461_v5, 4  ;;  %v469_v17 = vrot.slane %v467_v6, 5  ;;  %2406 = vmatpush.bf16.msrb.mxu0 %v5497_v18  ;;  %v5544_v6 = vld [vmem:[%s7447_s1 + $0x1f8] sm:$0xff] }
  0x58   : > { %869 = vmatmul.bf16.gmra.mxu3 %v725_v7  ;;  %v340_v50 = vsel %vm6008_vm2, %v335_v8, %v339_v49  ;;  %v454_v51 = vor.u32 %v453_v9, %v450_v61  ;;  %v546_v20 = vrot.slane %v544_v11, 4  ;;  %v547_v21 = vshll.u32 %v234_v55, 16  ;;  %v6279_v61 = vld [vmem:[%s5993_s11 + $0x28] sm:$0xf]  ;;  %v5512_v7 = vld [vmem:[%s7447_s1 + $0x178] sm:$0xff] }
  0x59   : > { %v350_v23 = vsel %vm6008_vm2, %v345_v13, %v349_v31  ;;  %v683_v25 = vunpack.c.l.b16 %v340_v50  ;;  %v464_v26 = vor.u32 %v463_v15, %v459_v14  ;;  %v553_v28 = vshll.u32 %v235_v10, 16  ;;  %v5552_v8 = vld [vmem:[%s7447_s1 + $0x238] sm:$0xff]  ;;  %3819 = vmatpush.bf16.msra.mxu3 %v5544_v6  ;;  %2824 = vmatpush.bf16.msra.mxu1 %v5512_v7 }
  0x5a   : > { %v684_v29 = vunpack.c.l.b16 %v350_v23  ;;  %v455_v32 = vrot.slane %v454_v51, 4  ;;  %v549_v33 = vrot.slane %v547_v21, 5  ;;  %v557_v34 = vshrl.u32 %v235_v10, 16 }
  0x5b   : > { %v465_v36 = vrot.slane %v464_v26, 4  ;;  %v555_v37 = vrot.slane %v553_v28, 5  ;;  %v563_v38 = vshll.u32 %v271_v16, 16  ;;  %v640_v40 = vshrl.u32 %v242_v22, 16  ;;  %4244 = vmatpush.bf16.msra.mxu0 %v5552_v8  ;;  %v1113_v26 = vld [vmem:[%s5993_s11] sm:$0xe] }
  0x5c   : > { %v713_v41 = vpack.c.b16 %v684_v29, %v683_v25  ;;  %v460_v42 = vsel %vm6008_vm2, %v455_v32, %v459_v14  ;;  %v550_v43 = vor.u32 %v549_v33, %v546_v20  ;;  %v559_v44 = vrot.slane %v557_v34, 4  ;;  %v6293_v14 = vld [vmem:[%s5993_s11 + $0x2c] sm:$0x1] }
  0x5d   : > { %v470_v48 = vsel %vm6008_vm2, %v465_v36, %v469_v17  ;;  %v693_v49 = vunpack.c.l.b16 %v460_v42  ;;  %v565_v54 = vrot.slane %v563_v38, 5  ;;  %v642_v12 = vrot.slane %v640_v40, 4  ;;  %v5012_v38 = vld [vmem:[%s5993_s11 + $0xc] sm:$0xf] }
  0x5e   : > { %809 = vmatmul.bf16.gmra.mxu0 %v713_v41  ;;  %v694_v19 = vunpack.c.l.b16 %v470_v48  ;;  %v551_v31 = vrot.slane %v550_v43, 4  ;;  %v560_v55 = vor.u32 %v559_v44, %v555_v37  ;;  %v643_v56 = vshll.u32 %v242_v22, 16 }
  0x5f   : > { %v649_v57 = vshll.u32 %v243_v39, 16  ;;  %v653_v58 = vshrl.u32 %v243_v39, 16  ;;  %v659_v60 = vshll.u32 %v275_v45, 16  ;;  %v352_v63 = vshrl.u32 %v218_v46, 16  ;;  %v5013_v39 = vld [vmem:[%s5993_s11 + $0x10] sm:$0xf] }
  0x60   : > { %v718_v0 = vpack.c.b16 %v694_v19, %v693_v49  ;;  %v556_v1 = vsel %vm6008_vm2, %v551_v31, %v555_v37  ;;  %v561_v3 = vrot.slane %v560_v55, 4  ;;  %v645_v5 = vrot.slane %v643_v56, 5 }
  0x61   : > { %v701_v9 = vunpack.c.l.b16 %v556_v1  ;;  %v651_v10 = vrot.slane %v649_v57, 5  ;;  %v655_v11 = vrot.slane %v653_v58, 4  ;;  %v661_v13 = vrot.slane %v659_v60, 5  ;;  %v5014_v58 = vld [vmem:[%s5993_s11 + $0x14] sm:$0x1] }
  0x62   : > { %v566_v15 = vsel %vm6008_vm2, %v561_v3, %v565_v54  ;;  %v646_v17 = vor.u32 %v645_v5, %v642_v12  ;;  %v354_v18 = vrot.slane %v352_v63, 4  ;;  %v355_v50 = vshll.u32 %v218_v46, 16 }
  0x63   : > { %v702_v51 = vunpack.c.l.b16 %v566_v15  ;;  %v656_v16 = vor.u32 %v655_v11, %v651_v10  ;;  %v361_v20 = vshll.u32 %v6279_v61, 16  ;;  %v365_v21 = vshrl.u32 %v6279_v61, 16 }
  0x64   : > { %v647_v22 = vrot.slane %v646_v17, 4  ;;  %v357_v23 = vrot.slane %v355_v50, 5  ;;  %v371_v25 = vshll.u32 %v6293_v14, 16  ;;  %v4836_v44 = vrot.slane %v1113_v26, 9  ;;  %v5015_v50 = vld [vmem:[%s5993_s11 + $0x18] sm:$0xf] }
  0x65   : > { %v722_v28 = vpack.c.b16 %v702_v51, %v701_v9  ;;  %v657_v29 = vrot.slane %v656_v16, 4  ;;  %v363_v32 = vrot.slane %v361_v20, 5  ;;  %v367_v33 = vrot.slane %v365_v21, 4  ;;  %834 = vmatmul.bf16.gmra.mxu1 %v718_v0  ;;  %v5433_v51 = vld [vmem:[%s5993_s11] sm:$0xff]  ;;  %v5016_v16 = vld [vmem:[%s5993_s11 + $0x1c] sm:$0xf] }
  0x66   : > { %v652_v34 = vsel %vm6008_vm2, %v647_v22, %v651_v10  ;;  %v358_v36 = vor.u32 %v357_v23, %v354_v18  ;;  %v373_v37 = vrot.slane %v371_v25, 5  ;;  %v1166_v47 = vrot.slane %v6033_v62, 5  ;;  %v1114_v21 = vld [vmem:[%s5993_s11 + $0xc] sm:$0xe] }
  0x67   : > { %854 = vmatmul.bf16.gmra.mxu2 %v722_v28  ;;  %v662_v40 = vsel %vm6008_vm2, %v657_v29, %v661_v13  ;;  %v709_v41 = vunpack.c.l.b16 %v652_v34  ;;  %v368_v42 = vor.u32 %v367_v33, %v363_v32  ;;  %v1169_v48 = vrot.slane %v6040_v4, 5  ;;  %v5473_v34 = vld [vmem:[%s5993_s11 + $0xc] sm:$0xff] }
  0x68   : > { %v710_v45 = vunpack.c.l.b16 %v662_v40  ;;  %v359_v46 = vrot.slane %v358_v36, 4  ;;  %v1888_v54 = vshrl.u32 %v5012_v38, 16  ;;  %v1891_v12 = vshll.u32 %v5012_v38, 16 }
  0x69   : > { %v369_v49 = vrot.slane %v368_v42, 4  ;;  %v1897_v19 = vshll.u32 %v5013_v39, 16  ;;  %v1167_v56 = vsel %vm6308_vm5, %v4836_v44, %v1166_v47  ;;  %v1168_v57 = vrot.slane %v1166_v47, 4  ;;  %v5017_v44 = vld [vmem:[%s5993_s11 + $0x20] sm:$0x1] }
  0x6a   : > { %v726_v31 = vpack.c.b16 %v710_v45, %v709_v41  ;;  %v364_v55 = vsel %vm6008_vm2, %v359_v46, %v363_v32  ;;  %v1292_v62 = vunpack.c.l.b16 %v1167_v56  ;;  %v1890_v0 = vrot.slane %v1888_v54, 4  ;;  %v5511_v56 = vld [vmem:[%s7447_s1 + $0x170] sm:$0xff] }
  0x6b   : > { %v374_v60 = vsel %vm6008_vm2, %v369_v49, %v373_v37  ;;  %v685_v63 = vunpack.c.l.b16 %v364_v55  ;;  %v1170_v1 = vsel %vm6308_vm5, %v1168_v57, %v1169_v48  ;;  %v1893_v3 = vrot.slane %v1891_v12, 5  ;;  %v5535_v48 = vld [vmem:[%s7447_s1 + $0x1b0] sm:$0xff]  ;;  %2825 = vmatpush.bf16.msra.mxu1 %v5511_v56 }
  0x6c   : > { %874 = vmatmul.bf16.gmra.mxu3 %v726_v31  ;;  %v686_v4 = vunpack.c.l.b16 %v374_v60  ;;  %v1293_v5 = vunpack.c.l.b16 %v1170_v1  ;;  %v1899_v6 = vrot.slane %v1897_v19, 5  ;;  %v1901_v7 = vshrl.u32 %v5013_v39, 16  ;;  %3139 = vmatpush.bf16.msra.mxu2 %v5535_v48  ;;  %v5018_v31 = vld [vmem:[%s5993_s11 + $0x24] sm:$0xf]  ;;  %v5543_v55 = vld [vmem:[%s7447_s1 + $0x1f0] sm:$0xff] }
  0x6d   : > { %v1907_v8 = vshll.u32 %v5014_v58, 16  ;;  %v1894_v10 = vor.u32 %v1893_v3, %v1890_v0  ;;  %v1173_v22 = vrot.slane %v6112_v27, 5  ;;  %v1912_v23 = vshrl.u32 %v5015_v50, 16  ;;  %v5551_v57 = vld [vmem:[%s7447_s1 + $0x230] sm:$0xff]  ;;  %3820 = vmatpush.bf16.msra.mxu3 %v5543_v55  ;;  %v1116_v48 = vld [vmem:[%s5993_s11 + $0x24] sm:$0xe] }
  0x6e   : > { %v714_v9 = vpack.c.b16 %v686_v4, %v685_v63  ;;  %v1324_v11 = vpack.c.b16 %v1293_v5, %v1292_v62  ;;  %v1903_v13 = vrot.slane %v1901_v7, 4  ;;  %v1915_v25 = vshll.u32 %v5015_v50, 16  ;;  %v5019_v62 = vld [vmem:[%s5993_s11 + $0x28] sm:$0xf]  ;;  %v5434_v0 = vld [vmem:[%s5993_s11 + $0xc] sm:$0xff]  ;;  %4245 = vmatpush.bf16.msra.mxu0 %v5551_v57 }
  0x6f   : > { %v1895_v15 = vrot.slane %v1894_v10, 4  ;;  %v1909_v18 = vrot.slane %v1907_v8, 5  ;;  %v1921_v29 = vshll.u32 %v5016_v16, 16  ;;  %v1925_v32 = vshrl.u32 %v5016_v16, 16 }
  0x70   : > { %814 = vmatmul.bf16.gmra.mxu0 %v714_v9  ;;  %v1904_v17 = vor.u32 %v1903_v13, %v1899_v6  ;;  %v4837_v33 = vrot.slane %v1114_v21, 9  ;;  %v1175_v38 = vrot.slane %v1173_v22, 4  ;;  %v1176_v27 = vrot.slane %v6122_v35, 5  ;;  %v5020_v21 = vld [vmem:[%s5993_s11 + $0x2c] sm:$0x1] }
  0x71   : > { %v1900_v26 = vsel %vm6008_vm2, %v1895_v15, %v1899_v6  ;;  %v1914_v39 = vrot.slane %v1912_v23, 4  ;;  %v1917_v40 = vrot.slane %v1915_v25, 5  ;;  %v1923_v41 = vrot.slane %v1921_v29, 5  ;;  %v1115_v6 = vld [vmem:[%s5993_s11 + $0x18] sm:$0xe] }
  0x72   : > { %v1905_v20 = vrot.slane %v1904_v17, 4  ;;  %v2287_v36 = vunpack.c.l.b16 %v1900_v26  ;;  %v1927_v42 = vrot.slane %v1925_v32, 4  ;;  %v1174_v46 = vsel %vm6308_vm5, %v4837_v33, %v1173_v22 }
  0x73   : > { %v1177_v47 = vsel %vm6308_vm5, %v1175_v38, %v1176_v27  ;;  %v1918_v35 = vor.u32 %v1917_v40, %v1914_v39  ;;  %v1931_v54 = vshll.u32 %v5017_v44, 16  ;;  %v1294_v12 = vunpack.c.l.b16 %v1174_v46  ;;  %v5022_v38 = vld [vmem:[%s5993_s11 + $0x34] sm:$0xf]  ;;  %v5435_v27 = vld [vmem:[%s5993_s11 + $0x18] sm:$0xff] }
  0x74   : > { %v1910_v28 = vsel %vm6008_vm2, %v1905_v20, %v1909_v18  ;;  %v1928_v49 = vor.u32 %v1927_v42, %v1923_v41  ;;  %v1295_v19 = vunpack.c.l.b16 %v1177_v47  ;;  %v1180_v1 = vrot.slane %v6209_v59, 5  ;;  %v5474_v18 = vld [vmem:[%s5993_s11 + $0x18] sm:$0xff] }
  0x75   : > { %1032 = vmatmul.bf16.vlgmr.msrb.gmra.mxu1 %v5433_v51  ;;  %v2288_v37 = vunpack.c.l.b16 %v1910_v28  ;;  %v1919_v58 = vrot.slane %v1918_v35, 4  ;;  %v1933_v63 = vrot.slane %v1931_v54, 5  ;;  %v1936_v3 = vshrl.u32 %v5018_v31, 16 }
  0x76   : > { %v1929_v60 = vrot.slane %v1928_v49, 4  ;;  %v1325_v4 = vpack.c.b16 %v1295_v19, %v1294_v12  ;;  %v1939_v5 = vshll.u32 %v5018_v31, 16  ;;  %v1945_v7 = vshll.u32 %v5019_v62, 16  ;;  %v5475_v31 = vld [vmem:[%s5993_s11 + $0x24] sm:$0xff] }
  0x77   : > { %1412 = vmatmul.bf16.vlgmr.msrb.gmra.mxu2 %v1324_v11  ;;  %v2319_v45 = vpack.c.b16 %v2288_v37, %v2287_v36  ;;  %v1949_v8 = vshrl.u32 %v5019_v62, 16  ;;  %v1924_v9 = vsel %vm6008_vm2, %v1919_v58, %v1923_v41  ;;  %v1183_v11 = vrot.slane %v6215_v24, 5  ;;  %v5021_v37 = vld [vmem:[%s5993_s11 + $0x30] sm:$0xf] }
  0x78   : > { %v1934_v10 = vsel %vm6008_vm2, %v1929_v60, %v1933_v63  ;;  %v4838_v13 = vrot.slane %v1115_v6, 9  ;;  %v1182_v59 = vrot.slane %v1180_v1, 4  ;;  %v1938_v15 = vrot.slane %v1936_v3, 4  ;;  %v5024_v6 = vld [vmem:[%s5993_s11 + $0x3c] sm:$0xf] }
  0x79   : > { %v1941_v17 = vrot.slane %v1939_v5, 5  ;;  %v2289_v50 = vunpack.c.l.b16 %v1924_v9  ;;  %v2290_v51 = vunpack.c.l.b16 %v1934_v10  ;;  %v1947_v16 = vrot.slane %v1945_v7, 5  ;;  %v5025_v7 = vld [vmem:[%s5993_s11 + $0x40] sm:$0xf] }
  0x7a   : > { %v1951_v20 = vrot.slane %v1949_v8, 4  ;;  %v1181_v22 = vsel %vm6308_vm5, %v4838_v13, %v1180_v1  ;;  %v1184_v25 = vsel %vm6308_vm5, %v1182_v59, %v1183_v11  ;;  %v1955_v28 = vshll.u32 %v5020_v21, 16  ;;  %v5534_v1 = vld [vmem:[%s7447_s1 + $0x1a8] sm:$0xff]  ;;  %v5725_v21 = vld [vmem:[%s5993_s11 + $0x34] sm:$0xf] }
  0x7b   : > { %v1942_v23 = vor.u32 %v1941_v17, %v1938_v15  ;;  %v2320_v24 = vpack.c.b16 %v2290_v51, %v2289_v50  ;;  %v1296_v29 = vunpack.c.l.b16 %v1181_v22  ;;  %v1297_v32 = vunpack.c.l.b16 %v1184_v25  ;;  %3140 = vmatpush.bf16.msra.mxu2 %v5534_v1  ;;  %v5542_v11 = vld [vmem:[%s7447_s1 + $0x1e8] sm:$0xff]  ;;  %v1118_v1 = vld [vmem:[%s5993_s11 + $0x3c] sm:$0xe] }
  0x7c   : > { %1726 = vmatmul.bf16.vlgmr.msrb.gmra.mxu3 %v5473_v34  ;;  %v1952_v26 = vor.u32 %v1951_v20, %v1947_v16  ;;  %v1957_v36 = vrot.slane %v1955_v28, 5  ;;  %v1960_v41 = vshrl.u32 %v5021_v37, 16  ;;  %v1963_v42 = vshll.u32 %v5021_v37, 16  ;;  %v5510_v13 = vld [vmem:[%s7447_s1 + $0x168] sm:$0xff]  ;;  %v5726_v37 = vld [vmem:[%s5993_s11 + $0x38] sm:$0x1] }
  0x7d   : > { %v1943_v33 = vrot.slane %v1942_v23, 4  ;;  %v1326_v39 = vpack.c.b16 %v1297_v32, %v1296_v29  ;;  %v1969_v46 = vshll.u32 %v5022_v38, 16  ;;  %v1973_v47 = vshrl.u32 %v5022_v38, 16  ;;  %v5550_v59 = vld [vmem:[%s7447_s1 + $0x228] sm:$0xff]  ;;  %3821 = vmatpush.bf16.msra.mxu3 %v5542_v11  ;;  %2826 = vmatpush.bf16.msra.mxu1 %v5510_v13  ;;  %v5728_v13 = vld [vmem:[%s5993_s11 + $0x44] sm:$0x1] }
  0x7e   : > { %v1953_v34 = vrot.slane %v1952_v26, 4  ;;  %v1190_v54 = vrot.slane %v6293_v14, 5  ;;  %v1962_v12 = vrot.slane %v1960_v41, 4  ;;  %v1965_v19 = vrot.slane %v1963_v42, 5  ;;  %v5436_v15 = vld [vmem:[%s5993_s11 + $0x24] sm:$0xff]  ;;  %4246 = vmatpush.bf16.msra.mxu0 %v5550_v59 }
  0x7f   : > { %v1948_v40 = vsel %vm6008_vm2, %v1943_v33, %v1947_v16  ;;  %v4839_v55 = vrot.slane %v1116_v48, 9  ;;  %v1971_v57 = vrot.slane %v1969_v46, 5  ;;  %v1975_v58 = vrot.slane %v1973_v47, 4  ;;  %v5476_v33 = vld [vmem:[%s5993_s11 + $0x30] sm:$0xff] }
  0x80   : > { %2407 = vmatmul.bf16.vlgmr.msrb.gmra.mxu0 %v2319_v45  ;;  %v1958_v44 = vsel %vm6008_vm2, %v1953_v34, %v1957_v36  ;;  %v1187_v45 = vrot.slane %v6279_v61, 5  ;;  %v2291_v35 = vunpack.c.l.b16 %v1948_v40  ;;  %v5023_v61 = vld [vmem:[%s5993_s11 + $0x38] sm:$0x1]  ;;  %v1966_v63 = vor.u32 %v1965_v19, %v1962_v12  ;;  %v5027_v12 = vld [vmem:[%s5993_s11 + $0x48] sm:$0xf] }
  0x81   : > { %v2292_v49 = vunpack.c.l.b16 %v1958_v44  ;;  %v1976_v14 = vor.u32 %v1975_v58, %v1971_v57  ;;  %v1984_v17 = vshrl.u32 %v5024_v6, 16  ;;  %v1993_v51 = vshll.u32 %v5025_v7, 16  ;;  %v5028_v19 = vld [vmem:[%s5993_s11 + $0x4c] sm:$0xf] }
  0x82   : > { %v1189_v56 = vrot.slane %v1187_v45, 4  ;;  %v1188_v62 = vsel %vm6308_vm5, %v4839_v55, %v1187_v45  ;;  %v1967_v8 = vrot.slane %v1966_v63, 4  ;;  %v1194_v22 = vrot.slane %v5725_v21, 5 }
  0x83   : > { %v2321_v60 = vpack.c.b16 %v2292_v49, %v2291_v35  ;;  %v1298_v3 = vunpack.c.l.b16 %v1188_v62  ;;  %v1977_v9 = vrot.slane %v1976_v14, 4  ;;  %v1997_v23 = vshrl.u32 %v5025_v7, 16  ;;  %v5727_v62 = vld [vmem:[%s5993_s11 + $0x40] sm:$0xf] }
  0x84   : > { %v1972_v16 = vsel %vm6008_vm2, %v1967_v8, %v1971_v57  ;;  %v1986_v25 = vrot.slane %v1984_v17, 4  ;;  %v1995_v32 = vrot.slane %v1993_v51, 5  ;;  %v1196_v36 = vrot.slane %v1194_v22, 4 }
  0x85   : > { %1037 = vmatmul.bf16.gmra.mxu1 %v5434_v0  ;;  %v1191_v0 = vsel %vm6308_vm5, %v1189_v56, %v1190_v54  ;;  %v2293_v28 = vunpack.c.l.b16 %v1972_v16  ;;  %v1197_v38 = vrot.slane %v5726_v37, 5  ;;  %v2008_v58 = vshrl.u32 %v5027_v12, 16  ;;  %v5031_v37 = vld [vmem:[%s5993_s11 + $0x58] sm:$0xf] }
  0x86   : > { %v1299_v5 = vunpack.c.l.b16 %v1191_v0  ;;  %v1201_v0 = vrot.slane %v5727_v62, 5  ;;  %v2021_v14 = vshrl.u32 %v5028_v19, 16  ;;  %v1204_v59 = vrot.slane %v5728_v13, 5 }
  0x87   : > { %1417 = vmatmul.bf16.gmra.mxu2 %v1325_v4  ;;  %v1979_v4 = vshll.u32 %v5023_v61, 16  ;;  %v1198_v44 = vsel %vm6308_vm5, %v1196_v36, %v1197_v38  ;;  %v2011_v61 = vshll.u32 %v5027_v12, 16  ;;  %v5541_v38 = vld [vmem:[%s7447_s1 + $0x1e0] sm:$0xff]  ;;  %v2045_v12 = vshrl.u32 %v5031_v37, 16 }
  0x88   : > { %v1327_v50 = vpack.c.b16 %v1299_v5, %v1298_v3  ;;  %v1301_v35 = vunpack.c.l.b16 %v1198_v44  ;;  %v1203_v11 = vrot.slane %v1201_v0, 4  ;;  %3822 = vmatpush.bf16.msra.mxu3 %v5541_v38 }
  0x89   : > { %v1981_v10 = vrot.slane %v1979_v4, 5  ;;  %v2013_v7 = vrot.slane %v2011_v61, 5 }
  0x8b   : > { %v1982_v20 = vsel %vm6008_vm2, %v1977_v9, %v1981_v10  ;;  %v5477_v9 = vld [vmem:[%s5993_s11 + $0x3c] sm:$0xff]  ;;  %v4841_v10 = vrot.slane %v1118_v1, 9 }
  0x8c   : > { %1731 = vmatmul.bf16.gmra.mxu3 %v5474_v18  ;;  %v1987_v18 = vshll.u32 %v5024_v6, 16  ;;  %v2294_v29 = vunpack.c.l.b16 %v1982_v20  ;;  %v2010_v6 = vrot.slane %v2008_v58, 4 }
  0x8d   : > { %v1202_v21 = vsel %vm6308_vm5, %v4841_v10, %v1201_v0 }
  0x8e   : > { %v1989_v26 = vrot.slane %v1987_v18, 5  ;;  %v2322_v41 = vpack.c.b16 %v2294_v29, %v2293_v28  ;;  %v5029_v18 = vld [vmem:[%s5993_s11 + $0x50] sm:$0x1]  ;;  %v2014_v20 = vor.u32 %v2013_v7, %v2010_v6  ;;  %v1302_v28 = vunpack.c.l.b16 %v1202_v21 }
  0x90   : > { %2412 = vmatmul.bf16.gmra.mxu0 %v2320_v24  ;;  %v1117_v24 = vld [vmem:[%s5993_s11 + $0x30] sm:$0xe]  ;;  %v1990_v40 = vor.u32 %v1989_v26, %v1986_v25  ;;  %v5533_v25 = vld [vmem:[%s7447_s1 + $0x1a0] sm:$0xff] }
  0x91   : > { %v4840_v34 = vrot.slane %v1117_v24, 9  ;;  %v2027_v24 = vshll.u32 %v5029_v18, 16  ;;  %3141 = vmatpush.bf16.msra.mxu2 %v5533_v25 }
  0x92   : > { %v1991_v47 = vrot.slane %v1990_v40, 4 }
  0x93   : > { %v1195_v42 = vsel %vm6308_vm5, %v4840_v34, %v1194_v22  ;;  %v1205_v22 = vsel %vm6308_vm5, %v1203_v11, %v1204_v59  ;;  %v2029_v36 = vrot.slane %v2027_v24, 5 }
  0x94   : > { %v1300_v48 = vunpack.c.l.b16 %v1195_v42  ;;  %v1996_v55 = vsel %vm6008_vm2, %v1991_v47, %v1995_v32  ;;  %v1303_v29 = vunpack.c.l.b16 %v1205_v22  ;;  %v2041_v47 = vshll.u32 %v5031_v37, 16  ;;  %v5033_v22 = vld [vmem:[%s5993_s11 + $0x60] sm:$0xf] }
  0x95   : > { %1042 = vmatmul.bf16.gmra.mxu1 %v5435_v27  ;;  %v1999_v27 = vrot.slane %v1997_v23, 4  ;;  %v2295_v3 = vunpack.c.l.b16 %v1996_v55  ;;  %v2059_v37 = vshll.u32 %v5033_v22, 16 }
  0x96   : > { %v1328_v57 = vpack.c.b16 %v1301_v35, %v1300_v48  ;;  %v5549_v48 = vld [vmem:[%s7447_s1 + $0x220] sm:$0xff] }
  0x97   : > { %1422 = vmatmul.bf16.gmra.mxu2 %v1326_v39  ;;  %v5026_v39 = vld [vmem:[%s5993_s11 + $0x44] sm:$0x1]  ;;  %v2000_v45 = vor.u32 %v1999_v27, %v1995_v32  ;;  %v2015_v32 = vrot.slane %v2014_v20, 4  ;;  %4247 = vmatpush.bf16.msra.mxu0 %v5549_v48 }
  0x98   : > { %v2003_v46 = vshll.u32 %v5026_v39, 16  ;;  %v5509_v27 = vld [vmem:[%s7447_s1 + $0x160] sm:$0xff] }
  0x99   : > { %v2001_v49 = vrot.slane %v2000_v45, 4  ;;  %2827 = vmatpush.bf16.msra.mxu1 %v5509_v27 }
  0x9a   : > { %v2005_v54 = vrot.slane %v2003_v46, 5  ;;  %v1329_v46 = vpack.c.b16 %v1303_v29, %v1302_v28  ;;  %v5439_v29 = vld [vmem:[%s5993_s11 + $0x48] sm:$0xff] }
  0x9c   : > { %1736 = vmatmul.bf16.gmra.mxu3 %v5475_v31  ;;  %v5437_v31 = vld [vmem:[%s5993_s11 + $0x30] sm:$0xff]  ;;  %v2006_v63 = vsel %vm6008_vm2, %v2001_v49, %v2005_v54  ;;  %v1208_v54 = vrot.slane %v6151_v2, 5 }
  0x9d   : > { %v2296_v5 = vunpack.c.l.b16 %v2006_v63  ;;  %v5478_v63 = vld [vmem:[%s5993_s11 + $0x48] sm:$0xff] }
  0x9e   : > { %v1210_v0 = vrot.slane %v1208_v54, 4 }
  0x9f   : > { %v2323_v51 = vpack.c.b16 %v2296_v5, %v2295_v3  ;;  %v2047_v3 = vrot.slane %v2045_v12, 4  ;;  %v5032_v5 = vld [vmem:[%s5993_s11 + $0x5c] sm:$0x1] }
  0xa0   : > { %2417 = vmatmul.bf16.gmra.mxu0 %v2321_v60  ;;  %v2017_v60 = vshll.u32 %v5028_v19, 16  ;;  %v1119_v19 = vld [vmem:[%s5993_s11 + $0x48] sm:$0xe]  ;;  %v2051_v59 = vshll.u32 %v5032_v5, 16  ;;  %v5532_v5 = vld [vmem:[%s7447_s1 + $0x198] sm:$0xff] }
  0xa1   : > { %v4842_v62 = vrot.slane %v1119_v19, 9  ;;  %3142 = vmatpush.bf16.msra.mxu2 %v5532_v5 }
  0xa2   : > { %v2019_v8 = vrot.slane %v2017_v60, 5  ;;  %v2043_v60 = vrot.slane %v2041_v47, 5  ;;  %v2053_v21 = vrot.slane %v2051_v59, 5  ;;  %v5036_v59 = vld [vmem:[%s5993_s11 + $0x6c] sm:$0xf] }
  0xa3   : > { %v1209_v10 = vsel %vm6308_vm5, %v4842_v62, %v1208_v54  ;;  %v5479_v54 = vld [vmem:[%s5993_s11 + $0x54] sm:$0xff] }
  0xa4   : > { %v2020_v35 = vsel %vm6008_vm2, %v2015_v32, %v2019_v8  ;;  %v2048_v13 = vor.u32 %v2047_v3, %v2043_v60  ;;  %v1304_v18 = vunpack.c.l.b16 %v1209_v10 }
  0xa5   : > { %1047 = vmatmul.bf16.gmra.mxu1 %v5436_v15  ;;  %v2023_v15 = vrot.slane %v2021_v14, 4  ;;  %v2297_v58 = vunpack.c.l.b16 %v2020_v35  ;;  %v5729_v14 = vld [vmem:[%s5993_s11 + $0x50] sm:$0x1]  ;;  %v2061_v35 = vrot.slane %v2059_v37, 5  ;;  %v5730_v37 = vld [vmem:[%s5993_s11 + $0x64] sm:$0xf] }
  0xa6   : > { %v1211_v1 = vrot.slane %v5729_v14, 5  ;;  %v2049_v20 = vrot.slane %v2048_v13, 4 }
  0xa7   : > { %1427 = vmatmul.bf16.gmra.mxu2 %v1327_v50  ;;  %v2024_v23 = vor.u32 %v2023_v15, %v2019_v8 }
  0xa8   : > { %v1212_v11 = vsel %vm6308_vm5, %v1210_v0, %v1211_v1  ;;  %v2054_v27 = vsel %vm6008_vm2, %v2049_v20, %v2053_v21  ;;  %v5440_v20 = vld [vmem:[%s5993_s11 + $0x54] sm:$0xff]  ;;  %v5037_v21 = vld [vmem:[%s5993_s11 + $0x70] sm:$0xf] }
  0xa9   : > { %v2025_v34 = vrot.slane %v2024_v23, 4  ;;  %v5034_v23 = vld [vmem:[%s5993_s11 + $0x64] sm:$0xf]  ;;  %v2300_v47 = vunpack.c.l.b16 %v2054_v27  ;;  %v2083_v27 = vshll.u32 %v5036_v59, 16 }
  0xaa   : > { %v2065_v38 = vshll.u32 %v5034_v23, 16 }
  0xab   : > { %v2030_v49 = vsel %vm6008_vm2, %v2025_v34, %v2029_v36  ;;  %v2056_v36 = vshrl.u32 %v5033_v22, 16 }
  0xac   : > { %1741 = vmatmul.bf16.gmra.mxu3 %v5476_v33  ;;  %v5030_v33 = vld [vmem:[%s5993_s11 + $0x54] sm:$0xf]  ;;  %v2298_v61 = vunpack.c.l.b16 %v2030_v49  ;;  %v2067_v49 = vrot.slane %v2065_v38, 5  ;;  %v1222_v38 = vrot.slane %v5730_v37, 5 }
  0xad   : > { %v2032_v42 = vshrl.u32 %v5030_v33, 16  ;;  %v2035_v44 = vshll.u32 %v5030_v33, 16  ;;  %v2058_v48 = vrot.slane %v2056_v36, 4 }
  0xae   : > { %v2324_v8 = vpack.c.b16 %v2298_v61, %v2297_v58  ;;  %v5035_v61 = vld [vmem:[%s5993_s11 + $0x68] sm:$0x1] }
  0xaf   : > { %v2037_v55 = vrot.slane %v2035_v44, 5  ;;  %v1120_v44 = vld [vmem:[%s5993_s11 + $0x54] sm:$0xe]  ;;  %v2062_v62 = vor.u32 %v2061_v35, %v2058_v48  ;;  %v2075_v3 = vshll.u32 %v5035_v61, 16  ;;  %v2085_v61 = vrot.slane %v2083_v27, 5  ;;  %v5441_v27 = vld [vmem:[%s5993_s11 + $0x60] sm:$0xff] }
  0xb0   : > { %2422 = vmatmul.bf16.gmra.mxu0 %v2322_v41  ;;  %v5438_v41 = vld [vmem:[%s5993_s11 + $0x3c] sm:$0xff]  ;;  %v4843_v12 = vrot.slane %v1120_v44, 9  ;;  %v2089_v44 = vshll.u32 %v5037_v21, 16 }
  0xb1   : > { %v2063_v10 = vrot.slane %v2062_v62, 4  ;;  %v2077_v13 = vrot.slane %v2075_v3, 5 }
  0xb2   : > { %v6416_v56 = vpop.f32.mrf.mxu1 }
  0xb5   : > { %v6421_v4 = vpop.f32.mrf.mxu0  ;;  %1052 = vmatmul.bf16.gmra.mxu1 %v5437_v31  ;;  %v2034_v31 = vrot.slane %v2032_v42, 4  ;;  %v2069_v42 = vshrl.u32 %v5034_v23, 16 }
  0xb7   : > { %1432 = vmatmul.bf16.gmra.mxu2 %v1328_v57  ;;  %v2038_v7 = vor.u32 %v2037_v55, %v2034_v31  ;;  %v1218_v31 = vrot.slane %v6241_v53, 5  ;;  %v2071_v55 = vrot.slane %v2069_v42, 4  ;;  %v1121_v42 = vld [vmem:[%s5993_s11 + $0x60] sm:$0xe] }
  0xb8   : > { %v6426_v17 = vpop.f32.mrf.mxu2 }
  0xb9   : > { %v6429_v50 = vpop.f32.mrf.mxu3  ;;  %v2039_v15 = vrot.slane %v2038_v7, 4  ;;  %v2072_v1 = vor.u32 %v2071_v55, %v2067_v49 }
  0xba   : > { %v6431_v16 = vpop.f32.mrf.mxu1 }
  0xbb   : > { %v2044_v32 = vsel %vm6008_vm2, %v2039_v15, %v2043_v60  ;;  %v5540_v15 = vld [vmem:[%s7447_s1 + $0x1d8] sm:$0xff] }
  0xbc   : > { %1746 = vmatmul.bf16.gmra.mxu3 %v5477_v9 }
  0xbd   : > { %v6440_v26 = vpop.f32.mrf.mxu0  ;;  %3823 = vmatpush.bf16.msra.mxu3 %v5540_v15 }
  0xc0   : > { %2427 = vmatmul.bf16.gmra.mxu0 %v2323_v51  ;;  %v6450_v39 = vpop.f32.mrf.mxu2  ;;  %v1305_v51 = vunpack.c.l.b16 %v1212_v11  ;;  %v2073_v11 = vrot.slane %v2072_v1, 4 }
  0xc1   : > { %v6452_v40 = vpop.f32.mrf.mxu3 }
  0xc2   : > { %v6455_v45 = vpop.f32.mrf.mxu1  ;;  %v1330_v34 = vpack.c.b16 %v1305_v51, %v1304_v18  ;;  %v5508_v18 = vld [vmem:[%s7447_s1 + $0x158] sm:$0xff]  ;;  %v2078_v36 = vsel %vm6008_vm2, %v2073_v11, %v2077_v13 }
  0xc3   : > { %2828 = vmatpush.bf16.msra.mxu1 %v5508_v18  ;;  %v2302_v35 = vunpack.c.l.b16 %v2078_v36 }
  0xc5   : > { %1057 = vmatmul.bf16.gmra.mxu1 %v5438_v41  ;;  %v1215_v41 = vrot.slane %v6238_v52, 5 }
  0xc7   : > { %v6466_v57 = vpop.f32.mrf.mxu0  ;;  %1437 = vmatmul.bf16.gmra.mxu2 %v1329_v46  ;;  %v2299_v46 = vunpack.c.l.b16 %v2044_v32  ;;  %v1217_v19 = vrot.slane %v1215_v41, 4  ;;  %v1216_v14 = vsel %vm6308_vm5, %v4843_v12, %v1215_v41  ;;  %v4844_v12 = vrot.slane %v1121_v42, 9 }
  0xc8   : > { %v6470_v2 = vpop.f32.mrf.mxu2  ;;  %v1306_v7 = vunpack.c.l.b16 %v1216_v14 }
  0xc9   : > { %v6473_v6 = vpop.f32.mrf.mxu3  ;;  %v2325_v60 = vpack.c.b16 %v2300_v47, %v2299_v46  ;;  %v1219_v53 = vsel %vm6308_vm5, %v1217_v19, %v1218_v31  ;;  %v2093_v46 = vshrl.u32 %v5037_v21, 16  ;;  %v5548_v47 = vld [vmem:[%s7447_s1 + $0x218] sm:$0xff]  ;;  %v1224_v19 = vrot.slane %v1222_v38, 4  ;;  %v5731_v31 = vld [vmem:[%s5993_s11 + $0x68] sm:$0x1] }
  0xca   : > { %v6475_v9 = vpop.f32.mrf.mxu1  ;;  %4248 = vmatpush.bf16.msra.mxu0 %v5548_v47  ;;  %v1225_v55 = vrot.slane %v5731_v31, 5  ;;  %v1223_v5 = vsel %vm6308_vm5, %v4844_v12, %v1222_v38  ;;  %v5040_v21 = vld [vmem:[%s5993_s11 + $0x7c] sm:$0xf]  ;;  %v5732_v47 = vld [vmem:[%s5993_s11 + $0x70] sm:$0xf] }
  0xcb   : > { %v2095_v62 = vrot.slane %v2093_v46, 4  ;;  %v1308_v18 = vunpack.c.l.b16 %v1223_v5  ;;  %v2113_v42 = vshll.u32 %v5040_v21, 16 }
  0xcc   : > { %1751 = vmatmul.bf16.gmra.mxu3 %v5478_v63 }
  0xcf   : > { %v6483_v24 = vpop.f32.mrf.mxu0 }
  0xd0   : > { %2432 = vmatmul.bf16.gmra.mxu0 %v2324_v8  ;;  %v6485_v25 = vpop.f32.mrf.mxu2  ;;  %v1307_v8 = vunpack.c.l.b16 %v1219_v53  ;;  %v5038_v53 = vld [vmem:[%s5993_s11 + $0x74] sm:$0x1] }
  0xd1   : > { %v6487_v28 = vpop.f32.mrf.mxu3  ;;  %v2099_v13 = vshll.u32 %v5038_v53, 16 }
  0xd2   : > { %v6492_v33 = vpop.f32.mrf.mxu1  ;;  %v1331_v23 = vpack.c.b16 %v1307_v8, %v1306_v7  ;;  %v1226_v7 = vsel %vm6308_vm5, %v1224_v19, %v1225_v55 }
  0xd5   : > { %1062 = vmatmul.bf16.gmra.mxu1 %v5439_v29  ;;  %v2080_v29 = vshrl.u32 %v5036_v59, 16  ;;  %v5039_v59 = vld [vmem:[%s5993_s11 + $0x78] sm:$0xf] }
  0xd6   : > { %v2104_v36 = vshrl.u32 %v5039_v59, 16  ;;  %v2107_v37 = vshll.u32 %v5039_v59, 16 }
  0xd7   : > { %1442 = vmatmul.bf16.gmra.mxu2 %v1330_v34  ;;  %v2068_v34 = vsel %vm6008_vm2, %v2063_v10, %v2067_v49  ;;  %v2082_v49 = vrot.slane %v2080_v29, 4 }
  0xd8   : > { %v6500_v58 = vpop.f32.mrf.mxu2  ;;  %v2301_v48 = vunpack.c.l.b16 %v2068_v34  ;;  %v2101_v34 = vrot.slane %v2099_v13, 5  ;;  %v2106_v55 = vrot.slane %v2104_v36, 4  ;;  %v5481_v13 = vld [vmem:[%s5993_s11 + $0x6c] sm:$0xff] }
  0xd9   : > { %v2086_v8 = vor.u32 %v2085_v61, %v2082_v49  ;;  %v2109_v61 = vrot.slane %v2107_v37, 5 }
  0xda   : > { %v6507_v0 = vpop.f32.mrf.mxu1  ;;  %v2326_v1 = vpack.c.b16 %v2302_v35, %v2301_v48  ;;  %v1229_v48 = vrot.slane %v5732_v47, 5  ;;  %v5531_v47 = vld [vmem:[%s7447_s1 + $0x190] sm:$0xff] }
  0xdb   : > { %v6503_v52 = vpop.f32.mrf.mxu0  ;;  %v6505_v63 = vpop.f32.mrf.mxu3  ;;  %3143 = vmatpush.bf16.msra.mxu2 %v5531_v47 }
  0xdc   : > { %1756 = vmatmul.bf16.gmra.mxu3 %v5479_v54  ;;  %v5480_v54 = vld [vmem:[%s5993_s11 + $0x60] sm:$0xff] }
  0xe0   : > { %2437 = vmatmul.bf16.gmra.mxu0 %v2325_v60  ;;  %v6523_v51 = vpop.f32.mrf.mxu2  ;;  %v2091_v60 = vrot.slane %v2089_v44, 5  ;;  %v2117_v44 = vshrl.u32 %v5040_v21, 16 }
  0xe2   : > { %v6529_v32 = vpop.f32.mrf.mxu1  ;;  %v2096_v11 = vor.u32 %v2095_v62, %v2091_v60  ;;  %v2115_v62 = vrot.slane %v2113_v42, 5  ;;  %v2119_v53 = vrot.slane %v2117_v44, 4 }
  0xe3   : > { %v6527_v22 = vpop.f32.mrf.mxu0  ;;  %v6536_v41 = vpop.f32.mrf.mxu3 }
  0xe4   : > { %v2097_v29 = vrot.slane %v2096_v11, 4  ;;  %v5041_v11 = vld [vmem:[%s5993_s11 + $0x80] sm:$0x1]  ;;  %v2120_v21 = vor.u32 %v2119_v53, %v2115_v62  ;;  %v5507_v53 = vld [vmem:[%s7447_s1 + $0x150] sm:$0xff] }
  0xe5   : > { %1067 = vmatmul.bf16.gmra.mxu1 %v5440_v20  ;;  %v1309_v20 = vunpack.c.l.b16 %v1226_v7  ;;  %v5733_v7 = vld [vmem:[%s5993_s11 + $0x74] sm:$0x1] }
  0xe6   : > { %v2102_v31 = vsel %vm6008_vm2, %v2097_v29, %v2101_v34  ;;  %2829 = vmatpush.bf16.msra.mxu1 %v5507_v53 }
  0xe7   : > { %1447 = vmatmul.bf16.gmra.mxu2 %v1331_v23  ;;  %v2087_v23 = vrot.slane %v2086_v8, 4  ;;  %v1332_v46 = vpack.c.b16 %v1309_v20, %v1308_v18  ;;  %v1232_v8 = vrot.slane %v5733_v7, 5  ;;  %v2304_v18 = vunpack.c.l.b16 %v2102_v31  ;;  %v5042_v31 = vld [vmem:[%s5993_s11 + $0x84] sm:$0xf]  ;;  %v5442_v7 = vld [vmem:[%s5993_s11 + $0x6c] sm:$0xff] }
  0xe9   : > { %v2092_v49 = vsel %vm6008_vm2, %v2087_v23, %v2091_v60  ;;  %v1231_v60 = vrot.slane %v1229_v48, 4  ;;  %v2123_v23 = vshll.u32 %v5041_v11, 16 }
  0xea   : > { %v6544_v14 = vpop.f32.mrf.mxu2  ;;  %v6547_v3 = vpop.f32.mrf.mxu1  ;;  %v2303_v59 = vunpack.c.l.b16 %v2092_v49 }
  0xeb   : > { %v1233_v36 = vsel %vm6308_vm5, %v1231_v60, %v1232_v8 }
  0xec   : > { %1761 = vmatmul.bf16.gmra.mxu3 %v5480_v54  ;;  %v1122_v54 = vld [vmem:[%s5993_s11 + $0x6c] sm:$0xe]  ;;  %v2327_v37 = vpack.c.b16 %v2304_v18, %v2303_v59  ;;  %v1311_v49 = vunpack.c.l.b16 %v1233_v36 }
  0xed   : > { %v6553_v10 = vpop.f32.mrf.mxu0  ;;  %v4845_v5 = vrot.slane %v1122_v54, 9  ;;  %v2121_v54 = vrot.slane %v2120_v21, 4 }
  0xef   : > { %v6556_v15 = vpop.f32.mrf.mxu3  ;;  %v1230_v34 = vsel %vm6308_vm5, %v4845_v5, %v1229_v48  ;;  %v2125_v48 = vrot.slane %v2123_v23, 5 }
  0xf0   : > { %2442 = vmatmul.bf16.gmra.mxu0 %v2326_v1 }
  0xf1   : > { %v2126_v11 = vsel %vm6008_vm2, %v2121_v54, %v2125_v48 }
  0xf2   : > { %v6559_v38 = vpop.f32.mrf.mxu2  ;;  %v1033_v35 = vpop.f32.mrf.mxu1 }
  0xf3   : > { %v1034_v19 = vadd.f32 %v1033_v35, %v6421_v4  ;;  %v2110_v4 = vor.u32 %v2109_v61, %v2106_v55  ;;  %v1310_v35 = vunpack.c.l.b16 %v1230_v34  ;;  %v5043_v61 = vld [vmem:[%s5993_s11 + $0x88] sm:$0xf] }
  0xf4   : > { %v2141_v21 = vshrl.u32 %v5043_v61, 16 }
  0xf5   : > { %v6566_v12 = vpop.f32.mrf.mxu0  ;;  %1072 = vmatmul.bf16.gmra.mxu1 %v5441_v27  ;;  %v1333_v8 = vpack.c.b16 %v1311_v49, %v1310_v35 }
  0xf6   : > { %v2143_v54 = vrot.slane %v2141_v21, 4 }
  0xf7   : > { %v6571_v1 = vpop.f32.mrf.mxu3  ;;  %1452 = vmatmul.bf16.gmra.mxu2 %v1332_v46  ;;  %v2111_v46 = vrot.slane %v2110_v4, 4  ;;  %v2131_v4 = vshll.u32 %v5042_v31, 16 }
  0xf9   : > { %v2116_v5 = vsel %vm6008_vm2, %v2111_v46, %v2115_v62  ;;  %v2133_v35 = vrot.slane %v2131_v4, 5 }
  0xfa   : > { %v1413_v20 = vpop.f32.mrf.mxu2  ;;  %v1035_v27 = vpop.f32.mrf.mxu1 }
  0xfb   : > { %v1493_v29 = vadd.f32 %v1413_v20, %v1034_v19  ;;  %v1036_v44 = vadd.f32 %v1035_v27, %v6440_v26  ;;  %v5539_v26 = vld [vmem:[%s7447_s1 + $0x1d0] sm:$0xff]  ;;  %v2137_v20 = vshll.u32 %v5043_v61, 16 }
  0xfc   : > { %1766 = vmatmul.bf16.gmra.mxu3 %v5481_v13  ;;  %v2128_v13 = vshrl.u32 %v5042_v31, 16  ;;  %v5547_v27 = vld [vmem:[%s7447_s1 + $0x210] sm:$0xff] }
  0xfd   : > { %v2408_v42 = vpop.f32.mrf.mxu0  ;;  %3824 = vmatpush.bf16.msra.mxu3 %v5539_v26  ;;  %v2139_v49 = vrot.slane %v2137_v20, 5  ;;  %4249 = vmatpush.bf16.msra.mxu0 %v5547_v27  ;;  %v5044_v26 = vld [vmem:[%s5993_s11 + $0x8c] sm:$0x1] }
  0xfe   : > { %v2130_v47 = vrot.slane %v2128_v13, 4  ;;  %v2147_v4 = vshll.u32 %v5044_v26, 16  ;;  %v5736_v26 = vld [vmem:[%s5993_s11 + $0x88] sm:$0xf] }
  0xff   : > { %v1727_v19 = vpop.f32.mrf.mxu3 }
 0x100   : > { %2447 = vmatmul.bf16.gmra.mxu0 %v2327_v37  ;;  %v1807_v55 = vadd.f32 %v1727_v19, %v1493_v29  ;;  %v5734_v29 = vld [vmem:[%s5993_s11 + $0x7c] sm:$0xf]  ;;  %v1123_v37 = vld [vmem:[%s5993_s11 + $0x78] sm:$0xe] }
 0x101   : > { %v1236_v34 = vrot.slane %v5734_v29, 5  ;;  %v5482_v19 = vld [vmem:[%s5993_s11 + $0x78] sm:$0xff] }
 0x102   : > { %v1415_v60 = vpop.f32.mrf.mxu2  ;;  %v6597_v59 = vadd.f32 %v2408_v42, %v1807_v55  ;;  %v1038_v23 = vpop.f32.mrf.mxu1  ;;  %v2305_v42 = vunpack.c.l.b16 %v2116_v5  ;;  %v5735_v55 = vld [vmem:[%s5993_s11 + $0x80] sm:$0x1] }
 0x103   : > { %v1494_v18 = vadd.f32 %v1415_v60, %v1036_v44  ;;  %v1039_v36 = vadd.f32 %v1038_v23, %v6466_v57  ;;  %v2306_v44 = vunpack.c.l.b16 %v2126_v11  ;;  %v4846_v57 = vrot.slane %v1123_v37, 9 }
 0x104   : > { %v1238_v31 = vrot.slane %v1236_v34, 4  ;;  %v1239_v61 = vrot.slane %v5735_v55, 5  ;;  %v2134_v23 = vor.u32 %v2133_v35, %v2130_v47  ;;  %v5443_v47 = vld [vmem:[%s5993_s11 + $0x78] sm:$0xff]  ;;  %v5046_v35 = vld [vmem:[%s5993_s11 + $0x94] sm:$0xf] }
 0x105   : > { %v2410_v62 = vpop.f32.mrf.mxu0  ;;  %1077 = vmatmul.bf16.gmra.mxu1 %v5442_v7  ;;  %v2328_v60 = vpack.c.b16 %v2306_v44, %v2305_v42  ;;  %v1237_v11 = vsel %vm6308_vm5, %v4846_v57, %v1236_v34  ;;  %v2149_v44 = vrot.slane %v2147_v4, 5  ;;  %v5045_v34 = vld [vmem:[%s5993_s11 + $0x90] sm:$0xf] }
 0x106   : > { %v1240_v13 = vsel %vm6308_vm5, %v1238_v31, %v1239_v61  ;;  %v2135_v27 = vrot.slane %v2134_v23, 4  ;;  %v2152_v57 = vshrl.u32 %v5045_v34, 16  ;;  %v1124_v23 = vld [vmem:[%s5993_s11 + $0x84] sm:$0xe] }
 0x107   : > { %v1729_v46 = vpop.f32.mrf.mxu3  ;;  %1457 = vmatmul.bf16.gmra.mxu2 %v1333_v8 }
 0x108   : > { %v1808_v48 = vadd.f32 %v1729_v46, %v1494_v18  ;;  %v2144_v18 = vor.u32 %v2143_v54, %v2139_v49  ;;  %v2140_v55 = vsel %vm6008_vm2, %v2135_v27, %v2139_v49  ;;  %v2154_v49 = vrot.slane %v2152_v57, 4 }
 0x10a   : > { %v1418_v53 = vpop.f32.mrf.mxu2  ;;  %v6608_v5 = vadd.f32 %v2410_v62, %v1808_v48  ;;  %v1040_v8 = vpop.f32.mrf.mxu1  ;;  %v1313_v62 = vunpack.c.l.b16 %v1240_v13  ;;  %v2145_v42 = vrot.slane %v2144_v18, 4  ;;  %v2307_v18 = vunpack.c.l.b16 %v2140_v55 }
 0x10b   : > { %v1495_v7 = vadd.f32 %v1418_v53, %v1039_v36  ;;  %v1041_v21 = vadd.f32 %v1040_v8, %v6483_v24  ;;  %v1312_v36 = vunpack.c.l.b16 %v1237_v11  ;;  %v2155_v24 = vshll.u32 %v5045_v34, 16  ;;  %v5047_v34 = vld [vmem:[%s5993_s11 + $0x98] sm:$0x1] }
 0x10c   : > { %1771 = vmatmul.bf16.gmra.mxu3 %v5482_v19  ;;  %v2150_v61 = vsel %vm6008_vm2, %v2145_v42, %v2149_v44  ;;  %v1243_v53 = vrot.slane %v5736_v26, 5  ;;  %v2161_v8 = vshll.u32 %v5046_v35, 16  ;;  %v2165_v11 = vshrl.u32 %v5046_v35, 16 }
 0x10d   : > { %v2413_v20 = vpop.f32.mrf.mxu0  ;;  %v1334_v19 = vpack.c.b16 %v1313_v62, %v1312_v36  ;;  %v2308_v4 = vunpack.c.l.b16 %v2150_v61  ;;  %v4847_v36 = vrot.slane %v1124_v23, 9  ;;  %v2171_v26 = vshll.u32 %v5047_v34, 16 }
 0x10e   : > { %v1245_v62 = vrot.slane %v1243_v53, 4  ;;  %v6629_v42 = vrot.slane %v2161_v8, 5 }
 0x10f   : > { %v1732_v29 = vpop.f32.mrf.mxu3  ;;  %v2329_v35 = vpack.c.b16 %v2308_v4, %v2307_v18  ;;  %v5506_v4 = vld [vmem:[%s7447_s1 + $0x148] sm:$0xff] }
 0x110   : > { %2452 = vmatmul.bf16.gmra.mxu0 %v2328_v60  ;;  %v1809_v37 = vadd.f32 %v1732_v29, %v1495_v7  ;;  %v5483_v29 = vld [vmem:[%s5993_s11 + $0x84] sm:$0xff]  ;;  %2830 = vmatpush.bf16.msra.mxu1 %v5506_v4 }
 0x112   : > { %v1420_v46 = vpop.f32.mrf.mxu2  ;;  %v6618_v48 = vadd.f32 %v2413_v20, %v1809_v37  ;;  %v1043_v31 = vpop.f32.mrf.mxu1  ;;  %v2157_v20 = vrot.slane %v2155_v24, 5  ;;  %v5737_v37 = vld [vmem:[%s5993_s11 + $0x8c] sm:$0x1] }
 0x113   : > { %v1496_v54 = vadd.f32 %v1420_v46, %v1041_v21  ;;  %v1044_v7 = vadd.f32 %v1043_v31, %v6503_v52  ;;  %v1246_v27 = vrot.slane %v5737_v37, 5  ;;  %v2167_v52 = vrot.slane %v2165_v11, 4 }
 0x114   : > { %v2158_v24 = vor.u32 %v2157_v20, %v2154_v49  ;;  %v2173_v20 = vrot.slane %v2171_v26, 5 }
 0x115   : > { %v2415_v60 = vpop.f32.mrf.mxu0  ;;  %1082 = vmatmul.bf16.gmra.mxu1 %v5443_v47  ;;  %v1247_v57 = vsel %vm6308_vm5, %v1245_v62, %v1246_v27  ;;  %v2168_v61 = vor.u32 %v2167_v52, %v6629_v42  ;;  %v5444_v62 = vld [vmem:[%s5993_s11 + $0x84] sm:$0xff] }
 0x116   : > { %v1315_v11 = vunpack.c.l.b16 %v1247_v57  ;;  %v2159_v18 = vrot.slane %v2158_v24, 4  ;;  %v1125_v57 = vld [vmem:[%s5993_s11 + $0x90] sm:$0xe] }
 0x117   : > { %v1734_v13 = vpop.f32.mrf.mxu3  ;;  %1462 = vmatmul.bf16.gmra.mxu2 %v1334_v19  ;;  %v2169_v49 = vrot.slane %v2168_v61, 4 }
 0x118   : > { %v1810_v21 = vadd.f32 %v1734_v13, %v1496_v54  ;;  %v1244_v54 = vsel %vm6308_vm5, %v4847_v36, %v1243_v53  ;;  %v5049_v53 = vld [vmem:[%s5993_s11 + $0xa0] sm:$0xf] }
 0x119   : > { %v1314_v8 = vunpack.c.l.b16 %v1244_v54  ;;  %v2185_v37 = vshll.u32 %v5049_v53, 16  ;;  %v2189_v27 = vshrl.u32 %v5049_v53, 16  ;;  %v2164_v54 = vsel %vm6008_vm2, %v2159_v18, %v6629_v42  ;;  %v5739_v53 = vld [vmem:[%s5993_s11 + $0x98] sm:$0x1] }
 0x11a   : > { %v1423_v44 = vpop.f32.mrf.mxu2  ;;  %v6632_v47 = vadd.f32 %v2415_v60, %v1810_v21  ;;  %v1045_v19 = vpop.f32.mrf.mxu1  ;;  %v5530_v60 = vld [vmem:[%s7447_s1 + $0x188] sm:$0xff]  ;;  %v2174_v26 = vsel %vm6008_vm2, %v2169_v49, %v2173_v20  ;;  %v4848_v42 = vrot.slane %v1125_v57, 9  ;;  %v2309_v4 = vunpack.c.l.b16 %v2164_v54 }
 0x11b   : > { %v1497_v46 = vadd.f32 %v1423_v44, %v1044_v7  ;;  %v1046_v55 = vadd.f32 %v1045_v19, %v6527_v22  ;;  %v5048_v7 = vld [vmem:[%s5993_s11 + $0x9c] sm:$0xf]  ;;  %3144 = vmatpush.bf16.msra.mxu2 %v5530_v60  ;;  %v5538_v22 = vld [vmem:[%s7447_s1 + $0x1c8] sm:$0xff]  ;;  %v1335_v34 = vpack.c.b16 %v1315_v11, %v1314_v8  ;;  %v2310_v49 = vunpack.c.l.b16 %v2174_v26 }
 0x11c   : > { %1776 = vmatmul.bf16.gmra.mxu3 %v5483_v29  ;;  %v2176_v21 = vshrl.u32 %v5048_v7, 16  ;;  %v2179_v29 = vshll.u32 %v5048_v7, 16  ;;  %v5546_v60 = vld [vmem:[%s7447_s1 + $0x208] sm:$0xff]  ;;  %v2187_v7 = vrot.slane %v2185_v37, 5 }
 0x11d   : > { %v2418_v31 = vpop.f32.mrf.mxu0  ;;  %3825 = vmatpush.bf16.msra.mxu3 %v5538_v22  ;;  %4250 = vmatpush.bf16.msra.mxu0 %v5546_v60  ;;  %v5484_v22 = vld [vmem:[%s5993_s11 + $0x90] sm:$0xff] }
 0x11f   : > { %v1737_v23 = vpop.f32.mrf.mxu3 }
 0x120   : > { %2457 = vmatmul.bf16.gmra.mxu0 %v2329_v35  ;;  %v1811_v13 = vadd.f32 %v1737_v23, %v1497_v46  ;;  %v5738_v46 = vld [vmem:[%s5993_s11 + $0x94] sm:$0xf]  ;;  %v2191_v23 = vrot.slane %v2189_v27, 4 }
 0x121   : > { %v1250_v35 = vrot.slane %v5738_v46, 5 }
 0x122   : > { %v1425_v36 = vpop.f32.mrf.mxu2  ;;  %v6652_v52 = vadd.f32 %v2418_v31, %v1811_v13  ;;  %v1048_v19 = vpop.f32.mrf.mxu1  ;;  %v2178_v31 = vrot.slane %v2176_v21, 4  ;;  %v1253_v13 = vrot.slane %v5739_v53, 5 }
 0x123   : > { %v1498_v44 = vadd.f32 %v1425_v36, %v1046_v55  ;;  %v1049_v61 = vadd.f32 %v1048_v19, %v6553_v10  ;;  %v2181_v55 = vrot.slane %v2179_v29, 5  ;;  %v1252_v11 = vrot.slane %v1250_v35, 4  ;;  %v5050_v10 = vld [vmem:[%s5993_s11 + $0xa4] sm:$0x1] }
 0x124   : > { %v2192_v29 = vor.u32 %v2191_v23, %v2187_v7  ;;  %v2195_v36 = vshll.u32 %v5050_v10, 16  ;;  %v1251_v37 = vsel %vm6308_vm5, %v4848_v42, %v1250_v35  ;;  %v5051_v35 = vld [vmem:[%s5993_s11 + $0xa8] sm:$0xf] }
 0x125   : > { %v2420_v24 = vpop.f32.mrf.mxu0  ;;  %1087 = vmatmul.bf16.gmra.mxu1 %v5444_v62  ;;  %v2182_v20 = vor.u32 %v2181_v55, %v2178_v31  ;;  %v1254_v27 = vsel %vm6308_vm5, %v1252_v11, %v1253_v13  ;;  %v1316_v26 = vunpack.c.l.b16 %v1251_v37  ;;  %v5445_v11 = vld [vmem:[%s5993_s11 + $0x90] sm:$0xff]  ;;  %v2200_v13 = vshrl.u32 %v5051_v35, 16 }
 0x126   : > { %v1317_v31 = vunpack.c.l.b16 %v1254_v27  ;;  %v2197_v55 = vrot.slane %v2195_v36, 5 }
 0x127   : > { %v1739_v8 = vpop.f32.mrf.mxu3  ;;  %1467 = vmatmul.bf16.gmra.mxu2 %v1335_v34  ;;  %v2183_v57 = vrot.slane %v2182_v20, 4 }
 0x128   : > { %v1812_v18 = vadd.f32 %v1739_v8, %v1498_v44  ;;  %v2330_v44 = vpack.c.b16 %v2310_v49, %v2309_v4  ;;  %v5052_v8 = vld [vmem:[%s5993_s11 + $0xac] sm:$0xf]  ;;  %v1336_v53 = vpack.c.b16 %v1317_v31, %v1316_v26  ;;  %v5485_v26 = vld [vmem:[%s5993_s11 + $0x9c] sm:$0xff] }
 0x129   : > { %v2209_v4 = vshll.u32 %v5052_v8, 16  ;;  %v2213_v49 = vshrl.u32 %v5052_v8, 16 }
 0x12a   : > { %v1428_v21 = vpop.f32.mrf.mxu2  ;;  %v6672_v34 = vadd.f32 %v2420_v24, %v1812_v18  ;;  %v1050_v46 = vpop.f32.mrf.mxu1  ;;  %v2188_v24 = vsel %vm6008_vm2, %v2183_v57, %v2187_v7  ;;  %v1126_v7 = vld [vmem:[%s5993_s11 + $0x9c] sm:$0xe] }
 0x12b   : > { %v1499_v62 = vadd.f32 %v1428_v21, %v1049_v61  ;;  %v1051_v54 = vadd.f32 %v1050_v46, %v6566_v12  ;;  %v2193_v61 = vrot.slane %v2192_v29, 4  ;;  %v5740_v21 = vld [vmem:[%s5993_s11 + $0xa0] sm:$0xf]  ;;  %v4849_v31 = vrot.slane %v1126_v7, 9  ;;  %v5054_v7 = vld [vmem:[%s5993_s11 + $0xb4] sm:$0xf] }
 0x12c   : > { %1781 = vmatmul.bf16.gmra.mxu3 %v5484_v22  ;;  %v2203_v22 = vshll.u32 %v5051_v35, 16  ;;  %v1257_v29 = vrot.slane %v5740_v21, 5 }
 0x12d   : > { %v2423_v19 = vpop.f32.mrf.mxu0  ;;  %v2198_v12 = vsel %vm6008_vm2, %v2193_v61, %v2197_v55  ;;  %v5741_v55 = vld [vmem:[%s5993_s11 + $0xa4] sm:$0x1] }
 0x12e   : > { %v2312_v37 = vunpack.c.l.b16 %v2198_v12  ;;  %v2205_v46 = vrot.slane %v2203_v22, 5  ;;  %v1259_v61 = vrot.slane %v1257_v29, 4 }
 0x12f   : > { %v1742_v60 = vpop.f32.mrf.mxu3 }
 0x130   : > { %2462 = vmatmul.bf16.gmra.mxu0 %v2330_v44  ;;  %v1813_v23 = vadd.f32 %v1742_v60, %v1499_v62  ;;  %v2311_v62 = vunpack.c.l.b16 %v2188_v24  ;;  %v2202_v44 = vrot.slane %v2200_v13, 4  ;;  %v1260_v60 = vrot.slane %v5741_v55, 5 }
 0x131   : > { %v1258_v13 = vsel %vm6308_vm5, %v4849_v31, %v1257_v29  ;;  %v5055_v31 = vld [vmem:[%s5993_s11 + $0xb8] sm:$0xf]  ;;  %v2227_v55 = vshll.u32 %v5054_v7, 16 }
 0x132   : > { %v1430_v42 = vpop.f32.mrf.mxu2  ;;  %v6682_v10 = vadd.f32 %v2423_v19, %v1813_v23  ;;  %v1053_v20 = vpop.f32.mrf.mxu1  ;;  %v2211_v19 = vrot.slane %v2209_v4, 5  ;;  %v5053_v23 = vld [vmem:[%s5993_s11 + $0xb0] sm:$0x1]  ;;  %v1318_v21 = vunpack.c.l.b16 %v1258_v13  ;;  %v1127_v13 = vld [vmem:[%s5993_s11 + $0xa8] sm:$0xe] }
 0x133   : > { %v1500_v18 = vadd.f32 %v1430_v42, %v1051_v54  ;;  %v2215_v54 = vrot.slane %v2213_v49, 4  ;;  %v1054_v35 = vadd.f32 %v1053_v20, %v6416_v56  ;;  %v2331_v42 = vpack.c.b16 %v2312_v37, %v2311_v62  ;;  %v5529_v56 = vld [vmem:[%s7447_s1 + $0x180] sm:$0xff] }
 0x134   : > { %v2219_v4 = vshll.u32 %v5053_v23, 16  ;;  %3145 = vmatpush.bf16.msra.mxu2 %v5529_v56  ;;  %v2229_v56 = vrot.slane %v2227_v55, 5 }
 0x135   : > { %v2425_v36 = vpop.f32.mrf.mxu0  ;;  %1092 = vmatmul.bf16.gmra.mxu1 %v5445_v11  ;;  %v2206_v11 = vor.u32 %v2205_v46, %v2202_v44  ;;  %v2216_v22 = vor.u32 %v2215_v54, %v2211_v19  ;;  %v5537_v44 = vld [vmem:[%s7447_s1 + $0x1c0] sm:$0xff] }
 0x136   : > { %v5505_v46 = vld [vmem:[%s7447_s1 + $0x140] sm:$0xff]  ;;  %3826 = vmatpush.bf16.msra.mxu3 %v5537_v44 }
 0x137   : > { %v1744_v27 = vpop.f32.mrf.mxu3  ;;  %1472 = vmatmul.bf16.gmra.mxu2 %v1336_v53  ;;  %v2207_v29 = vrot.slane %v2206_v11, 4  ;;  %v2217_v37 = vrot.slane %v2216_v22, 4  ;;  %2831 = vmatpush.bf16.msra.mxu1 %v5505_v46  ;;  %v2237_v22 = vshrl.u32 %v5055_v31, 16 }
 0x138   : > { %v1814_v57 = vadd.f32 %v1744_v27, %v1500_v18  ;;  %v1261_v18 = vsel %vm6308_vm5, %v1259_v61, %v1260_v60  ;;  %v2221_v27 = vrot.slane %v2219_v4, 5  ;;  %v2224_v61 = vshrl.u32 %v5054_v7, 16  ;;  %v5545_v4 = vld [vmem:[%s7447_s1 + $0x200] sm:$0xff]  ;;  %v5486_v7 = vld [vmem:[%s5993_s11 + $0xa8] sm:$0xff] }
 0x139   : > { %4251 = vmatpush.bf16.msra.mxu0 %v5545_v4  ;;  %v5057_v4 = vld [vmem:[%s5993_s11 + $0xc0] sm:$0xf] }
 0x13a   : > { %v1433_v8 = vpop.f32.mrf.mxu2  ;;  %v6690_v12 = vadd.f32 %v2425_v36, %v1814_v57  ;;  %v1055_v53 = vpop.f32.mrf.mxu1  ;;  %v1319_v36 = vunpack.c.l.b16 %v1261_v18  ;;  %v2233_v18 = vshll.u32 %v5055_v31, 16 }
 0x13b   : > { %v1501_v24 = vadd.f32 %v1433_v8, %v1054_v35  ;;  %v1056_v54 = vadd.f32 %v1055_v53, %v6431_v16  ;;  %v5742_v16 = vld [vmem:[%s5993_s11 + $0xac] sm:$0xf] }
 0x13c   : > { %1786 = vmatmul.bf16.gmra.mxu3 %v5485_v26  ;;  %v5446_v26 = vld [vmem:[%s5993_s11 + $0x9c] sm:$0xff]  ;;  %v1337_v23 = vpack.c.b16 %v1319_v36, %v1318_v21  ;;  %v1264_v11 = vrot.slane %v5742_v16, 5  ;;  %v2235_v46 = vrot.slane %v2233_v18, 5 }
 0x13d   : > { %v2428_v49 = vpop.f32.mrf.mxu0 }
 0x13f   : > { %v1747_v20 = vpop.f32.mrf.mxu3 }
 0x140   : > { %2467 = vmatmul.bf16.gmra.mxu0 %v2331_v42  ;;  %v1815_v62 = vadd.f32 %v1747_v20, %v1501_v24  ;;  %v2212_v42 = vsel %vm6008_vm2, %v2207_v29, %v2211_v19  ;;  %v2222_v24 = vsel %vm6008_vm2, %v2217_v37, %v2221_v27  ;;  %v1266_v29 = vrot.slane %v1264_v11, 4  ;;  %v5743_v37 = vld [vmem:[%s5993_s11 + $0xb0] sm:$0x1] }
 0x141   : > { %v2313_v20 = vunpack.c.l.b16 %v2212_v42  ;;  %v2314_v21 = vunpack.c.l.b16 %v2222_v24  ;;  %v1267_v27 = vrot.slane %v5743_v37, 5  ;;  %v2248_v37 = vshrl.u32 %v5057_v4, 16 }
 0x142   : > { %v1435_v57 = vpop.f32.mrf.mxu2  ;;  %v6709_v60 = vadd.f32 %v2428_v49, %v1815_v62  ;;  %v1058_v8 = vpop.f32.mrf.mxu1  ;;  %v2226_v49 = vrot.slane %v2224_v61, 4  ;;  %v4850_v62 = vrot.slane %v1127_v13, 9 }
 0x143   : > { %v1502_v35 = vadd.f32 %v1435_v57, %v1056_v54  ;;  %v1059_v44 = vadd.f32 %v1058_v8, %v6455_v45  ;;  %v2239_v54 = vrot.slane %v2237_v22, 4  ;;  %v1268_v45 = vsel %vm6308_vm5, %v1266_v29, %v1267_v27 }
 0x144   : > { %v2230_v31 = vor.u32 %v2229_v56, %v2226_v49  ;;  %v1265_v42 = vsel %vm6308_vm5, %v4850_v62, %v1264_v11  ;;  %v5058_v56 = vld [vmem:[%s5993_s11 + $0xc4] sm:$0xf]  ;;  %v5447_v62 = vld [vmem:[%s5993_s11 + $0xa8] sm:$0xff]  ;;  %v2251_v27 = vshll.u32 %v5057_v4, 16 }
 0x145   : > { %v2430_v53 = vpop.f32.mrf.mxu0  ;;  %1097 = vmatmul.bf16.gmra.mxu1 %v5446_v26  ;;  %v5056_v26 = vld [vmem:[%s5993_s11 + $0xbc] sm:$0x1]  ;;  %v2240_v24 = vor.u32 %v2239_v54, %v2235_v46  ;;  %v1320_v22 = vunpack.c.l.b16 %v1265_v42 }
 0x146   : > { %v2243_v16 = vshll.u32 %v5056_v26, 16  ;;  %v2231_v13 = vrot.slane %v2230_v31, 4  ;;  %v2257_v26 = vshll.u32 %v5058_v56, 16  ;;  %v2261_v31 = vshrl.u32 %v5058_v56, 16 }
 0x147   : > { %v1749_v19 = vpop.f32.mrf.mxu3  ;;  %1477 = vmatmul.bf16.gmra.mxu2 %v1337_v23 }
 0x148   : > { %v1816_v36 = vadd.f32 %v1749_v19, %v1502_v35  ;;  %v2332_v35 = vpack.c.b16 %v2314_v21, %v2313_v20  ;;  %v5744_v19 = vld [vmem:[%s5993_s11 + $0x10] sm:$0xf]  ;;  %v2241_v21 = vrot.slane %v2240_v24, 4  ;;  %v2236_v29 = vsel %vm6008_vm2, %v2231_v13, %v2235_v46 }
 0x149   : > { %v2586_v20 = vrot.slane %v5744_v19, 5  ;;  %v2250_v13 = vrot.slane %v2248_v37, 4  ;;  %v2263_v56 = vrot.slane %v2261_v31, 4 }
 0x14a   : > { %v1438_v57 = vpop.f32.mrf.mxu2  ;;  %v6724_v55 = vadd.f32 %v2430_v53, %v1816_v36  ;;  %v1060_v23 = vpop.f32.mrf.mxu1  ;;  %v1321_v53 = vunpack.c.l.b16 %v1268_v45  ;;  %v2245_v36 = vrot.slane %v2243_v16, 5  ;;  %v5746_v45 = vld [vmem:[%s5993_s11 + $0x14] sm:$0x1] }
 0x14b   : > { %v1503_v61 = vadd.f32 %v1438_v57, %v1059_v44  ;;  %v1061_v11 = vadd.f32 %v1060_v23, %v6475_v9  ;;  %v5745_v9 = vld [vmem:[%s5993_s11 + $0xb8] sm:$0xf]  ;;  %v2588_v42 = vrot.slane %v2586_v20, 4  ;;  %v2589_v24 = vrot.slane %v5746_v45, 5 }
 0x14c   : > { %7457 = vst [vmem:[#allocation9_spill] sm:$0xff] %v6724_v55  ;;  %1791 = vmatmul.bf16.gmra.mxu3 %v5486_v7  ;;  %v1338_v57 = vpack.c.b16 %v1321_v53, %v1320_v22  ;;  %v1271_v23 = vrot.slane %v5745_v9, 5  ;;  %v2246_v46 = vsel %vm6008_vm2, %v2241_v21, %v2245_v36  ;;  %v5092_v22 = vld [vmem:[%s5993_s11 + $0xc] sm:$0xe]  ;;  %v5059_v21 = vld [vmem:[%s5993_s11 + $0xc8] sm:$0x1] }
 0x14d   : > { %v2433_v8 = vpop.f32.mrf.mxu0  ;;  %v5108_v19 = vrot.slane %v5092_v22, 9  ;;  %v2316_v9 = vunpack.c.l.b16 %v2246_v46 }
 0x14e   : > { %v1273_v45 = vrot.slane %v1271_v23, 4 }
 0x14f   : > { %v1752_v18 = vpop.f32.mrf.mxu3 }
 0x150   : > { %2472 = vmatmul.bf16.gmra.mxu0 %v2332_v35  ;;  %v1817_v49 = vadd.f32 %v1752_v18, %v1503_v61  ;;  %v1128_v35 = vld [vmem:[%s5993_s11 + $0xb4] sm:$0xe]  ;;  %v2253_v18 = vrot.slane %v2251_v27, 5 }
 0x151   : > { %v4851_v4 = vrot.slane %v1128_v35, 9  ;;  %v2267_v35 = vshll.u32 %v5059_v21, 16  ;;  %v5448_v21 = vld [vmem:[%s5993_s11 + $0xb4] sm:$0xff] }
 0x152   : > { %v1440_v7 = vpop.f32.mrf.mxu2  ;;  %v6737_v44 = vadd.f32 %v2433_v8, %v1817_v49  ;;  %v1063_v61 = vpop.f32.mrf.mxu1  ;;  %v2315_v8 = vunpack.c.l.b16 %v2236_v29  ;;  %v2259_v49 = vrot.slane %v2257_v26, 5  ;;  %v2590_v29 = vsel %vm6308_vm5, %v2588_v42, %v2589_v24  ;;  %v5284_v42 = vld [vmem:[%s5993_s11 + $0x18] sm:$0xf] }
 0x153   : > { %v1504_v54 = vadd.f32 %v1440_v7, %v1061_v11  ;;  %v5487_v7 = vld [vmem:[%s5993_s11 + $0xb4] sm:$0xff]  ;;  %v1064_v36 = vadd.f32 %v1063_v61, %v6492_v33  ;;  %v2254_v27 = vor.u32 %v2253_v18, %v2250_v13  ;;  %v1272_v31 = vsel %vm6308_vm5, %v4851_v4, %v1271_v23  ;;  %v6763_v18 = vld [vmem:[%s5993_s11 + $0x1c] sm:$0xf] }
 0x154   : > { %7458 = vst [vmem:[#allocation10_spill] sm:$0xff] %v6737_v44  ;;  %v5747_v44 = vld [vmem:[%s5993_s11 + $0xbc] sm:$0x1]  ;;  %v2333_v33 = vpack.c.b16 %v2316_v9, %v2315_v8  ;;  %v1322_v22 = vunpack.c.l.b16 %v1272_v31  ;;  %v3308_v8 = vshrl.u32 %v5284_v42, 16  ;;  %v3311_v9 = vshll.u32 %v5284_v42, 16 }
 0x155   : > { %v2435_v16 = vpop.f32.mrf.mxu0  ;;  %1102 = vmatmul.bf16.gmra.mxu1 %v5447_v62  ;;  %v1274_v55 = vrot.slane %v5747_v44, 5  ;;  %v2587_v62 = vsel %vm6308_vm5, %v5108_v19, %v2586_v20  ;;  %v2264_v44 = vor.u32 %v2263_v56, %v2259_v49  ;;  %v2269_v19 = vrot.slane %v2267_v35, 5  ;;  %v5286_v35 = vld [vmem:[%s5993_s11 + $0x20] sm:$0x1] }
 0x157   : > { %v1754_v53 = vpop.f32.mrf.mxu3  ;;  %1482 = vmatmul.bf16.gmra.mxu2 %v1338_v57  ;;  %v2712_v57 = vunpack.c.l.b16 %v2587_v62  ;;  %v1275_v20 = vsel %vm6308_vm5, %v1273_v45, %v1274_v55  ;;  %v2265_v56 = vrot.slane %v2264_v44, 4  ;;  %v3317_v55 = vshll.u32 %v6763_v18, 16 }
 0x158   : > { %v1818_v11 = vadd.f32 %v1754_v53, %v1504_v54  ;;  %v2713_v54 = vunpack.c.l.b16 %v2590_v29  ;;  %v2255_v53 = vrot.slane %v2254_v27, 4  ;;  %v1323_v4 = vunpack.c.l.b16 %v1275_v20 }
 0x159   : > { %v2270_v27 = vsel %vm6008_vm2, %v2265_v56, %v2269_v19  ;;  %v3319_v31 = vrot.slane %v3317_v55, 5  ;;  %v5287_v56 = vld [vmem:[%s5993_s11 + $0x24] sm:$0xf] }
 0x15a   : > { %v1443_v37 = vpop.f32.mrf.mxu2  ;;  %v1065_v61 = vpop.f32.mrf.mxu1  ;;  %v6757_v46 = vpack.c.b16 %v2713_v54, %v2712_v57  ;;  %v6760_v24 = vadd.f32 %v2435_v16, %v1818_v11  ;;  %v3321_v16 = vshrl.u32 %v6763_v18, 16  ;;  %v1339_v29 = vpack.c.b16 %v1323_v4, %v1322_v22 }
 0x15b   : > { %v1505_v26 = vadd.f32 %v1443_v37, %v1064_v36  ;;  %v1066_v11 = vadd.f32 %v1065_v61, %v6507_v0  ;;  %v2260_v37 = vsel %vm6008_vm2, %v2255_v53, %v2259_v49  ;;  %v3310_v54 = vrot.slane %v3308_v8, 4 }
 0x15c   : > { %1796 = vmatmul.bf16.gmra.mxu3 %v5487_v7  ;;  %v3323_v44 = vrot.slane %v3321_v16, 4  ;;  %v2317_v61 = vunpack.c.l.b16 %v2260_v37  ;;  %v2318_v20 = vunpack.c.l.b16 %v2270_v27  ;;  %v3327_v53 = vshll.u32 %v5286_v35, 16 }
 0x15d   : > { %v2438_v13 = vpop.f32.mrf.mxu0  ;;  %v3332_v37 = vshrl.u32 %v5287_v56, 16  ;;  %v3335_v27 = vshll.u32 %v5287_v56, 16  ;;  %v5748_v56 = vld [vmem:[%s5993_s11 + $0x1c] sm:$0xf] }
 0x15e   : > { %v3324_v22 = vor.u32 %v3323_v44, %v3319_v31  ;;  %v2334_v19 = vpack.c.b16 %v2318_v20, %v2317_v61  ;;  %v4009_v20 = vrot.slane %v5286_v35, 5 }
 0x15f   : > { %v1757_v23 = vpop.f32.mrf.mxu3 }
 0x160   : > { %2477 = vmatmul.bf16.gmra.mxu0 %v2333_v33  ;;  %v1819_v7 = vadd.f32 %v1757_v23, %v1505_v26  ;;  %v3313_v26 = vrot.slane %v3311_v9, 5  ;;  %v3325_v16 = vrot.slane %v3324_v22, 4 }
 0x162   : > { %v1445_v45 = vpop.f32.mrf.mxu2  ;;  %v6769_v36 = vadd.f32 %v2438_v13, %v1819_v7  ;;  %v1068_v57 = vpop.f32.mrf.mxu1  ;;  %v5488_v13 = vld [vmem:[%s5993_s11 + $0xc0] sm:$0xff]  ;;  %v3314_v49 = vor.u32 %v3313_v26, %v3310_v54  ;;  %v6780_v7 = vld [vmem:[%s5993_s11 + $0x28] sm:$0xf] }
 0x163   : > { %v1506_v62 = vadd.f32 %v1445_v45, %v1066_v11  ;;  %v1069_v23 = vadd.f32 %v1068_v57, %v6529_v32  ;;  %v3329_v11 = vrot.slane %v3327_v53, 5  ;;  %v3341_v32 = vshll.u32 %v6780_v7, 16 }
 0x164   : > { %v3315_v55 = vrot.slane %v3314_v49, 4  ;;  %v3345_v57 = vshrl.u32 %v6780_v7, 16  ;;  %v3337_v49 = vrot.slane %v3335_v27, 5 }
 0x165   : > { %v2440_v0 = vpop.f32.mrf.mxu0  ;;  %1107 = vmatmul.bf16.gmra.mxu1 %v5448_v21  ;;  %v6793_v22 = vrot.slane %v3341_v32, 5 }
 0x166   : > { %v3320_v44 = vsel %vm6008_vm2, %v3315_v55, %v3319_v31  ;;  %v3347_v53 = vrot.slane %v3345_v57, 4  ;;  %v5513_v31 = vld [vmem:[%s5993_s11 + $0x18] sm:$0xff] }
 0x167   : > { %v1759_v33 = vpop.f32.mrf.mxu3  ;;  %1487 = vmatmul.bf16.gmra.mxu2 %v1339_v29  ;;  %v4006_v29 = vrot.slane %v6763_v18, 5 }
 0x168   : > { %v1820_v42 = vadd.f32 %v1759_v33, %v1506_v62  ;;  %v5364_v62 = vld [vmem:[%s5993_s11 + $0x18] sm:$0xe] }
 0x169   : > { %v5380_v33 = vrot.slane %v5364_v62, 9  ;;  %v4008_v61 = vrot.slane %v4006_v29, 4 }
 0x16a   : > { %v1448_v4 = vpop.f32.mrf.mxu2  ;;  %v1070_v9 = vpop.f32.mrf.mxu1  ;;  %v6782_v45 = vadd.f32 %v2440_v0, %v1820_v42  ;;  %v3330_v0 = vsel %vm6008_vm2, %v3325_v16, %v3329_v11  ;;  %v3334_v42 = vrot.slane %v3332_v37, 4  ;;  %v5093_v16 = vld [vmem:[%s5993_s11 + $0x18] sm:$0xe]  ;;  %v3348_v37 = vor.u32 %v3347_v53, %v6793_v22 }
 0x16b   : > { %v1507_v8 = vadd.f32 %v1448_v4, %v1069_v23  ;;  %v1071_v18 = vadd.f32 %v1070_v9, %v6547_v3  ;;  %v3707_v3 = vunpack.c.l.b16 %v3320_v44  ;;  %v3708_v9 = vunpack.c.l.b16 %v3330_v0 }
 0x16c   : > { %1801 = vmatmul.bf16.gmra.mxu3 %v5488_v13  ;;  %v4007_v11 = vsel %vm6308_vm5, %v5380_v33, %v4006_v29  ;;  %v4010_v62 = vsel %vm6308_vm5, %v4008_v61, %v4009_v20  ;;  %v5109_v57 = vrot.slane %v5093_v16, 9  ;;  %v5290_v16 = vld [vmem:[%s5993_s11 + $0x30] sm:$0xf] }
 0x16d   : > { %v2443_v21 = vpop.f32.mrf.mxu0  ;;  %v4132_v29 = vunpack.c.l.b16 %v4007_v11  ;;  %v4133_v33 = vunpack.c.l.b16 %v4010_v62  ;;  %v6822_v11 = vld [vmem:[%s5993_s11 + $0x34] sm:$0xf] }
 0x16f   : > { %v1762_v54 = vpop.f32.mrf.mxu3 }
 0x170   : > { %2482 = vmatmul.bf16.gmra.mxu0 %v2334_v19  ;;  %v1821_v26 = vadd.f32 %v1762_v54, %v1507_v8  ;;  %v2593_v19 = vrot.slane %v5748_v56, 5  ;;  %v6800_v8 = vld [vmem:[%s5993_s11 + $0x2c] sm:$0x1]  ;;  %v5365_v56 = vld [vmem:[%s5993_s11 + $0x24] sm:$0xe] }
 0x171   : > { %v3351_v27 = vshll.u32 %v6800_v8, 16 }
 0x172   : > { %v1450_v13 = vpop.f32.mrf.mxu2  ;;  %v6795_v23 = vadd.f32 %v2443_v21, %v1821_v26  ;;  %v1073_v55 = vpop.f32.mrf.mxu1  ;;  %v3338_v21 = vor.u32 %v3337_v49, %v3334_v42  ;;  %v2595_v54 = vrot.slane %v2593_v19, 4  ;;  %v5749_v26 = vld [vmem:[%s5993_s11 + $0x20] sm:$0x1]  ;;  %v3349_v42 = vrot.slane %v3348_v37, 4 }
 0x173   : > { %v1508_v4 = vadd.f32 %v1450_v13, %v1071_v18  ;;  %v2596_v44 = vrot.slane %v5749_v26, 5  ;;  %v3739_v18 = vpack.c.b16 %v3708_v9, %v3707_v3  ;;  %v1074_v61 = vadd.f32 %v1073_v55, %v6426_v17 }
 0x174   : > { %v3339_v20 = vrot.slane %v3338_v21, 4  ;;  %v3353_v13 = vrot.slane %v3351_v27, 5  ;;  %v2594_v53 = vsel %vm6308_vm5, %v5109_v57, %v2593_v19  ;;  %v4164_v3 = vpack.c.b16 %v4133_v33, %v4132_v29 }
 0x175   : > { %v2445_v35 = vpop.f32.mrf.mxu0  ;;  %2832 = vmatmul.bf16.vlgmr.msra.gmra.mxu1 %v6757_v46  ;;  %v2714_v62 = vunpack.c.l.b16 %v2594_v53  ;;  %v5381_v37 = vrot.slane %v5365_v56, 9  ;;  %v3356_v57 = vshrl.u32 %v5290_v16, 16  ;;  %v4016_v26 = vrot.slane %v6800_v8, 5  ;;  %v5094_v53 = vld [vmem:[%s5993_s11 + $0x24] sm:$0xe] }
 0x176   : > { %v3344_v19 = vsel %vm6008_vm2, %v3339_v20, %v6793_v22 }
 0x177   : > { %v1764_v32 = vpop.f32.mrf.mxu3  ;;  %3146 = vmatmul.bf16.vlgmr.msra.gmra.mxu2 %v5513_v31  ;;  %v2597_v31 = vsel %vm6308_vm5, %v2595_v54, %v2596_v44  ;;  %v3365_v44 = vshll.u32 %v6822_v11, 16  ;;  %v3709_v33 = vunpack.c.l.b16 %v3344_v19  ;;  %v3358_v8 = vrot.slane %v3356_v57, 4 }
 0x178   : > { %v1822_v0 = vadd.f32 %v1764_v32, %v1508_v4  ;;  %v4013_v4 = vrot.slane %v6780_v7, 5  ;;  %v2715_v21 = vunpack.c.l.b16 %v2597_v31  ;;  %v3354_v7 = vsel %vm6008_vm2, %v3349_v42, %v3353_v13  ;;  %v5514_v13 = vld [vmem:[%s5993_s11 + $0x24] sm:$0xff] }
 0x17a   : > { %v1453_v46 = vpop.f32.mrf.mxu2  ;;  %v1075_v9 = vpop.f32.mrf.mxu1  ;;  %v6819_v17 = vadd.f32 %v2445_v35, %v1822_v0  ;;  %v4015_v32 = vrot.slane %v4013_v4, 4  ;;  %v3359_v35 = vshll.u32 %v5290_v16, 16  ;;  %v3369_v0 = vshrl.u32 %v6822_v11, 16 }
 0x17b   : > { %v1509_v49 = vadd.f32 %v1453_v46, %v1074_v61  ;;  %v1076_v22 = vadd.f32 %v1075_v9, %v6450_v39  ;;  %v2745_v29 = vpack.c.b16 %v2715_v21, %v2714_v62  ;;  %v5750_v61 = vld [vmem:[%s5993_s11 + $0x28] sm:$0xf]  ;;  %v6842_v9 = vrot.slane %v3365_v44, 5 }
 0x17c   : > { %3827 = vmatmul.bf16.vlgmr.msra.gmra.mxu3 %v3739_v18  ;;  %v2600_v46 = vrot.slane %v5750_v61, 5  ;;  %v3361_v31 = vrot.slane %v3359_v35, 5  ;;  %v4017_v39 = vsel %vm6308_vm5, %v4015_v32, %v4016_v26  ;;  %v3371_v16 = vrot.slane %v3369_v0, 4  ;;  %v5293_v61 = vld [vmem:[%s5993_s11 + $0x3c] sm:$0xf] }
 0x17d   : > { %v2448_v55 = vpop.f32.mrf.mxu0  ;;  %v5110_v21 = vrot.slane %v5094_v53, 9 }
 0x17e   : > { %v2602_v19 = vrot.slane %v2600_v46, 4  ;;  %v3372_v26 = vor.u32 %v3371_v16, %v6842_v9  ;;  %v5366_v16 = vld [vmem:[%s5993_s11 + $0x30] sm:$0xe] }
 0x17f   : > { %v1767_v27 = vpop.f32.mrf.mxu3 }
 0x180   : > { %4252 = vmatmul.bf16.vlgmr.msra.gmra.mxu0 %v4164_v3  ;;  %v1823_v54 = vadd.f32 %v1767_v27, %v1509_v49  ;;  %v3710_v49 = vunpack.c.l.b16 %v3354_v7  ;;  %v4014_v3 = vsel %vm6308_vm5, %v5381_v37, %v4013_v4  ;;  %v5751_v27 = vld [vmem:[%s5993_s11 + $0x2c] sm:$0x1]  ;;  %v4135_v4 = vunpack.c.l.b16 %v4017_v39 }
 0x181   : > { %v2603_v7 = vrot.slane %v5751_v27, 5  ;;  %v4134_v35 = vunpack.c.l.b16 %v4014_v3  ;;  %v3362_v37 = vor.u32 %v3361_v31, %v3358_v8 }
 0x182   : > { %v1455_v18 = vpop.f32.mrf.mxu2  ;;  %v6834_v20 = vadd.f32 %v2448_v55, %v1823_v54  ;;  %v1078_v56 = vpop.f32.mrf.mxu1  ;;  %v6845_v55 = vld [vmem:[%s5993_s11 + $0x38] sm:$0x1]  ;;  %v3740_v32 = vpack.c.b16 %v3710_v49, %v3709_v33  ;;  %v3373_v49 = vrot.slane %v3372_v26, 4 }
 0x183   : > { %v1510_v42 = vadd.f32 %v1455_v18, %v1076_v22  ;;  %v3375_v44 = vshll.u32 %v6845_v55, 16  ;;  %v1079_v0 = vadd.f32 %v1078_v56, %v6470_v2  ;;  %v2601_v18 = vsel %vm6308_vm5, %v5110_v21, %v2600_v46 }
 0x184   : > { %v3363_v8 = vrot.slane %v3362_v37, 4  ;;  %v4020_v2 = vrot.slane %v6822_v11, 5  ;;  %v2716_v46 = vunpack.c.l.b16 %v2601_v18  ;;  %v3380_v21 = vshrl.u32 %v5293_v61, 16 }
 0x185   : > { %v2450_v62 = vpop.f32.mrf.mxu0  ;;  %2837 = vmatmul.bf16.gmra.mxu1 %v2745_v29  ;;  %v2604_v29 = vsel %vm6308_vm5, %v2602_v19, %v2603_v7  ;;  %v3377_v31 = vrot.slane %v3375_v44, 5  ;;  %v3383_v19 = vshll.u32 %v5293_v61, 16  ;;  %v4023_v26 = vrot.slane %v6845_v55, 5 }
 0x186   : > { %v2717_v39 = vunpack.c.l.b16 %v2604_v29  ;;  %v4022_v37 = vrot.slane %v4020_v2, 4  ;;  %v3382_v44 = vrot.slane %v3380_v21, 4 }
 0x187   : > { %v1769_v57 = vpop.f32.mrf.mxu3  ;;  %3151 = vmatmul.bf16.gmra.mxu2 %v5514_v13  ;;  %v4165_v13 = vpack.c.b16 %v4135_v4, %v4134_v35  ;;  %v3368_v35 = vsel %vm6008_vm2, %v3363_v8, %v6842_v9  ;;  %v5382_v4 = vrot.slane %v5366_v16, 9 }
 0x188   : > { %v1824_v54 = vadd.f32 %v1769_v57, %v1510_v42  ;;  %v6857_v42 = vld [vmem:[%s5993_s11 + $0x40] sm:$0xf]  ;;  %v4024_v16 = vsel %vm6308_vm5, %v4022_v37, %v4023_v26 }
 0x189   : > { %v3389_v27 = vshll.u32 %v6857_v42, 16  ;;  %v3393_v7 = vshrl.u32 %v6857_v42, 16 }
 0x18a   : > { %v1458_v22 = vpop.f32.mrf.mxu2  ;;  %v1080_v33 = vpop.f32.mrf.mxu1  ;;  %v6860_v56 = vadd.f32 %v2450_v62, %v1824_v54  ;;  %v3378_v62 = vsel %vm6008_vm2, %v3373_v49, %v3377_v31  ;;  %v6879_v49 = vld [vmem:[%s5993_s11 + $0x44] sm:$0x1] }
 0x18b   : > { %v1511_v53 = vadd.f32 %v1458_v22, %v1079_v0  ;;  %v1081_v54 = vadd.f32 %v1080_v33, %v6485_v25  ;;  %v3385_v22 = vrot.slane %v3383_v19, 5  ;;  %v6872_v9 = vrot.slane %v3389_v27, 5 }
 0x18c   : > { %3832 = vmatmul.bf16.gmra.mxu3 %v3740_v32  ;;  %v2746_v32 = vpack.c.b16 %v2717_v39, %v2716_v46  ;;  %v3395_v18 = vrot.slane %v3393_v7, 4  ;;  %v3711_v33 = vunpack.c.l.b16 %v3368_v35  ;;  %v3712_v31 = vunpack.c.l.b16 %v3378_v62  ;;  %v5095_v46 = vld [vmem:[%s5993_s11 + $0x30] sm:$0xe]  ;;  %v5753_v35 = vld [vmem:[%s5993_s11 + $0x38] sm:$0x1] }
 0x18d   : > { %v2453_v3 = vpop.f32.mrf.mxu0  ;;  %v4021_v39 = vsel %vm6308_vm5, %v5382_v4, %v4020_v2  ;;  %v3399_v19 = vshll.u32 %v6879_v49, 16  ;;  %v5111_v7 = vrot.slane %v5095_v46, 9  ;;  %v4137_v4 = vunpack.c.l.b16 %v4024_v16  ;;  %v5296_v46 = vld [vmem:[%s5993_s11 + $0x48] sm:$0xf] }
 0x18e   : > { %v3396_v21 = vor.u32 %v3395_v18, %v6872_v9  ;;  %v4136_v2 = vunpack.c.l.b16 %v4021_v39  ;;  %v6900_v39 = vld [vmem:[%s5993_s11 + $0x4c] sm:$0xf] }
 0x18f   : > { %v1772_v57 = vpop.f32.mrf.mxu3 }
 0x190   : > { %4257 = vmatmul.bf16.gmra.mxu0 %v4165_v13  ;;  %v1825_v11 = vadd.f32 %v1772_v57, %v1511_v53  ;;  %v5515_v13 = vld [vmem:[%s5993_s11 + $0x30] sm:$0xff] }
 0x191   : > { %v5752_v53 = vld [vmem:[%s5993_s11 + $0x34] sm:$0xf] }
 0x192   : > { %v1460_v0 = vpop.f32.mrf.mxu2  ;;  %v6874_v29 = vadd.f32 %v2453_v3, %v1825_v11  ;;  %v2607_v8 = vrot.slane %v5752_v53, 5  ;;  %v1083_v25 = vpop.f32.mrf.mxu1  ;;  %v3386_v3 = vor.u32 %v3385_v22, %v3382_v44  ;;  %v2610_v11 = vrot.slane %v5753_v35, 5  ;;  %v5367_v53 = vld [vmem:[%s5993_s11 + $0x3c] sm:$0xe] }
 0x193   : > { %v1512_v61 = vadd.f32 %v1460_v0, %v1081_v54  ;;  %v3741_v54 = vpack.c.b16 %v3712_v31, %v3711_v33  ;;  %v1084_v37 = vadd.f32 %v1083_v25, %v6500_v58  ;;  %v3397_v44 = vrot.slane %v3396_v21, 4 }
 0x194   : > { %v2609_v57 = vrot.slane %v2607_v8, 4  ;;  %v3387_v26 = vrot.slane %v3386_v3, 4  ;;  %v3401_v0 = vrot.slane %v3399_v19, 5  ;;  %v2608_v18 = vsel %vm6308_vm5, %v5111_v7, %v2607_v8 }
 0x195   : > { %v2455_v55 = vpop.f32.mrf.mxu0  ;;  %2842 = vmatmul.bf16.gmra.mxu1 %v2746_v32  ;;  %v4166_v33 = vpack.c.b16 %v4137_v4, %v4136_v2  ;;  %v2718_v16 = vunpack.c.l.b16 %v2608_v18  ;;  %v5383_v21 = vrot.slane %v5367_v53, 9  ;;  %v3404_v7 = vshrl.u32 %v5296_v46, 16  ;;  %v5096_v18 = vld [vmem:[%s5993_s11 + $0x3c] sm:$0xe] }
 0x196   : > { %v3392_v8 = vsel %vm6008_vm2, %v3387_v26, %v6872_v9  ;;  %v4030_v35 = vrot.slane %v6879_v49, 5 }
 0x197   : > { %v1774_v27 = vpop.f32.mrf.mxu3  ;;  %3156 = vmatmul.bf16.gmra.mxu2 %v5515_v13  ;;  %v2611_v13 = vsel %vm6308_vm5, %v2609_v57, %v2610_v11  ;;  %v3413_v11 = vshll.u32 %v6900_v39, 16  ;;  %v3713_v4 = vunpack.c.l.b16 %v3392_v8  ;;  %v3406_v49 = vrot.slane %v3404_v7, 4 }
 0x198   : > { %v1826_v62 = vadd.f32 %v1774_v27, %v1512_v61  ;;  %v4027_v61 = vrot.slane %v6857_v42, 5  ;;  %v2719_v3 = vunpack.c.l.b16 %v2611_v13  ;;  %v3402_v42 = vsel %vm6008_vm2, %v3397_v44, %v3401_v0  ;;  %v5516_v0 = vld [vmem:[%s5993_s11 + $0x3c] sm:$0xff] }
 0x19a   : > { %v1463_v32 = vpop.f32.mrf.mxu2  ;;  %v1085_v31 = vpop.f32.mrf.mxu1  ;;  %v6897_v58 = vadd.f32 %v2455_v55, %v1826_v62  ;;  %v4029_v27 = vrot.slane %v4027_v61, 4  ;;  %v3407_v55 = vshll.u32 %v5296_v46, 16  ;;  %v3417_v62 = vshrl.u32 %v6900_v39, 16 }
 0x19b   : > { %v1513_v22 = vadd.f32 %v1463_v32, %v1084_v37  ;;  %v1086_v9 = vadd.f32 %v1085_v31, %v6523_v51  ;;  %v2747_v2 = vpack.c.b16 %v2719_v3, %v2718_v16  ;;  %v5754_v37 = vld [vmem:[%s5993_s11 + $0x40] sm:$0xf]  ;;  %v6920_v31 = vrot.slane %v3413_v11, 5 }
 0x19c   : > { %3837 = vmatmul.bf16.gmra.mxu3 %v3741_v54  ;;  %v2614_v32 = vrot.slane %v5754_v37, 5  ;;  %v3409_v13 = vrot.slane %v3407_v55, 5  ;;  %v4031_v51 = vsel %vm6308_vm5, %v4029_v27, %v4030_v35  ;;  %v3419_v46 = vrot.slane %v3417_v62, 4  ;;  %v5299_v37 = vld [vmem:[%s5993_s11 + $0x54] sm:$0xf] }
 0x19d   : > { %v2458_v25 = vpop.f32.mrf.mxu0  ;;  %v5112_v3 = vrot.slane %v5096_v18, 9 }
 0x19e   : > { %v2616_v8 = vrot.slane %v2614_v32, 4  ;;  %v3420_v35 = vor.u32 %v3419_v46, %v6920_v31  ;;  %v5368_v46 = vld [vmem:[%s5993_s11 + $0x48] sm:$0xe] }
 0x19f   : > { %v1777_v19 = vpop.f32.mrf.mxu3 }
 0x1a0   : > { %4262 = vmatmul.bf16.gmra.mxu0 %v4166_v33  ;;  %v1827_v57 = vadd.f32 %v1777_v19, %v1513_v22  ;;  %v3714_v22 = vunpack.c.l.b16 %v3402_v42  ;;  %v4028_v33 = vsel %vm6308_vm5, %v5383_v21, %v4027_v61  ;;  %v5755_v19 = vld [vmem:[%s5993_s11 + $0x44] sm:$0x1]  ;;  %v4139_v61 = vunpack.c.l.b16 %v4031_v51 }
 0x1a1   : > { %v2617_v42 = vrot.slane %v5755_v19, 5  ;;  %v4138_v55 = vunpack.c.l.b16 %v4028_v33  ;;  %v3410_v21 = vor.u32 %v3409_v13, %v3406_v49 }
 0x1a2   : > { %v1465_v54 = vpop.f32.mrf.mxu2  ;;  %v6912_v26 = vadd.f32 %v2458_v25, %v1827_v57  ;;  %v1088_v53 = vpop.f32.mrf.mxu1  ;;  %v6923_v25 = vld [vmem:[%s5993_s11 + $0x50] sm:$0x1]  ;;  %v3742_v27 = vpack.c.b16 %v3714_v22, %v3713_v4  ;;  %v3421_v22 = vrot.slane %v3420_v35, 4 }
 0x1a3   : > { %v1514_v44 = vadd.f32 %v1465_v54, %v1086_v9  ;;  %v3423_v11 = vshll.u32 %v6923_v25, 16  ;;  %v1089_v62 = vadd.f32 %v1088_v53, %v6544_v14  ;;  %v2615_v54 = vsel %vm6308_vm5, %v5112_v3, %v2614_v32 }
 0x1a4   : > { %v3411_v49 = vrot.slane %v3410_v21, 4  ;;  %v4034_v14 = vrot.slane %v6900_v39, 5  ;;  %v2720_v32 = vunpack.c.l.b16 %v2615_v54  ;;  %v3428_v3 = vshrl.u32 %v5299_v37, 16 }
 0x1a5   : > { %v2460_v16 = vpop.f32.mrf.mxu0  ;;  %2847 = vmatmul.bf16.gmra.mxu1 %v2747_v2  ;;  %v2618_v2 = vsel %vm6308_vm5, %v2616_v8, %v2617_v42  ;;  %v3425_v13 = vrot.slane %v3423_v11, 5  ;;  %v3431_v8 = vshll.u32 %v5299_v37, 16  ;;  %v4037_v35 = vrot.slane %v6923_v25, 5 }
 0x1a6   : > { %v2721_v51 = vunpack.c.l.b16 %v2618_v2  ;;  %v4036_v21 = vrot.slane %v4034_v14, 4  ;;  %v3430_v11 = vrot.slane %v3428_v3, 4 }
 0x1a7   : > { %v1779_v7 = vpop.f32.mrf.mxu3  ;;  %3161 = vmatmul.bf16.gmra.mxu2 %v5516_v0  ;;  %v4167_v0 = vpack.c.b16 %v4139_v61, %v4138_v55  ;;  %v3416_v55 = vsel %vm6008_vm2, %v3411_v49, %v6920_v31  ;;  %v5384_v61 = vrot.slane %v5368_v46, 9 }
 0x1a8   : > { %v1828_v57 = vadd.f32 %v1779_v7, %v1514_v44  ;;  %v6935_v44 = vld [vmem:[%s5993_s11 + $0x58] sm:$0xf]  ;;  %v4038_v46 = vsel %vm6308_vm5, %v4036_v21, %v4037_v35 }
 0x1a9   : > { %v3437_v19 = vshll.u32 %v6935_v44, 16  ;;  %v3441_v42 = vshrl.u32 %v6935_v44, 16 }
 0x1aa   : > { %v1468_v9 = vpop.f32.mrf.mxu2  ;;  %v1090_v4 = vpop.f32.mrf.mxu1  ;;  %v6938_v53 = vadd.f32 %v2460_v16, %v1828_v57  ;;  %v3426_v16 = vsel %vm6008_vm2, %v3421_v22, %v3425_v13  ;;  %v6957_v22 = vld [vmem:[%s5993_s11 + $0x5c] sm:$0x1] }
 0x1ab   : > { %v1515_v18 = vadd.f32 %v1468_v9, %v1089_v62  ;;  %v1091_v57 = vadd.f32 %v1090_v4, %v6559_v38  ;;  %v3433_v9 = vrot.slane %v3431_v8, 5  ;;  %v6950_v31 = vrot.slane %v3437_v19, 5 }
 0x1ac   : > { %3842 = vmatmul.bf16.gmra.mxu3 %v3742_v27  ;;  %v2748_v27 = vpack.c.b16 %v2721_v51, %v2720_v32  ;;  %v3443_v54 = vrot.slane %v3441_v42, 4  ;;  %v3715_v4 = vunpack.c.l.b16 %v3416_v55  ;;  %v3716_v13 = vunpack.c.l.b16 %v3426_v16  ;;  %v5097_v32 = vld [vmem:[%s5993_s11 + $0x48] sm:$0xe]  ;;  %v5757_v55 = vld [vmem:[%s5993_s11 + $0x50] sm:$0x1] }
 0x1ad   : > { %v2463_v33 = vpop.f32.mrf.mxu0  ;;  %v4035_v51 = vsel %vm6308_vm5, %v5384_v61, %v4034_v14  ;;  %v3447_v8 = vshll.u32 %v6957_v22, 16  ;;  %v5113_v42 = vrot.slane %v5097_v32, 9  ;;  %v4141_v61 = vunpack.c.l.b16 %v4038_v46  ;;  %v5302_v32 = vld [vmem:[%s5993_s11 + $0x60] sm:$0xf] }
 0x1ae   : > { %v3444_v3 = vor.u32 %v3443_v54, %v6950_v31  ;;  %v4140_v14 = vunpack.c.l.b16 %v4035_v51  ;;  %v6978_v51 = vld [vmem:[%s5993_s11 + $0x64] sm:$0xf] }
 0x1af   : > { %v1782_v7 = vpop.f32.mrf.mxu3 }
 0x1b0   : > { %4267 = vmatmul.bf16.gmra.mxu0 %v4167_v0  ;;  %v1829_v39 = vadd.f32 %v1782_v7, %v1515_v18  ;;  %v5517_v0 = vld [vmem:[%s5993_s11 + $0x48] sm:$0xff] }
 0x1b1   : > { %v5756_v18 = vld [vmem:[%s5993_s11 + $0x4c] sm:$0xf] }
 0x1b2   : > { %v1470_v62 = vpop.f32.mrf.mxu2  ;;  %v6952_v2 = vadd.f32 %v2463_v33, %v1829_v39  ;;  %v2621_v49 = vrot.slane %v5756_v18, 5  ;;  %v1093_v38 = vpop.f32.mrf.mxu1  ;;  %v3434_v33 = vor.u32 %v3433_v9, %v3430_v11  ;;  %v2624_v39 = vrot.slane %v5757_v55, 5  ;;  %v5369_v18 = vld [vmem:[%s5993_s11 + $0x54] sm:$0xe] }
 0x1b3   : > { %v1516_v37 = vadd.f32 %v1470_v62, %v1091_v57  ;;  %v3743_v57 = vpack.c.b16 %v3716_v13, %v3715_v4  ;;  %v1094_v21 = vadd.f32 %v1093_v38, %v6429_v50  ;;  %v3445_v11 = vrot.slane %v3444_v3, 4 }
 0x1b4   : > { %v2623_v7 = vrot.slane %v2621_v49, 4  ;;  %v3435_v35 = vrot.slane %v3434_v33, 4  ;;  %v3449_v62 = vrot.slane %v3447_v8, 5  ;;  %v2622_v54 = vsel %vm6308_vm5, %v5113_v42, %v2621_v49 }
 0x1b5   : > { %v2465_v25 = vpop.f32.mrf.mxu0  ;;  %2852 = vmatmul.bf16.gmra.mxu1 %v2748_v27  ;;  %v4168_v4 = vpack.c.b16 %v4141_v61, %v4140_v14  ;;  %v2722_v46 = vunpack.c.l.b16 %v2622_v54  ;;  %v5385_v3 = vrot.slane %v5369_v18, 9  ;;  %v3452_v42 = vshrl.u32 %v5302_v32, 16  ;;  %v5098_v54 = vld [vmem:[%s5993_s11 + $0x54] sm:$0xe] }
 0x1b6   : > { %v3440_v49 = vsel %vm6008_vm2, %v3435_v35, %v6950_v31  ;;  %v4044_v55 = vrot.slane %v6957_v22, 5 }
 0x1b7   : > { %v1784_v19 = vpop.f32.mrf.mxu3  ;;  %3166 = vmatmul.bf16.gmra.mxu2 %v5517_v0  ;;  %v2625_v0 = vsel %vm6308_vm5, %v2623_v7, %v2624_v39  ;;  %v3461_v39 = vshll.u32 %v6978_v51, 16  ;;  %v3717_v61 = vunpack.c.l.b16 %v3440_v49  ;;  %v3454_v22 = vrot.slane %v3452_v42, 4 }
 0x1b8   : > { %v1830_v16 = vadd.f32 %v1784_v19, %v1516_v37  ;;  %v4041_v37 = vrot.slane %v6935_v44, 5  ;;  %v2723_v33 = vunpack.c.l.b16 %v2625_v0  ;;  %v3450_v44 = vsel %vm6008_vm2, %v3445_v11, %v3449_v62  ;;  %v5518_v62 = vld [vmem:[%s5993_s11 + $0x54] sm:$0xff] }
 0x1ba   : > { %v1473_v27 = vpop.f32.mrf.mxu2  ;;  %v1095_v13 = vpop.f32.mrf.mxu1  ;;  %v6975_v50 = vadd.f32 %v2465_v25, %v1830_v16  ;;  %v4043_v19 = vrot.slane %v4041_v37, 4  ;;  %v3455_v25 = vshll.u32 %v5302_v32, 16  ;;  %v3465_v16 = vshrl.u32 %v6978_v51, 16 }
 0x1bb   : > { %v1517_v9 = vadd.f32 %v1473_v27, %v1094_v21  ;;  %v1096_v31 = vadd.f32 %v1095_v13, %v6452_v40  ;;  %v2749_v14 = vpack.c.b16 %v2723_v33, %v2722_v46  ;;  %v5758_v21 = vld [vmem:[%s5993_s11 + $0x58] sm:$0xf]  ;;  %v3463_v13 = vrot.slane %v3461_v39, 5  ;;  %v6999_v33 = vld [vmem:[%s5993_s11 + $0x68] sm:$0x1] }
 0x1bc   : > { %3847 = vmatmul.bf16.gmra.mxu3 %v3743_v57  ;;  %v2628_v27 = vrot.slane %v5758_v21, 5  ;;  %v3457_v0 = vrot.slane %v3455_v25, 5  ;;  %v4045_v40 = vsel %vm6308_vm5, %v4043_v19, %v4044_v55  ;;  %v3467_v32 = vrot.slane %v3465_v16, 4  ;;  %v5305_v21 = vld [vmem:[%s5993_s11 + $0x6c] sm:$0xf] }
 0x1bd   : > { %v2468_v38 = vpop.f32.mrf.mxu0  ;;  %v3471_v55 = vshll.u32 %v6999_v33, 16 }
 0x1be   : > { %v2630_v49 = vrot.slane %v2628_v27, 4  ;;  %v3468_v19 = vor.u32 %v3467_v32, %v3463_v13  ;;  %v5370_v32 = vld [vmem:[%s5993_s11 + $0x60] sm:$0xe] }
 0x1bf   : > { %v1787_v8 = vpop.f32.mrf.mxu3 }
 0x1c0   : > { %4272 = vmatmul.bf16.gmra.mxu0 %v4168_v4  ;;  %v1831_v7 = vadd.f32 %v1787_v8, %v1517_v9  ;;  %v3718_v9 = vunpack.c.l.b16 %v3450_v44  ;;  %v4042_v4 = vsel %vm6308_vm5, %v5385_v3, %v4041_v37  ;;  %v5759_v8 = vld [vmem:[%s5993_s11 + $0x5c] sm:$0x1]  ;;  %v3458_v37 = vor.u32 %v3457_v0, %v3454_v22  ;;  %v7010_v22 = vld [vmem:[%s5993_s11 + $0x70] sm:$0xf] }
 0x1c1   : > { %v2631_v44 = vrot.slane %v5759_v8, 5  ;;  %v4142_v25 = vunpack.c.l.b16 %v4042_v4  ;;  %v3485_v8 = vshll.u32 %v7010_v22, 16 }
 0x1c2   : > { %v1475_v57 = vpop.f32.mrf.mxu2  ;;  %v6990_v35 = vadd.f32 %v2468_v38, %v1831_v7  ;;  %v1098_v18 = vpop.f32.mrf.mxu1  ;;  %v5114_v38 = vrot.slane %v5098_v54, 9  ;;  %v4143_v7 = vunpack.c.l.b16 %v4045_v40  ;;  %v3459_v4 = vrot.slane %v3458_v37, 4 }
 0x1c3   : > { %v1518_v11 = vadd.f32 %v1475_v57, %v1096_v31  ;;  %v3744_v31 = vpack.c.b16 %v3718_v9, %v3717_v61  ;;  %v1099_v39 = vadd.f32 %v1098_v18, %v6473_v6  ;;  %v3473_v9 = vrot.slane %v3471_v55, 5 }
 0x1c4   : > { %v2629_v57 = vsel %vm6308_vm5, %v5114_v38, %v2628_v27  ;;  %v4048_v6 = vrot.slane %v6978_v51, 5  ;;  %v3476_v38 = vshrl.u32 %v5305_v21, 16 }
 0x1c5   : > { %v2470_v46 = vpop.f32.mrf.mxu0  ;;  %2857 = vmatmul.bf16.gmra.mxu1 %v2749_v14  ;;  %v2632_v14 = vsel %vm6308_vm5, %v2630_v49, %v2631_v44  ;;  %v2724_v27 = vunpack.c.l.b16 %v2629_v57  ;;  %v3479_v49 = vshll.u32 %v5305_v21, 16  ;;  %v3489_v44 = vshrl.u32 %v7010_v22, 16 }
 0x1c6   : > { %v2725_v40 = vunpack.c.l.b16 %v2632_v14  ;;  %v4050_v37 = vrot.slane %v4048_v6, 4  ;;  %v3478_v55 = vrot.slane %v3476_v38, 4 }
 0x1c7   : > { %v1789_v42 = vpop.f32.mrf.mxu3  ;;  %3171 = vmatmul.bf16.gmra.mxu2 %v5518_v62  ;;  %v4169_v62 = vpack.c.b16 %v4143_v7, %v4142_v25  ;;  %v3464_v25 = vsel %vm6008_vm2, %v3459_v4, %v3463_v13  ;;  %v5386_v7 = vrot.slane %v5370_v32, 9  ;;  %v7024_v13 = vrot.slane %v3485_v8, 5 }
 0x1c8   : > { %v1832_v3 = vadd.f32 %v1789_v42, %v1518_v11  ;;  %v3469_v11 = vrot.slane %v3468_v19, 4  ;;  %v4051_v19 = vrot.slane %v6999_v33, 5  ;;  %v3491_v57 = vrot.slane %v3489_v44, 4 }
 0x1ca   : > { %v1478_v16 = vpop.f32.mrf.mxu2  ;;  %v1100_v61 = vpop.f32.mrf.mxu1  ;;  %v7013_v0 = vadd.f32 %v2470_v46, %v1832_v3  ;;  %v3474_v46 = vsel %vm6008_vm2, %v3469_v11, %v3473_v9  ;;  %v5099_v9 = vld [vmem:[%s5993_s11 + $0x60] sm:$0xe]  ;;  %v4052_v32 = vsel %vm6308_vm5, %v4050_v37, %v4051_v19  ;;  %v3492_v38 = vor.u32 %v3491_v57, %v7024_v13 }
 0x1cb   : > { %v1519_v54 = vadd.f32 %v1478_v16, %v1099_v39  ;;  %v1101_v3 = vadd.f32 %v1100_v61, %v6487_v28  ;;  %v3481_v16 = vrot.slane %v3479_v49, 5  ;;  %v3719_v28 = vunpack.c.l.b16 %v3464_v25 }
 0x1cc   : > { %3852 = vmatmul.bf16.gmra.mxu3 %v3744_v31  ;;  %v2750_v31 = vpack.c.b16 %v2725_v40, %v2724_v27  ;;  %v3720_v61 = vunpack.c.l.b16 %v3474_v46  ;;  %v7032_v27 = vld [vmem:[%s5993_s11 + $0x74] sm:$0x1]  ;;  %v4049_v40 = vsel %vm6308_vm5, %v5386_v7, %v4048_v6  ;;  %v5115_v8 = vrot.slane %v5099_v9, 9 }
 0x1cd   : > { %v2473_v18 = vpop.f32.mrf.mxu0  ;;  %v4145_v6 = vunpack.c.l.b16 %v4052_v32  ;;  %v3493_v19 = vrot.slane %v3492_v38, 4 }
 0x1cf   : > { %v1792_v42 = vpop.f32.mrf.mxu3 }
 0x1d0   : > { %4277 = vmatmul.bf16.gmra.mxu0 %v4169_v62  ;;  %v1833_v51 = vadd.f32 %v1792_v42, %v1519_v54  ;;  %v5519_v62 = vld [vmem:[%s5993_s11 + $0x60] sm:$0xff]  ;;  %v5761_v42 = vld [vmem:[%s5993_s11 + $0x68] sm:$0x1] }
 0x1d1   : > { %v5760_v54 = vld [vmem:[%s5993_s11 + $0x64] sm:$0xf]  ;;  %v2638_v25 = vrot.slane %v5761_v42, 5 }
 0x1d2   : > { %v1480_v39 = vpop.f32.mrf.mxu2  ;;  %v7026_v14 = vadd.f32 %v2473_v18, %v1833_v51  ;;  %v2635_v4 = vrot.slane %v5760_v54, 5  ;;  %v1103_v11 = vpop.f32.mrf.mxu1  ;;  %v3482_v18 = vor.u32 %v3481_v16, %v3478_v55  ;;  %v3495_v51 = vshll.u32 %v7032_v27, 16 }
 0x1d3   : > { %v1520_v21 = vadd.f32 %v1480_v39, %v1101_v3  ;;  %v3745_v3 = vpack.c.b16 %v3720_v61, %v3719_v28  ;;  %v4144_v39 = vunpack.c.l.b16 %v4049_v40  ;;  %v1104_v7 = vadd.f32 %v1103_v11, %v6505_v63  ;;  %v5371_v28 = vld [vmem:[%s5993_s11 + $0x6c] sm:$0xe]  ;;  %v5308_v11 = vld [vmem:[%s5993_s11 + $0x78] sm:$0xf] }
 0x1d4   : > { %v2637_v44 = vrot.slane %v2635_v4, 4  ;;  %v2636_v16 = vsel %vm6308_vm5, %v5115_v8, %v2635_v4  ;;  %v4055_v61 = vrot.slane %v7010_v22, 5  ;;  %v5387_v8 = vrot.slane %v5371_v28, 9 }
 0x1d5   : > { %v2475_v33 = vpop.f32.mrf.mxu0  ;;  %2862 = vmatmul.bf16.gmra.mxu1 %v2750_v31  ;;  %v3483_v31 = vrot.slane %v3482_v18, 4  ;;  %v2726_v40 = vunpack.c.l.b16 %v2636_v16  ;;  %v7052_v18 = vld [vmem:[%s5993_s11 + $0x7c] sm:$0xf]  ;;  %v3500_v42 = vshrl.u32 %v5308_v11, 16 }
 0x1d6   : > { %v2639_v57 = vsel %vm6308_vm5, %v2637_v44, %v2638_v25  ;;  %v4058_v44 = vrot.slane %v7032_v27, 5 }
 0x1d7   : > { %v1794_v49 = vpop.f32.mrf.mxu3  ;;  %3176 = vmatmul.bf16.gmra.mxu2 %v5519_v62  ;;  %v3497_v62 = vrot.slane %v3495_v51, 5  ;;  %v2727_v32 = vunpack.c.l.b16 %v2639_v57  ;;  %v3488_v4 = vsel %vm6008_vm2, %v3483_v31, %v7024_v13  ;;  %v3503_v51 = vshll.u32 %v5308_v11, 16  ;;  %v5762_v31 = vld [vmem:[%s5993_s11 + $0x70] sm:$0xf] }
 0x1d8   : > { %v1834_v46 = vadd.f32 %v1794_v49, %v1520_v21  ;;  %v4170_v21 = vpack.c.b16 %v4145_v6, %v4144_v39  ;;  %v3513_v13 = vshrl.u32 %v7052_v18, 16  ;;  %v3721_v27 = vunpack.c.l.b16 %v3488_v4 }
 0x1d9   : > { %v3498_v49 = vsel %vm6008_vm2, %v3493_v19, %v3497_v62  ;;  %v2751_v39 = vpack.c.b16 %v2727_v32, %v2726_v40  ;;  %v2642_v19 = vrot.slane %v5762_v31, 5  ;;  %v5100_v62 = vld [vmem:[%s5993_s11 + $0x6c] sm:$0xe]  ;;  %v3505_v28 = vrot.slane %v3503_v51, 5  ;;  %v7073_v40 = vld [vmem:[%s5993_s11 + $0x80] sm:$0x1] }
 0x1da   : > { %v1483_v37 = vpop.f32.mrf.mxu2  ;;  %v1105_v54 = vpop.f32.mrf.mxu1  ;;  %v7048_v9 = vadd.f32 %v2475_v33, %v1834_v46  ;;  %v4057_v33 = vrot.slane %v4055_v61, 4  ;;  %v3509_v46 = vshll.u32 %v7052_v18, 16  ;;  %v3722_v16 = vunpack.c.l.b16 %v3498_v49  ;;  %v5763_v49 = vld [vmem:[%s5993_s11 + $0x74] sm:$0x1] }
 0x1db   : > { %v1521_v55 = vadd.f32 %v1483_v37, %v1104_v7  ;;  %v1106_v25 = vadd.f32 %v1105_v54, %v6536_v41  ;;  %v5520_v37 = vld [vmem:[%s5993_s11 + $0x6c] sm:$0xff]  ;;  %v4056_v41 = vsel %vm6308_vm5, %v5387_v8, %v4055_v61  ;;  %v3502_v54 = vrot.slane %v3500_v42, 4 }
 0x1dc   : > { %3857 = vmatmul.bf16.gmra.mxu3 %v3745_v3  ;;  %v4059_v57 = vsel %vm6308_vm5, %v4057_v33, %v4058_v44  ;;  %v3515_v11 = vrot.slane %v3513_v13, 4  ;;  %v2644_v4 = vrot.slane %v2642_v19, 4  ;;  %v3746_v8 = vpack.c.b16 %v3722_v16, %v3721_v27 }
 0x1dd   : > { %v2478_v63 = vpop.f32.mrf.mxu0  ;;  %v4146_v33 = vunpack.c.l.b16 %v4056_v41  ;;  %v4147_v44 = vunpack.c.l.b16 %v4059_v57  ;;  %v4062_v16 = vrot.slane %v7052_v18, 5 }
 0x1df   : > { %v1797_v38 = vpop.f32.mrf.mxu3  ;;  %v4171_v31 = vpack.c.b16 %v4147_v44, %v4146_v33 }
 0x1e0   : > { %4282 = vmatmul.bf16.gmra.mxu0 %v4170_v21  ;;  %v1835_v22 = vadd.f32 %v1797_v38, %v1521_v55  ;;  %v5116_v38 = vrot.slane %v5100_v62, 9 }
 0x1e2   : > { %v1485_v3 = vpop.f32.mrf.mxu2  ;;  %v7063_v6 = vadd.f32 %v2478_v63, %v1835_v22  ;;  %v1108_v55 = vpop.f32.mrf.mxu1  ;;  %v3511_v63 = vrot.slane %v3509_v46, 5  ;;  %v2645_v22 = vrot.slane %v5763_v49, 5  ;;  %v3519_v46 = vshll.u32 %v7073_v40, 16 }
 0x1e3   : > { %v1522_v7 = vadd.f32 %v1485_v3, %v1106_v25  ;;  %v1109_v42 = vadd.f32 %v1108_v55, %v6556_v15  ;;  %v3506_v25 = vor.u32 %v3505_v28, %v3502_v54  ;;  %v7085_v15 = vld [vmem:[%s5993_s11 + $0x88] sm:$0xf]  ;;  %v5372_v28 = vld [vmem:[%s5993_s11 + $0x78] sm:$0xe] }
 0x1e4   : > { %v3516_v51 = vor.u32 %v3515_v11, %v3511_v63  ;;  %v3521_v54 = vrot.slane %v3519_v46, 5  ;;  %v3533_v49 = vshll.u32 %v7085_v15, 16  ;;  %v3537_v18 = vshrl.u32 %v7085_v15, 16  ;;  %v5101_v46 = vld [vmem:[%s5993_s11 + $0x78] sm:$0xe] }
 0x1e5   : > { %v2480_v21 = vpop.f32.mrf.mxu0  ;;  %2867 = vmatmul.bf16.gmra.mxu1 %v2751_v39  ;;  %v2643_v39 = vsel %vm6308_vm5, %v5116_v38, %v2642_v19  ;;  %v3507_v57 = vrot.slane %v3506_v25, 4 }
 0x1e6   : > { %v3517_v62 = vrot.slane %v3516_v51, 4  ;;  %v2728_v11 = vunpack.c.l.b16 %v2643_v39 }
 0x1e7   : > { %v1799_v32 = vpop.f32.mrf.mxu3  ;;  %3181 = vmatmul.bf16.gmra.mxu2 %v5520_v37  ;;  %v2646_v37 = vsel %vm6308_vm5, %v2644_v4, %v2645_v22  ;;  %v5388_v22 = vrot.slane %v5372_v28, 9  ;;  %v3512_v44 = vsel %vm6008_vm2, %v3507_v57, %v3511_v63 }
 0x1e8   : > { %v1836_v61 = vadd.f32 %v1799_v32, %v1522_v7  ;;  %v5311_v7 = vld [vmem:[%s5993_s11 + $0x84] sm:$0xf]  ;;  %v2729_v19 = vunpack.c.l.b16 %v2646_v37  ;;  %v3723_v57 = vunpack.c.l.b16 %v3512_v44 }
 0x1e9   : > { %v3524_v32 = vshrl.u32 %v5311_v7, 16  ;;  %v3527_v4 = vshll.u32 %v5311_v7, 16 }
 0x1ea   : > { %v1488_v13 = vpop.f32.mrf.mxu2  ;;  %v1110_v27 = vpop.f32.mrf.mxu1  ;;  %v7087_v55 = vadd.f32 %v2480_v21, %v1836_v61  ;;  %v4064_v61 = vrot.slane %v4062_v16, 4  ;;  %v2752_v51 = vpack.c.b16 %v2729_v19, %v2728_v11  ;;  %v5117_v19 = vrot.slane %v5101_v46, 9 }
 0x1eb   : > { %v1523_v3 = vadd.f32 %v1488_v13, %v1109_v42  ;;  %v1111_v33 = vadd.f32 %v1110_v27, %v6571_v1  ;;  %v3522_v42 = vsel %vm6008_vm2, %v3517_v62, %v3521_v54  ;;  %v5764_v13 = vld [vmem:[%s5993_s11 + $0x7c] sm:$0xf]  ;;  %v3526_v37 = vrot.slane %v3524_v32, 4 }
 0x1ec   : > { %3862 = vmatmul.bf16.gmra.mxu3 %v3746_v8  ;;  %v4065_v8 = vrot.slane %v7073_v40, 5  ;;  %v2649_v39 = vrot.slane %v5764_v13, 5  ;;  %v5521_v40 = vld [vmem:[%s5993_s11 + $0x78] sm:$0xff]  ;;  %v7103_v1 = vrot.slane %v3533_v49, 5  ;;  %v3539_v27 = vrot.slane %v3537_v18, 4 }
 0x1ed   : > { %v2483_v41 = vpop.f32.mrf.mxu0  ;;  %v3724_v28 = vunpack.c.l.b16 %v3522_v42  ;;  %v4063_v62 = vsel %vm6308_vm5, %v5388_v22, %v4062_v16  ;;  %v5373_v42 = vld [vmem:[%s5993_s11 + $0x84] sm:$0xe]  ;;  %v4069_v46 = vrot.slane %v7085_v15, 5  ;;  %v5314_v13 = vld [vmem:[%s5993_s11 + $0x90] sm:$0xf] }
 0x1ee   : > { %v4066_v54 = vsel %vm6308_vm5, %v4064_v61, %v4065_v8  ;;  %v2651_v32 = vrot.slane %v2649_v39, 4  ;;  %v4148_v18 = vunpack.c.l.b16 %v4063_v62  ;;  %v3540_v16 = vor.u32 %v3539_v27, %v7103_v1 }
 0x1ef   : > { %v1802_v38 = vpop.f32.mrf.mxu3  ;;  %v3747_v44 = vpack.c.b16 %v3724_v28, %v3723_v57  ;;  %v2650_v8 = vsel %vm6308_vm5, %v5117_v19, %v2649_v39  ;;  %v5389_v57 = vrot.slane %v5373_v42, 9  ;;  %v3548_v15 = vshrl.u32 %v5314_v13, 16 }
 0x1f0   : > { %4287 = vmatmul.bf16.gmra.mxu0 %v4171_v31  ;;  %v1837_v21 = vadd.f32 %v1802_v38, %v1523_v3  ;;  %v3529_v31 = vrot.slane %v3527_v4, 5  ;;  %v5765_v38 = vld [vmem:[%s5993_s11 + $0x80] sm:$0x1] }
 0x1f1   : > { %v2652_v4 = vrot.slane %v5765_v38, 5  ;;  %v3551_v38 = vshll.u32 %v5314_v13, 16 }
 0x1f2   : > { %v1490_v25 = vpop.f32.mrf.mxu2  ;;  %v7100_v3 = vadd.f32 %v2483_v41, %v1837_v21  ;;  %v2833_v63 = vpop.f32.mrf.mxu1  ;;  %v5313_v41 = vld [vmem:[%s5993_s11 + $0x8c] sm:$0x1]  ;;  %v4149_v21 = vunpack.c.l.b16 %v4066_v54  ;;  %v3541_v54 = vrot.slane %v3540_v16, 4 }
 0x1f3   : > { %v1524_v7 = vadd.f32 %v1490_v25, %v1111_v33  ;;  %v3530_v33 = vor.u32 %v3529_v31, %v3526_v37  ;;  %v3543_v61 = vshll.u32 %v5313_v41, 16  ;;  %v7120_v37 = vld [vmem:[%s5993_s11 + $0x94] sm:$0xf]  ;;  %v2730_v31 = vunpack.c.l.b16 %v2650_v8 }
 0x1f4   : > { %v2913_v28 = vadd.f32 %v2833_v63, %v6597_v59  ;;  %v5766_v63 = vld [vmem:[%s5993_s11 + $0x88] sm:$0xf]  ;;  %v3550_v8 = vrot.slane %v3548_v15, 4  ;;  %v3553_v42 = vrot.slane %v3551_v38, 5  ;;  %v5767_v38 = vld [vmem:[%s5993_s11 + $0x8c] sm:$0x1] }
 0x1f5   : > { %v2485_v11 = vpop.f32.mrf.mxu0  ;;  %2872 = vmatmul.bf16.gmra.mxu1 %v2752_v51  ;;  %v2653_v51 = vsel %vm6308_vm5, %v2651_v32, %v2652_v4  ;;  %v3531_v62 = vrot.slane %v3530_v33, 4  ;;  %v3545_v27 = vrot.slane %v3543_v61, 5  ;;  %v4071_v4 = vrot.slane %v4069_v46, 4  ;;  %v5102_v61 = vld [vmem:[%s5993_s11 + $0x84] sm:$0xe] }
 0x1f6   : > { %v2731_v32 = vunpack.c.l.b16 %v2653_v51 }
 0x1f7   : > { %v1804_v49 = vpop.f32.mrf.mxu3  ;;  %3186 = vmatmul.bf16.gmra.mxu2 %v5521_v40  ;;  %v4172_v40 = vpack.c.b16 %v4149_v21, %v4148_v18  ;;  %v3557_v18 = vshll.u32 %v7120_v37, 16  ;;  %v3561_v21 = vshrl.u32 %v7120_v37, 16  ;;  %v3546_v59 = vsel %vm6008_vm2, %v3541_v54, %v3545_v27  ;;  %v5522_v54 = vld [vmem:[%s5993_s11 + $0x84] sm:$0xff] }
 0x1f8   : > { %v1838_v22 = vadd.f32 %v1804_v49, %v1524_v7  ;;  %v4072_v49 = vrot.slane %v5313_v41, 5  ;;  %v4070_v41 = vsel %vm6308_vm5, %v5389_v57, %v4069_v46  ;;  %v3726_v27 = vunpack.c.l.b16 %v3546_v59 }
 0x1f9   : > { %v7139_v13 = vrot.slane %v3557_v18, 5 }
 0x1fa   : > { %v3147_v25 = vpop.f32.mrf.mxu2  ;;  %v2835_v7 = vpop.f32.mrf.mxu1  ;;  %v7122_v39 = vadd.f32 %v2485_v11, %v1838_v22  ;;  %v3536_v11 = vsel %vm6008_vm2, %v3531_v62, %v7103_v1  ;;  %v2656_v22 = vrot.slane %v5766_v63, 5  ;;  %v4073_v1 = vsel %vm6308_vm5, %v4071_v4, %v4072_v49 }
 0x1fb   : > { %v3227_v33 = vadd.f32 %v3147_v25, %v2913_v28  ;;  %v2914_v25 = vadd.f32 %v2835_v7, %v6608_v5  ;;  %v7143_v28 = vld [vmem:[%s5993_s11 + $0x98] sm:$0x1]  ;;  %v2659_v5 = vrot.slane %v5767_v38, 5  ;;  %v4150_v63 = vunpack.c.l.b16 %v4070_v41 }
 0x1fc   : > { %3867 = vmatmul.bf16.gmra.mxu3 %v3747_v44  ;;  %v2753_v44 = vpack.c.b16 %v2731_v32, %v2730_v31  ;;  %v3725_v31 = vunpack.c.l.b16 %v3536_v11  ;;  %v5118_v32 = vrot.slane %v5102_v61, 9  ;;  %v2658_v15 = vrot.slane %v2656_v22, 4 }
 0x1fd   : > { %v4253_v19 = vpop.f32.mrf.mxu0  ;;  %v4151_v4 = vunpack.c.l.b16 %v4073_v1  ;;  %v3554_v49 = vor.u32 %v3553_v42, %v3550_v8  ;;  %v5374_v8 = vld [vmem:[%s5993_s11 + $0x90] sm:$0xe] }
 0x1fe   : > { %v3748_v59 = vpack.c.b16 %v3726_v27, %v3725_v31  ;;  %v2657_v61 = vsel %vm6308_vm5, %v5118_v32, %v2656_v22  ;;  %v2660_v41 = vsel %vm6308_vm5, %v2658_v15, %v2659_v5  ;;  %v7161_v32 = vld [vmem:[%s5993_s11 + $0xa0] sm:$0xf] }
 0x1ff   : > { %v3828_v16 = vpop.f32.mrf.mxu3  ;;  %v3555_v42 = vrot.slane %v3554_v49, 4  ;;  %v2732_v27 = vunpack.c.l.b16 %v2657_v61  ;;  %v2733_v22 = vunpack.c.l.b16 %v2660_v41 }
 0x200   : > { %4292 = vmatmul.bf16.gmra.mxu0 %v4172_v40  ;;  %v3563_v40 = vrot.slane %v3561_v21, 4  ;;  %v3908_v62 = vadd.f32 %v3828_v16, %v3227_v33  ;;  %v3567_v21 = vshll.u32 %v7143_v28, 16 }
 0x202   : > { %v3149_v51 = vpop.f32.mrf.mxu2  ;;  %v2838_v57 = vpop.f32.mrf.mxu1  ;;  %v3564_v18 = vor.u32 %v3563_v40, %v7139_v13  ;;  %v4333_v33 = vadd.f32 %v4253_v19, %v3908_v62  ;;  %v3569_v62 = vrot.slane %v3567_v21, 5  ;;  %v3581_v21 = vshll.u32 %v7161_v32, 16 }
 0x203   : > { %v3228_v46 = vadd.f32 %v3149_v51, %v2914_v25  ;;  %v4076_v25 = vrot.slane %v7120_v37, 5  ;;  %v2915_v19 = vadd.f32 %v2838_v57, %v6618_v48  ;;  %v4079_v48 = vrot.slane %v7143_v28, 5 }
 0x204   : > { %v3565_v40 = vrot.slane %v3564_v18, 4  ;;  %v4467_v31 = vmul.f32 %v4333_v33, %v4333_v33  ;;  %v3560_v28 = vsel %vm6008_vm2, %v3555_v42, %v7139_v13  ;;  %v7181_v13 = vrot.slane %v3581_v21, 5 }
 0x205   : > { %v4255_v7 = vpop.f32.mrf.mxu0  ;;  %2877 = vmatmul.bf16.gmra.mxu1 %v2753_v44  ;;  %v4173_v44 = vpack.c.b16 %v4151_v4, %v4150_v63  ;;  %v4078_v4 = vrot.slane %v4076_v25, 4 }
 0x206   : > { %v3570_v41 = vsel %vm6008_vm2, %v3565_v40, %v3569_v62  ;;  %v5523_v40 = vld [vmem:[%s5993_s11 + $0x90] sm:$0xff]  ;;  %v3727_v62 = vunpack.c.l.b16 %v3560_v28 }
 0x207   : > { %v3830_v16 = vpop.f32.mrf.mxu3  ;;  %3191 = vmatmul.bf16.gmra.mxu2 %v5522_v54  ;;  %v5317_v54 = vld [vmem:[%s5993_s11 + $0x9c] sm:$0xf] }
 0x208   : > { %v3909_v11 = vadd.f32 %v3830_v16, %v3228_v46  ;;  %v5390_v46 = vrot.slane %v5374_v8, 9  ;;  %v3572_v57 = vshrl.u32 %v5317_v54, 16  ;;  %v3575_v49 = vshll.u32 %v5317_v54, 16 }
 0x209   : > { %v3585_v16 = vshrl.u32 %v7161_v32, 16 }
 0x20a   : > { %v4334_v51 = vadd.f32 %v4255_v7, %v3909_v11  ;;  %v3152_v1 = vpop.f32.mrf.mxu2  ;;  %v2840_v37 = vpop.f32.mrf.mxu1  ;;  %v5768_v11 = vld [vmem:[%s5993_s11 + $0x94] sm:$0xf]  ;;  %v4077_v8 = vsel %vm6308_vm5, %v5390_v46, %v4076_v25  ;;  %v3574_v54 = vrot.slane %v3572_v57, 4 }
 0x20b   : > { %v3229_v63 = vadd.f32 %v3152_v1, %v2915_v19  ;;  %v2754_v19 = vpack.c.b16 %v2733_v22, %v2732_v27  ;;  %v4080_v1 = vsel %vm6308_vm5, %v4078_v4, %v4079_v48  ;;  %v3587_v42 = vrot.slane %v3585_v16, 4  ;;  %v5769_v48 = vld [vmem:[%s5993_s11 + $0x98] sm:$0x1] }
 0x20c   : > { %v5557_v15 = vpack.c.bf16 %v4334_v51, %v4333_v33  ;;  %v4429_v38 = vadd.f32 %v4334_v51, %v4333_v33  ;;  %v4468_v5 = vmul.f32 %v4334_v51, %v4334_v51  ;;  %3872 = vmatmul.bf16.gmra.mxu3 %v3748_v59  ;;  %v2663_v59 = vrot.slane %v5768_v11, 5  ;;  %v5103_v51 = vld [vmem:[%s5993_s11 + $0x90] sm:$0xe] }
 0x20d   : > { %v4258_v7 = vpop.f32.mrf.mxu0  ;;  %v5119_v25 = vrot.slane %v5103_v51, 9  ;;  %v2666_v57 = vrot.slane %v5769_v48, 5  ;;  %v4152_v11 = vunpack.c.l.b16 %v4077_v8  ;;  %v3588_v16 = vor.u32 %v3587_v42, %v7181_v13  ;;  %v5375_v8 = vld [vmem:[%s5993_s11 + $0x9c] sm:$0xe] }
 0x20e   : > { %v4499_v18 = vadd.f32 %v4468_v5, %v4467_v31  ;;  %5558 = vst [vmem:[%s7166_s27] sm:$0xff] %v5557_v15   ;;  %v3577_v31 = vrot.slane %v3575_v49, 5  ;;  %v2916_v15 = vadd.f32 %v2840_v37, %v6632_v47  ;;  %v2665_v46 = vrot.slane %v2663_v59, 4 }
 0x20f   : > { %v3833_v33 = vpop.f32.mrf.mxu3  ;;  %v4153_v47 = vunpack.c.l.b16 %v4080_v1  ;;  %v2664_v51 = vsel %vm6308_vm5, %v5119_v25, %v2663_v59  ;;  %v3589_v42 = vrot.slane %v3588_v16, 4  ;;  %v7196_v59 = vld [vmem:[%s5993_s11 + $0xac] sm:$0xf] }
 0x210   : > { %4297 = vmatmul.bf16.gmra.mxu0 %v4173_v44  ;;  %v3910_v61 = vadd.f32 %v3833_v33, %v3229_v63  ;;  %v3728_v63 = vunpack.c.l.b16 %v3570_v41  ;;  %v3578_v21 = vor.u32 %v3577_v31, %v3574_v54  ;;  %v3605_v16 = vshll.u32 %v7196_v59, 16 }
 0x211   : > { %v4174_v1 = vpack.c.b16 %v4153_v47, %v4152_v11 }
 0x212   : > { %v4335_v44 = vadd.f32 %v4258_v7, %v3910_v61  ;;  %v3154_v5 = vpop.f32.mrf.mxu2  ;;  %v2843_v4 = vpop.f32.mrf.mxu1  ;;  %v5319_v7 = vld [vmem:[%s5993_s11 + $0xa4] sm:$0x1]  ;;  %v3749_v41 = vpack.c.b16 %v3728_v63, %v3727_v62 }
 0x213   : > { %v3230_v33 = vadd.f32 %v3154_v5, %v2916_v15  ;;  %v3591_v28 = vshll.u32 %v5319_v7, 16  ;;  %v2667_v15 = vsel %vm6308_vm5, %v2665_v46, %v2666_v57  ;;  %v2917_v54 = vadd.f32 %v2843_v4, %v6652_v52 }
 0x214   : > { %v4430_v27 = vadd.f32 %v4429_v38, %v4335_v44  ;;  %v4469_v22 = vmul.f32 %v4335_v44, %v4335_v44  ;;  %v3579_v5 = vrot.slane %v3578_v21, 4  ;;  %v2735_v62 = vunpack.c.l.b16 %v2667_v15 }
 0x215   : > { %v4260_v49 = vpop.f32.mrf.mxu0  ;;  %2882 = vmatmul.bf16.gmra.mxu1 %v2754_v19  ;;  %v3593_v63 = vrot.slane %v3591_v28, 5  ;;  %v4086_v4 = vrot.slane %v5319_v7, 5 }
 0x216   : > { %v4500_v37 = vadd.f32 %v4499_v18, %v4469_v22  ;;  %v4083_v18 = vrot.slane %v7161_v32, 5  ;;  %v2734_v22 = vunpack.c.l.b16 %v2664_v51  ;;  %v5104_v51 = vld [vmem:[%s5993_s11 + $0x9c] sm:$0xe] }
 0x217   : > { %v3835_v61 = vpop.f32.mrf.mxu3  ;;  %3196 = vmatmul.bf16.gmra.mxu2 %v5523_v40  ;;  %v5320_v40 = vld [vmem:[%s5993_s11 + $0xa8] sm:$0xf]  ;;  %v3594_v7 = vsel %vm6008_vm2, %v3589_v42, %v3593_v63  ;;  %v5524_v42 = vld [vmem:[%s5993_s11 + $0x9c] sm:$0xff] }
 0x218   : > { %v3911_v38 = vadd.f32 %v3835_v61, %v3230_v33  ;;  %v5391_v33 = vrot.slane %v5375_v8, 9  ;;  %v4085_v52 = vrot.slane %v4083_v18, 4  ;;  %v3596_v11 = vshrl.u32 %v5320_v40, 16 }
 0x219   : > { %v3599_v47 = vshll.u32 %v5320_v40, 16  ;;  %v3609_v61 = vshrl.u32 %v7196_v59, 16  ;;  %v2755_v15 = vpack.c.b16 %v2735_v62, %v2734_v22 }
 0x21a   : > { %v4336_v19 = vadd.f32 %v4260_v49, %v3911_v38  ;;  %v3157_v31 = vpop.f32.mrf.mxu2  ;;  %v2845_v57 = vpop.f32.mrf.mxu1  ;;  %v4087_v8 = vsel %vm6308_vm5, %v4085_v52, %v4086_v4  ;;  %v5771_v52 = vld [vmem:[%s5993_s11 + $0xa4] sm:$0x1] }
 0x21b   : > { %v3231_v32 = vadd.f32 %v3157_v31, %v2917_v54  ;;  %v3601_v54 = vrot.slane %v3599_v47, 5  ;;  %v2918_v31 = vadd.f32 %v2845_v57, %v6672_v34  ;;  %v2673_v4 = vrot.slane %v5771_v52, 5 }
 0x21c   : > { %v5562_v25 = vpack.c.bf16 %v4336_v19, %v4335_v44  ;;  %v4431_v46 = vadd.f32 %v4430_v27, %v4336_v19  ;;  %v4470_v48 = vmul.f32 %v4336_v19, %v4336_v19  ;;  %3877 = vmatmul.bf16.gmra.mxu3 %v3749_v41  ;;  %v5770_v44 = vld [vmem:[%s5993_s11 + $0xa0] sm:$0xf]  ;;  %v3584_v41 = vsel %vm6008_vm2, %v3579_v5, %v7181_v13 }
 0x21d   : > { %v4263_v49 = vpop.f32.mrf.mxu0  ;;  %v2670_v38 = vrot.slane %v5770_v44, 5  ;;  %v3598_v19 = vrot.slane %v3596_v11, 4  ;;  %v7213_v13 = vrot.slane %v3605_v16, 5  ;;  %v3611_v5 = vrot.slane %v3609_v61, 4 }
 0x21e   : > { %v4501_v21 = vadd.f32 %v4500_v37, %v4470_v48  ;;  %5634 = vst [vmem:[%s7166_s27 + $0x8] sm:$0xff] %v5562_v25   ;;  %v4084_v37 = vsel %vm6308_vm5, %v5391_v33, %v4083_v18  ;;  %v3729_v63 = vunpack.c.l.b16 %v3584_v41  ;;  %v3730_v25 = vunpack.c.l.b16 %v3594_v7 }
 0x21f   : > { %v3838_v28 = vpop.f32.mrf.mxu3  ;;  %v5120_v18 = vrot.slane %v5104_v51, 9  ;;  %v2672_v33 = vrot.slane %v2670_v38, 4  ;;  %v4154_v47 = vunpack.c.l.b16 %v4084_v37  ;;  %v4155_v34 = vunpack.c.l.b16 %v4087_v8  ;;  %v5376_v37 = vld [vmem:[%s5993_s11 + $0xa8] sm:$0xe] }
 0x220   : > { %4302 = vmatmul.bf16.gmra.mxu0 %v4174_v1  ;;  %v3912_v27 = vadd.f32 %v3838_v28, %v3231_v32  ;;  %v3602_v16 = vor.u32 %v3601_v54, %v3598_v19  ;;  %v3612_v61 = vor.u32 %v3611_v5, %v7213_v13 }
 0x221   : > { %v2671_v41 = vsel %vm6308_vm5, %v5120_v18, %v2670_v38  ;;  %v2674_v7 = vsel %vm6308_vm5, %v2672_v33, %v2673_v4  ;;  %v4175_v51 = vpack.c.b16 %v4155_v34, %v4154_v47  ;;  %v7228_v38 = vld [vmem:[%s5993_s11 + $0xb8] sm:$0xf] }
 0x222   : > { %v4337_v1 = vadd.f32 %v4263_v49, %v3912_v27  ;;  %v3159_v40 = vpop.f32.mrf.mxu2  ;;  %v2848_v32 = vpop.f32.mrf.mxu1  ;;  %v5322_v49 = vld [vmem:[%s5993_s11 + $0xb0] sm:$0x1]  ;;  %v3750_v27 = vpack.c.b16 %v3730_v25, %v3729_v63  ;;  %v3603_v54 = vrot.slane %v3602_v16, 4  ;;  %v2736_v5 = vunpack.c.l.b16 %v2671_v41 }
 0x223   : > { %v3232_v48 = vadd.f32 %v3159_v40, %v2918_v31  ;;  %v3615_v44 = vshll.u32 %v5322_v49, 16  ;;  %v2919_v8 = vadd.f32 %v2848_v32, %v6682_v10  ;;  %v3613_v31 = vrot.slane %v3612_v61, 4  ;;  %v5323_v40 = vld [vmem:[%s5993_s11 + $0xb4] sm:$0xf] }
 0x224   : > { %v4432_v22 = vadd.f32 %v4431_v46, %v4337_v1  ;;  %v4471_v62 = vmul.f32 %v4337_v1, %v4337_v1  ;;  %v5392_v25 = vrot.slane %v5376_v37, 9  ;;  %v4093_v32 = vrot.slane %v5322_v49, 5 }
 0x225   : > { %v4265_v11 = vpop.f32.mrf.mxu0  ;;  %2887 = vmatmul.bf16.gmra.mxu1 %v2755_v15  ;;  %v3617_v63 = vrot.slane %v3615_v44, 5  ;;  %v3620_v4 = vshrl.u32 %v5323_v40, 16  ;;  %v3629_v34 = vshll.u32 %v7228_v38, 16  ;;  %v3633_v16 = vshrl.u32 %v7228_v38, 16 }
 0x226   : > { %v4502_v57 = vadd.f32 %v4501_v21, %v4471_v62  ;;  %v4090_v21 = vrot.slane %v7196_v59, 5  ;;  %v3608_v44 = vsel %vm6008_vm2, %v3603_v54, %v7213_v13  ;;  %v5525_v54 = vld [vmem:[%s5993_s11 + $0xa8] sm:$0xff] }
 0x227   : > { %v3840_v28 = vpop.f32.mrf.mxu3  ;;  %3201 = vmatmul.bf16.gmra.mxu2 %v5524_v42  ;;  %v2737_v42 = vunpack.c.l.b16 %v2674_v7  ;;  %v3618_v49 = vsel %vm6008_vm2, %v3613_v31, %v3617_v63  ;;  %v3622_v7 = vrot.slane %v3620_v4, 4  ;;  %v7245_v13 = vrot.slane %v3629_v34, 5 }
 0x228   : > { %v3913_v46 = vadd.f32 %v3840_v28, %v3232_v48  ;;  %v4092_v10 = vrot.slane %v4090_v21, 4  ;;  %v3731_v31 = vunpack.c.l.b16 %v3608_v44  ;;  %v5377_v44 = vld [vmem:[%s5993_s11 + $0xb4] sm:$0xe] }
 0x22a   : > { %v4338_v15 = vadd.f32 %v4265_v11, %v3913_v46  ;;  %v3162_v19 = vpop.f32.mrf.mxu2  ;;  %v2850_v48 = vpop.f32.mrf.mxu1  ;;  %v3623_v11 = vshll.u32 %v5323_v40, 16  ;;  %v5105_v46 = vld [vmem:[%s5993_s11 + $0xa8] sm:$0xe]  ;;  %v4094_v41 = vsel %vm6308_vm5, %v4092_v10, %v4093_v32  ;;  %v3732_v40 = vunpack.c.l.b16 %v3618_v49 }
 0x22b   : > { %v3233_v59 = vadd.f32 %v3162_v19, %v2919_v8  ;;  %v3635_v19 = vrot.slane %v3633_v16, 4 }
 0x22c   : > { %v5567_v18 = vpack.c.bf16 %v4338_v15, %v4337_v1  ;;  %v4433_v33 = vadd.f32 %v4432_v22, %v4338_v15  ;;  %v4472_v62 = vmul.f32 %v4338_v15, %v4338_v15  ;;  %3882 = vmatmul.bf16.gmra.mxu3 %v3750_v27  ;;  %v5772_v1 = vld [vmem:[%s5993_s11 + $0xac] sm:$0xf]  ;;  %v2756_v27 = vpack.c.b16 %v2737_v42, %v2736_v5 }
 0x22d   : > { %v4268_v52 = vpop.f32.mrf.mxu0  ;;  %v2677_v28 = vrot.slane %v5772_v1, 5  ;;  %v3625_v37 = vrot.slane %v3623_v11, 5  ;;  %v2920_v15 = vadd.f32 %v2850_v48, %v6690_v12  ;;  %v4157_v12 = vunpack.c.l.b16 %v4094_v41 }
 0x22e   : > { %v4503_v47 = vadd.f32 %v4502_v57, %v4472_v62  ;;  %5635 = vst [vmem:[%s7166_s27 + $0x10] sm:$0xff] %v5567_v18   ;;  %v4091_v57 = vsel %vm6308_vm5, %v5392_v25, %v4090_v21  ;;  %v5121_v21 = vrot.slane %v5105_v46, 9  ;;  %v5773_v62 = vld [vmem:[%s5993_s11 + $0xb0] sm:$0x1]  ;;  %v3636_v11 = vor.u32 %v3635_v19, %v7245_v13 }
 0x22f   : > { %v3843_v61 = vpop.f32.mrf.mxu3  ;;  %v2679_v63 = vrot.slane %v2677_v28, 4  ;;  %v4156_v32 = vunpack.c.l.b16 %v4091_v57  ;;  %v3626_v4 = vor.u32 %v3625_v37, %v3622_v7  ;;  %v5326_v37 = vld [vmem:[%s5993_s11 + $0xc0] sm:$0xf] }
 0x230   : > { %4307 = vmatmul.bf16.gmra.mxu0 %v4175_v51  ;;  %v3914_v22 = vadd.f32 %v3843_v61, %v3233_v59  ;;  %v2680_v59 = vrot.slane %v5773_v62, 5  ;;  %v3751_v61 = vpack.c.b16 %v3732_v40, %v3731_v31  ;;  %v2678_v1 = vsel %vm6308_vm5, %v5121_v21, %v2677_v28  ;;  %v7260_v28 = vld [vmem:[%s5993_s11 + $0xc4] sm:$0xf] }
 0x231   : > { %v4176_v49 = vpack.c.b16 %v4157_v12, %v4156_v32  ;;  %v3627_v41 = vrot.slane %v3626_v4, 4  ;;  %v3637_v7 = vrot.slane %v3636_v11, 4  ;;  %v3647_v62 = vshll.u32 %v5326_v37, 16 }
 0x232   : > { %v4339_v51 = vadd.f32 %v4268_v52, %v3914_v22  ;;  %v3164_v8 = vpop.f32.mrf.mxu2  ;;  %v2853_v18 = vpop.f32.mrf.mxu1  ;;  %v5325_v52 = vld [vmem:[%s5993_s11 + $0xbc] sm:$0x1]  ;;  %v2681_v22 = vsel %vm6308_vm5, %v2679_v63, %v2680_v59  ;;  %v3657_v32 = vshrl.u32 %v7260_v28, 16 }
 0x233   : > { %v3234_v25 = vadd.f32 %v3164_v8, %v2920_v15  ;;  %v3639_v16 = vshll.u32 %v5325_v52, 16  ;;  %v2921_v46 = vadd.f32 %v2853_v18, %v6709_v60  ;;  %v2738_v15 = vunpack.c.l.b16 %v2678_v1 }
 0x234   : > { %v4434_v5 = vadd.f32 %v4433_v33, %v4339_v51  ;;  %v4473_v42 = vmul.f32 %v4339_v51, %v4339_v51  ;;  %v2739_v8 = vunpack.c.l.b16 %v2681_v22  ;;  %v3644_v18 = vshrl.u32 %v5326_v37, 16 }
 0x235   : > { %v4270_v10 = vpop.f32.mrf.mxu0  ;;  %2892 = vmatmul.bf16.gmra.mxu1 %v2756_v27  ;;  %v3641_v19 = vrot.slane %v3639_v16, 5  ;;  %v3632_v11 = vsel %vm6008_vm2, %v3627_v41, %v7245_v13  ;;  %v3649_v1 = vrot.slane %v3647_v62, 5 }
 0x236   : > { %v4504_v48 = vadd.f32 %v4503_v47, %v4473_v42  ;;  %v4097_v47 = vrot.slane %v7228_v38, 5  ;;  %v2757_v16 = vpack.c.b16 %v2739_v8, %v2738_v15  ;;  %v3733_v41 = vunpack.c.l.b16 %v3632_v11  ;;  %v5378_v11 = vld [vmem:[%s5993_s11 + $0xc0] sm:$0xe] }
 0x237   : > { %v3845_v34 = vpop.f32.mrf.mxu3  ;;  %3206 = vmatmul.bf16.gmra.mxu2 %v5525_v54  ;;  %v5393_v54 = vrot.slane %v5377_v44, 9  ;;  %v7459_v44 = vld [vmem:[#allocation9_spill] sm:$0xff] }
 0x238   : > { %v3915_v33 = vadd.f32 %v3845_v34, %v3234_v25  ;;  %v4099_v60 = vrot.slane %v4097_v47, 4  ;;  %v4100_v25 = vrot.slane %v5325_v52, 5  ;;  %v3642_v52 = vsel %vm6008_vm2, %v3637_v7, %v3641_v19  ;;  %v5106_v34 = vld [vmem:[%s5993_s11 + $0xb4] sm:$0xe] }
 0x239   : > { %v3734_v7 = vunpack.c.l.b16 %v3642_v52 }
 0x23a   : > { %v4340_v57 = vadd.f32 %v4270_v10, %v3915_v33  ;;  %v3167_v27 = vpop.f32.mrf.mxu2  ;;  %v2855_v63 = vpop.f32.mrf.mxu1  ;;  %v3653_v10 = vshll.u32 %v7260_v28, 16  ;;  %v4101_v33 = vsel %vm6308_vm5, %v4099_v60, %v4100_v25 }
 0x23b   : > { %v3235_v38 = vadd.f32 %v3167_v27, %v2921_v46  ;;  %v3659_v46 = vrot.slane %v3657_v32, 4  ;;  %v5526_v27 = vld [vmem:[%s5993_s11 + $0xb4] sm:$0xff] }
 0x23c   : > { %v5572_v31 = vpack.c.bf16 %v4340_v57, %v4339_v51  ;;  %v4435_v40 = vadd.f32 %v4434_v5, %v4340_v57  ;;  %v4474_v21 = vmul.f32 %v4340_v57, %v4340_v57  ;;  %3887 = vmatmul.bf16.gmra.mxu3 %v3751_v61  ;;  %v5774_v51 = vld [vmem:[%s5993_s11 + $0xb8] sm:$0xf]  ;;  %v3646_v61 = vrot.slane %v3644_v18, 4 }
 0x23d   : > { %v4273_v42 = vpop.f32.mrf.mxu0  ;;  %v2684_v4 = vrot.slane %v5774_v51, 5  ;;  %v7277_v13 = vrot.slane %v3653_v10, 5 }
 0x23e   : > { %v4505_v59 = vadd.f32 %v4504_v48, %v4474_v21  ;;  %5636 = vst [vmem:[%s7166_s27 + $0x18] sm:$0xff] %v5572_v31   ;;  %v4098_v48 = vsel %vm6308_vm5, %v5393_v54, %v4097_v47  ;;  %v5122_v47 = vrot.slane %v5106_v34, 9  ;;  %v5775_v31 = vld [vmem:[%s5993_s11 + $0xbc] sm:$0x1]  ;;  %v3650_v18 = vor.u32 %v3649_v1, %v3646_v61  ;;  %v7460_v34 = vld [vmem:[#allocation10_spill] sm:$0xff] }
 0x23f   : > { %v3848_v12 = vpop.f32.mrf.mxu3  ;;  %v2686_v37 = vrot.slane %v2684_v4, 4  ;;  %v2687_v21 = vrot.slane %v5775_v31, 5  ;;  %v4158_v60 = vunpack.c.l.b16 %v4098_v48  ;;  %v3660_v62 = vor.u32 %v3659_v46, %v7277_v13 }
 0x240   : > { %4312 = vmatmul.bf16.gmra.mxu0 %v4176_v49  ;;  %v3916_v5 = vadd.f32 %v3848_v12, %v3235_v38  ;;  %v2922_v49 = vadd.f32 %v2855_v63, %v7459_v44  ;;  %v5328_v38 = vld [vmem:[%s5993_s11 + $0xc8] sm:$0x1]  ;;  %v4159_v63 = vunpack.c.l.b16 %v4101_v33  ;;  %v3752_v12 = vpack.c.b16 %v3734_v7, %v3733_v41  ;;  %v5329_v44 = vld [vmem:[%s5993_s11 + $0xcc] sm:$0xf] }
 0x241   : > { %v3663_v32 = vshll.u32 %v5328_v38, 16  ;;  %v2685_v51 = vsel %vm6308_vm5, %v5122_v47, %v2684_v4  ;;  %v3651_v61 = vrot.slane %v3650_v18, 4  ;;  %v3661_v1 = vrot.slane %v3660_v62, 4  ;;  %v7292_v4 = vld [vmem:[%s5993_s11 + $0xd0] sm:$0xf] }
 0x242   : > { %v4341_v22 = vadd.f32 %v4273_v42, %v3916_v5  ;;  %v3169_v57 = vpop.f32.mrf.mxu2  ;;  %v2858_v54 = vpop.f32.mrf.mxu1  ;;  %v2688_v5 = vsel %vm6308_vm5, %v2686_v37, %v2687_v21  ;;  %v4177_v52 = vpack.c.b16 %v4159_v63, %v4158_v60  ;;  %v3668_v31 = vshrl.u32 %v5329_v44, 16 }
 0x243   : > { %v3236_v19 = vadd.f32 %v3169_v57, %v2922_v49  ;;  %v2740_v49 = vunpack.c.l.b16 %v2685_v51  ;;  %v2741_v57 = vunpack.c.l.b16 %v2688_v5  ;;  %v3665_v46 = vrot.slane %v3663_v32, 5 }
 0x244   : > { %v4436_v15 = vadd.f32 %v4435_v40, %v4341_v22  ;;  %v4475_v8 = vmul.f32 %v4341_v22, %v4341_v22  ;;  %v3671_v21 = vshll.u32 %v5329_v44, 16  ;;  %v3677_v60 = vshll.u32 %v7292_v4, 16 }
 0x245   : > { %v4275_v42 = vpop.f32.mrf.mxu0  ;;  %2897 = vmatmul.bf16.gmra.mxu1 %v2757_v16  ;;  %v2923_v16 = vadd.f32 %v2858_v54, %v7460_v34  ;;  %v4107_v54 = vrot.slane %v5328_v38, 5  ;;  %v3681_v63 = vshrl.u32 %v7292_v4, 16  ;;  %v3666_v38 = vsel %vm6008_vm2, %v3661_v1, %v3665_v46  ;;  %v5776_v34 = vld [vmem:[%s5993_s11 + $0xc4] sm:$0xf] }
 0x246   : > { %v4506_v25 = vadd.f32 %v4505_v59, %v4475_v8  ;;  %v4104_v59 = vrot.slane %v7260_v28, 5  ;;  %v2758_v62 = vpack.c.b16 %v2741_v57, %v2740_v49  ;;  %v3670_v32 = vrot.slane %v3668_v31, 4  ;;  %v5107_v49 = vld [vmem:[%s5993_s11 + $0xc0] sm:$0xe]  ;;  %v5331_v57 = vld [vmem:[%s5993_s11 + $0xd4] sm:$0x1] }
 0x247   : > { %v3850_v10 = vpop.f32.mrf.mxu3  ;;  %3211 = vmatmul.bf16.gmra.mxu2 %v5526_v27  ;;  %v5394_v27 = vrot.slane %v5378_v11, 9  ;;  %v7307_v11 = vrot.slane %v3677_v60, 5  ;;  %v3736_v44 = vunpack.c.l.b16 %v3666_v38  ;;  %v3687_v31 = vshll.u32 %v5331_v57, 16 }
 0x248   : > { %v3917_v40 = vadd.f32 %v3850_v10, %v3236_v19  ;;  %v4106_v19 = vrot.slane %v4104_v59, 4 }
 0x24a   : > { %v4342_v48 = vadd.f32 %v4275_v42, %v3917_v40  ;;  %v3172_v33 = vpop.f32.mrf.mxu2  ;;  %v2860_v28 = vpop.f32.mrf.mxu1  ;;  %v4108_v10 = vsel %vm6308_vm5, %v4106_v19, %v4107_v54  ;;  %v3673_v40 = vrot.slane %v3671_v21, 5 }
 0x24b   : > { %v3237_v37 = vadd.f32 %v3172_v33, %v2923_v16  ;;  %v2924_v51 = vadd.f32 %v2860_v28, %v6760_v24  ;;  %v2691_v16 = vrot.slane %v5776_v34, 5 }
 0x24c   : > { %v5577_v41 = vpack.c.bf16 %v4342_v48, %v4341_v22  ;;  %v4437_v7 = vadd.f32 %v4436_v15, %v4342_v48  ;;  %v4476_v47 = vmul.f32 %v4342_v48, %v4342_v48  ;;  %3892 = vmatmul.bf16.gmra.mxu3 %v3752_v12  ;;  %v3656_v15 = vsel %vm6008_vm2, %v3651_v61, %v7277_v13 }
 0x24d   : > { %v4278_v8 = vpop.f32.mrf.mxu0  ;;  %v3683_v13 = vrot.slane %v3681_v63, 4  ;;  %v3735_v48 = vunpack.c.l.b16 %v3656_v15  ;;  %v2693_v19 = vrot.slane %v2691_v16, 4 }
 0x24e   : > { %v4507_v42 = vadd.f32 %v4506_v25, %v4476_v47  ;;  %5637 = vst [vmem:[%s7166_s27 + $0x20] sm:$0xff] %v5577_v41   ;;  %v4105_v25 = vsel %vm6308_vm5, %v5394_v27, %v4104_v59  ;;  %v4161_v41 = vunpack.c.l.b16 %v4108_v10  ;;  %v3674_v47 = vor.u32 %v3673_v40, %v3670_v32 }
 0x24f   : > { %v3853_v18 = vpop.f32.mrf.mxu3  ;;  %v4160_v27 = vunpack.c.l.b16 %v4105_v25  ;;  %v3753_v60 = vpack.c.b16 %v3736_v44, %v3735_v48  ;;  %v3689_v10 = vrot.slane %v3687_v31, 5  ;;  %v4111_v32 = vrot.slane %v7292_v4, 5 }
 0x250   : > { %4317 = vmatmul.bf16.gmra.mxu0 %v4177_v52  ;;  %v3918_v22 = vadd.f32 %v3853_v18, %v3237_v37  ;;  %v5527_v52 = vld [vmem:[%s5993_s11 + $0xc0] sm:$0xff]  ;;  %v3684_v37 = vor.u32 %v3683_v13, %v7307_v11 }
 0x251   : > { %v4178_v63 = vpack.c.b16 %v4161_v41, %v4160_v27 }
 0x252   : > { %v4343_v12 = vadd.f32 %v4278_v8, %v3918_v22  ;;  %v3174_v5 = vpop.f32.mrf.mxu2  ;;  %v2863_v1 = vpop.f32.mrf.mxu1  ;;  %v5123_v8 = vrot.slane %v5107_v49, 9  ;;  %v3685_v38 = vrot.slane %v3684_v37, 4  ;;  %v4114_v49 = vrot.slane %v5331_v57, 5 }
 0x253   : > { %v3238_v61 = vadd.f32 %v3174_v5, %v2924_v51  ;;  %v2925_v22 = vadd.f32 %v2863_v1, %v6769_v36  ;;  %v5379_v36 = vld [vmem:[%s5993_s11 + $0xcc] sm:$0xe] }
 0x254   : > { %v4438_v59 = vadd.f32 %v4437_v7, %v4343_v12  ;;  %v4477_v33 = vmul.f32 %v4343_v12, %v4343_v12  ;;  %v5777_v7 = vld [vmem:[%s5993_s11 + $0xc8] sm:$0x1]  ;;  %v2692_v25 = vsel %vm6308_vm5, %v5123_v8, %v2691_v16  ;;  %v5395_v44 = vrot.slane %v5379_v36, 9 }
 0x255   : > { %v4280_v46 = vpop.f32.mrf.mxu0  ;;  %2902 = vmatmul.bf16.gmra.mxu1 %v2758_v62  ;;  %v2694_v54 = vrot.slane %v5777_v7, 5 }
 0x256   : > { %v4508_v24 = vadd.f32 %v4507_v42, %v4477_v33  ;;  %v3675_v42 = vrot.slane %v3674_v47, 4  ;;  %v2742_v33 = vunpack.c.l.b16 %v2692_v25  ;;  %v5528_v47 = vld [vmem:[%s5993_s11 + $0xcc] sm:$0xff]  ;;  %v4112_v8 = vsel %vm6308_vm5, %v5395_v44, %v4111_v32  ;;  %s5553_s11 = sshll.u32 %s5950_s19, 7 }
 0x257   : > { %v3855_v28 = vpop.f32.mrf.mxu3  ;;  %3216 = vmatmul.bf16.gmra.mxu2 %v5527_v52  ;;  %v2695_v62 = vsel %vm6308_vm5, %v2693_v19, %v2694_v54  ;;  %s4557_s30 = scalar_lea.hbm %s7448_s2, %s5553_s11 }
 0x258   : > { %v3919_v21 = vadd.f32 %v3855_v28, %v3238_v61  ;;  %v2743_v61 = vunpack.c.l.b16 %v2695_v62  ;;  %v3680_v1 = vsel %vm6008_vm2, %v3675_v42, %v7307_v11  ;;  %s4560_s6 = sshll.u32 %s4557_s30, 4  ;;  %s4561_s6 = int_to_ptr.hbm [resolvable:$true] %s4560_s6 }
 0x259   : > { %v3737_v37 = vunpack.c.l.b16 %v3680_v1  ;;  %s5792_s8 = sshra.s32 %s4561_s6, 4  ;;  %s5793_s8 = int_to_ptr.hbm [resolvable:$true] %s5792_s8 }
 0x25a   : > { %v4344_v18 = vadd.f32 %v4280_v46, %v3919_v21  ;;  %v3177_v15 = vpop.f32.mrf.mxu2  ;;  %v2865_v52 = vpop.f32.mrf.mxu1  ;;  %s5794_s9 = scalar_lea.hbm %s5793_s8, 128  ;;  %p5799_p0 = scmp.lt.s32.totalorder %s5793_s8, %s7448_s2 }
 0x25b   : > { %v3239_v13 = vadd.f32 %v3177_v15, %v2925_v22  ;;  %v2926_v27 = vadd.f32 %v2865_v52, %v6782_v45  ;;  %v4162_v45 = vunpack.c.l.b16 %v4112_v8  ;;  %p5795_p11 = scmp.ne.s32.totalorder %s5793_s8, %s5794_s9  ;;  %p5800_p1 = scmp.lt.s32.totalorder %s5798_s13, %s5794_s9 }
 0x25c   : > { %v5582_v40 = vpack.c.bf16 %v4344_v18, %v4343_v12  ;;  %v4439_v51 = vadd.f32 %v4438_v59, %v4344_v18  ;;  %v4478_v5 = vmul.f32 %v4344_v18, %v4344_v18  ;;  %3897 = vmatmul.bf16.gmra.mxu3 %v3753_v60  ;;  %v3690_v12 = vsel %vm6008_vm2, %v3685_v38, %v3689_v10 }
 0x25d   : > { %v4283_v48 = vpop.f32.mrf.mxu0  ;;  %v4113_v59 = vrot.slane %v4111_v32, 4  ;;  %v3738_v28 = vunpack.c.l.b16 %v3690_v12  ;;  %p5796_p12 = pnand %p5795_p11, %p5969_p5  ;;  %p5801_p2 = por %p5800_p1, %p5799_p0 }
 0x25e   : > { %v4509_v34 = vadd.f32 %v4508_v24, %v4478_v5  ;;  %5638 = vst [vmem:[%s7166_s27 + $0x28] sm:$0xff] %v5582_v40   ;;  %v2759_v24 = vpack.c.b16 %v2743_v61, %v2742_v33 }
 0x25f   : > { %v3858_v16 = vpop.f32.mrf.mxu3  ;;  %v4115_v30 = vsel %vm6308_vm5, %v4113_v59, %v4114_v49  ;;  %v3754_v18 = vpack.c.b16 %v3738_v28, %v3737_v37  ;;  %p5797_p13 = pneg %p5796_p12 }
 0x260   : > { %4322 = vmatmul.bf16.gmra.mxu0 %v4178_v63  ;;  %v3920_v4 = vadd.f32 %v3858_v16, %v3239_v13  ;;  %v4163_v60 = vunpack.c.l.b16 %v4115_v30 }
 0x261   : > { %p5802_p3 = pnand %p5801_p2, %p5797_p13 }
 0x262   : > { %v4345_v46 = vadd.f32 %v4283_v48, %v3920_v4  ;;  %v3179_v41 = vpop.f32.mrf.mxu2  ;;  %v2868_v54 = vpop.f32.mrf.mxu1  ;;  %v4179_v38 = vpack.c.b16 %v4163_v60, %v4162_v45 }
 0x263   : > { %v3240_v7 = vadd.f32 %v3179_v41, %v2926_v27  ;;  %v2927_v15 = vadd.f32 %v2868_v54, %v6795_v23 }
 0x264   : > { %v4440_v11 = vadd.f32 %v4439_v51, %v4345_v46  ;;  %v4479_v19 = vmul.f32 %v4345_v46, %v4345_v46 }
 0x265   : > { %v4285_v31 = vpop.f32.mrf.mxu0  ;;  %2907 = vmatmul.bf16.gmra.mxu1 %v2759_v24 }
 0x266   : > { %v4510_v57 = vadd.f32 %v4509_v34, %v4479_v19 }
 0x267   : > { %v3860_v21 = vpop.f32.mrf.mxu3  ;;  %3221 = vmatmul.bf16.gmra.mxu2 %v5528_v47 }
 0x268   : > { %v3921_v63 = vadd.f32 %v3860_v21, %v3240_v7 }
 0x26a   : > { %v4346_v22 = vadd.f32 %v4285_v31, %v3921_v63  ;;  %v3182_v42 = vpop.f32.mrf.mxu2  ;;  %v2870_v32 = vpop.f32.mrf.mxu1 }
 0x26b   : > { %v3241_v43 = vadd.f32 %v3182_v42, %v2927_v15  ;;  %v2928_v36 = vadd.f32 %v2870_v32, %v6819_v17 }
 0x26c   : > { %v5587_v25 = vpack.c.bf16 %v4346_v22, %v4345_v46  ;;  %v4441_v62 = vadd.f32 %v4440_v11, %v4346_v22  ;;  %v4480_v10 = vmul.f32 %v4346_v22, %v4346_v22  ;;  %3902 = vmatmul.bf16.gmra.mxu3 %v3754_v18 }
 0x26d   : > { %v4288_v40 = vpop.f32.mrf.mxu0 }
 0x26e   : > { %v4511_v51 = vadd.f32 %v4510_v57, %v4480_v10  ;;  %5639 = vst [vmem:[%s7166_s27 + $0x30] sm:$0xff] %v5587_v25  }
 0x26f   : > { %v3863_v5 = vpop.f32.mrf.mxu3 }
 0x270   : > { %4327 = vmatmul.bf16.gmra.mxu0 %v4179_v38  ;;  %v3922_v13 = vadd.f32 %v3863_v5, %v3241_v43 }
 0x272   : > { %v4347_v52 = vadd.f32 %v4288_v40, %v3922_v13  ;;  %v3184_v48 = vpop.f32.mrf.mxu2  ;;  %v2873_v61 = vpop.f32.mrf.mxu1 }
 0x273   : > { %v3242_v33 = vadd.f32 %v3184_v48, %v2928_v36  ;;  %v2929_v59 = vadd.f32 %v2873_v61, %v6834_v20 }
 0x274   : > { %v4442_v34 = vadd.f32 %v4441_v62, %v4347_v52  ;;  %v4481_v23 = vmul.f32 %v4347_v52, %v4347_v52 }
 0x275   : > { %v4290_v16 = vpop.f32.mrf.mxu0 }
 0x276   : > { %v4512_v1 = vadd.f32 %v4511_v51, %v4481_v23 }
 0x277   : > { %v3865_v44 = vpop.f32.mrf.mxu3 }
 0x278   : > { %v3923_v4 = vadd.f32 %v3865_v44, %v3242_v33 }
 0x27a   : > { %v4348_v12 = vadd.f32 %v4290_v16, %v3923_v4  ;;  %v3187_v49 = vpop.f32.mrf.mxu2  ;;  %v2875_v47 = vpop.f32.mrf.mxu1 }
 0x27b   : > { %v3243_v24 = vadd.f32 %v3187_v49, %v2929_v59  ;;  %v2930_v19 = vadd.f32 %v2875_v47, %v6860_v56 }
 0x27c   : > { %v5592_v46 = vpack.c.bf16 %v4348_v12, %v4347_v52  ;;  %v4443_v27 = vadd.f32 %v4442_v34, %v4348_v12  ;;  %v4482_v41 = vmul.f32 %v4348_v12, %v4348_v12 }
 0x27d   : > { %v4293_v17 = vpop.f32.mrf.mxu0 }
 0x27e   : > { %v4513_v37 = vadd.f32 %v4512_v1, %v4482_v41  ;;  %5640 = vst [vmem:[%s7166_s27 + $0x38] sm:$0xff] %v5592_v46  }
 0x27f   : > { %v3868_v28 = vpop.f32.mrf.mxu3 }
 0x280   : > { %v3924_v8 = vadd.f32 %v3868_v28, %v3243_v24 }
 0x282   : > { %v4349_v11 = vadd.f32 %v4293_v17, %v3924_v8  ;;  %v3189_v7 = vpop.f32.mrf.mxu2  ;;  %v2878_v20 = vpop.f32.mrf.mxu1 }
 0x283   : > { %v3244_v31 = vadd.f32 %v3189_v7, %v2930_v19  ;;  %v2931_v18 = vadd.f32 %v2878_v20, %v6874_v29 }
 0x284   : > { %v4444_v54 = vadd.f32 %v4443_v27, %v4349_v11  ;;  %v4483_v30 = vmul.f32 %v4349_v11, %v4349_v11 }
 0x285   : > { %v4295_v57 = vpop.f32.mrf.mxu0 }
 0x286   : > { %v4514_v21 = vadd.f32 %v4513_v37, %v4483_v30 }
 0x287   : > { %v3870_v45 = vpop.f32.mrf.mxu3 }
 0x288   : > { %v3925_v60 = vadd.f32 %v3870_v45, %v3244_v31 }
 0x28a   : > { %v4350_v63 = vadd.f32 %v4295_v57, %v3925_v60  ;;  %v3192_v22 = vpop.f32.mrf.mxu2  ;;  %v2880_v62 = vpop.f32.mrf.mxu1 }
 0x28b   : > { %v3245_v25 = vadd.f32 %v3192_v22, %v2931_v18  ;;  %v2932_v51 = vadd.f32 %v2880_v62, %v6897_v58 }
 0x28c   : > { %v5597_v15 = vpack.c.bf16 %v4350_v63, %v4349_v11  ;;  %v4445_v42 = vadd.f32 %v4444_v54, %v4350_v63  ;;  %v4484_v38 = vmul.f32 %v4350_v63, %v4350_v63 }
 0x28d   : > { %v4298_v56 = vpop.f32.mrf.mxu0 }
 0x28e   : > { %v4515_v10 = vadd.f32 %v4514_v21, %v4484_v38  ;;  %5641 = vst [vmem:[%s7166_s27 + $0x40] sm:$0xff] %v5597_v15  }
 0x28f   : > { %v3873_v43 = vpop.f32.mrf.mxu3 }
 0x290   : > { %v3926_v32 = vadd.f32 %v3873_v43, %v3245_v25 }
 0x292   : > { %v4351_v40 = vadd.f32 %v4298_v56, %v3926_v32  ;;  %v3194_v5 = vpop.f32.mrf.mxu2  ;;  %v2883_v29 = vpop.f32.mrf.mxu1 }
 0x293   : > { %v3246_v36 = vadd.f32 %v3194_v5, %v2932_v51  ;;  %v2933_v16 = vadd.f32 %v2883_v29, %v6912_v26 }
 0x294   : > { %v4446_v13 = vadd.f32 %v4445_v42, %v4351_v40  ;;  %v4485_v52 = vmul.f32 %v4351_v40, %v4351_v40 }
 0x295   : > { %v4300_v48 = vpop.f32.mrf.mxu0 }
 0x296   : > { %v4516_v34 = vadd.f32 %v4515_v10, %v4485_v52 }
 0x297   : > { %v3875_v23 = vpop.f32.mrf.mxu3 }
 0x298   : > { %v3927_v33 = vadd.f32 %v3875_v23, %v3246_v36 }
 0x29a   : > { %v4352_v61 = vadd.f32 %v4300_v48, %v3927_v33  ;;  %v3197_v1 = vpop.f32.mrf.mxu2  ;;  %v2885_v49 = vpop.f32.mrf.mxu1 }
 0x29b   : > { %v3247_v59 = vadd.f32 %v3197_v1, %v2933_v16  ;;  %v2934_v47 = vadd.f32 %v2885_v49, %v6938_v53 }
 0x29c   : > { %v5602_v44 = vpack.c.bf16 %v4352_v61, %v4351_v40  ;;  %v4447_v4 = vadd.f32 %v4446_v13, %v4352_v61  ;;  %v4486_v12 = vmul.f32 %v4352_v61, %v4352_v61 }
 0x29d   : > { %v4303_v58 = vpop.f32.mrf.mxu0 }
 0x29e   : > { %v4517_v46 = vadd.f32 %v4516_v34, %v4486_v12  ;;  %5642 = vst [vmem:[%s7166_s27 + $0x48] sm:$0xff] %v5602_v44  }
 0x29f   : > { %v3878_v27 = vpop.f32.mrf.mxu3 }
 0x2a0   : > { %v3928_v41 = vadd.f32 %v3878_v27, %v3247_v59 }
 0x2a2   : > { %v4353_v24 = vadd.f32 %v4303_v58, %v3928_v41  ;;  %v3199_v17 = vpop.f32.mrf.mxu2  ;;  %v2888_v26 = vpop.f32.mrf.mxu1 }
 0x2a3   : > { %v3248_v8 = vadd.f32 %v3199_v17, %v2934_v47  ;;  %v2935_v31 = vadd.f32 %v2888_v26, %v6952_v2 }
 0x2a4   : > { %v4448_v37 = vadd.f32 %v4447_v4, %v4353_v24  ;;  %v4487_v28 = vmul.f32 %v4353_v24, %v4353_v24 }
 0x2a5   : > { %v4305_v11 = vpop.f32.mrf.mxu0 }
 0x2a6   : > { %v4518_v19 = vadd.f32 %v4517_v46, %v4487_v28 }
 0x2a7   : > { %v3880_v7 = vpop.f32.mrf.mxu3 }
 0x2a8   : > { %v3929_v54 = vadd.f32 %v3880_v7, %v3248_v8 }
 0x2aa   : > { %v4354_v30 = vadd.f32 %v4305_v11, %v3929_v54  ;;  %v3202_v20 = vpop.f32.mrf.mxu2  ;;  %v2890_v63 = vpop.f32.mrf.mxu1 }
 0x2ab   : > { %v3249_v60 = vadd.f32 %v3202_v20, %v2935_v31  ;;  %v2936_v38 = vadd.f32 %v2890_v63, %v6975_v50 }
 0x2ac   : > { %v5607_v57 = vpack.c.bf16 %v4354_v30, %v4353_v24  ;;  %v4449_v21 = vadd.f32 %v4448_v37, %v4354_v30  ;;  %v4488_v45 = vmul.f32 %v4354_v30, %v4354_v30 }
 0x2ad   : > { %v4308_v53 = vpop.f32.mrf.mxu0 }
 0x2ae   : > { %v4519_v18 = vadd.f32 %v4518_v19, %v4488_v45  ;;  %5643 = vst [vmem:[%s7166_s27 + $0x50] sm:$0xff] %v5607_v57  }
 0x2af   : > { %v3883_v22 = vpop.f32.mrf.mxu3 }
 0x2b0   : > { %v3930_v15 = vadd.f32 %v3883_v22, %v3249_v60 }
 0x2b2   : > { %v4355_v42 = vadd.f32 %v4308_v53, %v3930_v15  ;;  %v3204_v25 = vpop.f32.mrf.mxu2  ;;  %v2893_v2 = vpop.f32.mrf.mxu1 }
 0x2b3   : > { %v3250_v10 = vadd.f32 %v3204_v25, %v2936_v38  ;;  %v2937_v13 = vadd.f32 %v2893_v2, %v6990_v35 }
 0x2b4   : > { %v4450_v62 = vadd.f32 %v4449_v21, %v4355_v42  ;;  %v4489_v56 = vmul.f32 %v4355_v42, %v4355_v42 }
 0x2b5   : > { %v4310_v43 = vpop.f32.mrf.mxu0 }
 0x2b6   : > { %v4520_v32 = vadd.f32 %v4519_v18, %v4489_v56 }
 0x2b7   : > { %v3885_v40 = vpop.f32.mrf.mxu3 }
 0x2b8   : > { %v3931_v51 = vadd.f32 %v3885_v40, %v3250_v10 }
 0x2ba   : > { %v4356_v5 = vadd.f32 %v4310_v43, %v3931_v51  ;;  %v3207_v52 = vpop.f32.mrf.mxu2  ;;  %v2895_v23 = vpop.f32.mrf.mxu1 }
 0x2bb   : > { %v3251_v34 = vadd.f32 %v3207_v52, %v2937_v13  ;;  %v2938_v44 = vadd.f32 %v2895_v23, %v7013_v0 }
 0x2bc   : > { %v5612_v36 = vpack.c.bf16 %v4356_v5, %v4355_v42  ;;  %v4451_v29 = vadd.f32 %v4450_v62, %v4356_v5  ;;  %v4490_v48 = vmul.f32 %v4356_v5, %v4356_v5 }
 0x2bd   : > { %v4313_v50 = vpop.f32.mrf.mxu0 }
 0x2be   : > { %v4521_v33 = vadd.f32 %v4520_v32, %v4490_v48  ;;  %5644 = vst [vmem:[%s7166_s27 + $0x58] sm:$0xff] %v5612_v36  }
 0x2bf   : > { %v3888_v61 = vpop.f32.mrf.mxu3 }
 0x2c0   : > { %v3932_v16 = vadd.f32 %v3888_v61, %v3251_v34 }
 0x2c2   : > { %v4357_v1 = vadd.f32 %v4313_v50, %v3932_v16  ;;  %v3209_v4 = vpop.f32.mrf.mxu2  ;;  %v2898_v35 = vpop.f32.mrf.mxu1 }
 0x2c3   : > { %v3252_v49 = vadd.f32 %v3209_v4, %v2938_v44  ;;  %v2939_v47 = vadd.f32 %v2898_v35, %v7026_v14 }
 0x2c4   : > { %v4452_v12 = vadd.f32 %v4451_v29, %v4357_v1  ;;  %v4491_v59 = vmul.f32 %v4357_v1, %v4357_v1 }
 0x2c5   : > { %v4315_v58 = vpop.f32.mrf.mxu0 }
 0x2c6   : > { %v4522_v46 = vadd.f32 %v4521_v33, %v4491_v59 }
 0x2c7   : > { %v3890_v27 = vpop.f32.mrf.mxu3 }
 0x2c8   : > { %v3933_v41 = vadd.f32 %v3890_v27, %v3252_v49 }
 0x2ca   : > { %v4358_v24 = vadd.f32 %v4315_v58, %v3933_v41  ;;  %v3212_v17 = vpop.f32.mrf.mxu2  ;;  %v2900_v11 = vpop.f32.mrf.mxu1 }
 0x2cb   : > { %v3253_v26 = vadd.f32 %v3212_v17, %v2939_v47  ;;  %v2940_v31 = vadd.f32 %v2900_v11, %v7048_v9 }
 0x2cc   : > { %v5617_v37 = vpack.c.bf16 %v4358_v24, %v4357_v1  ;;  %v4453_v28 = vadd.f32 %v4452_v12, %v4358_v24  ;;  %v4492_v8 = vmul.f32 %v4358_v24, %v4358_v24 }
 0x2cd   : > { %v4318_v0 = vpop.f32.mrf.mxu0 }
 0x2ce   : > { %v4523_v19 = vadd.f32 %v4522_v46, %v4492_v8  ;;  %5645 = vst [vmem:[%s7166_s27 + $0x60] sm:$0xff] %v5617_v37  }
 0x2cf   : > { %v3893_v7 = vpop.f32.mrf.mxu3 }
 0x2d0   : > { %v3934_v54 = vadd.f32 %v3893_v7, %v3253_v26 }
 0x2d2   : > { %v4359_v30 = vadd.f32 %v4318_v0, %v3934_v54  ;;  %v3214_v20 = vpop.f32.mrf.mxu2  ;;  %v2903_v14 = vpop.f32.mrf.mxu1 }
 0x2d3   : > { %v3254_v45 = vadd.f32 %v3214_v20, %v2940_v31  ;;  %v2941_v15 = vadd.f32 %v2903_v14, %v7063_v6 }
 0x2d4   : > { %v4454_v57 = vadd.f32 %v4453_v28, %v4359_v30  ;;  %v4493_v21 = vmul.f32 %v4359_v30, %v4359_v30 }
 0x2d5   : > { %v4320_v60 = vpop.f32.mrf.mxu0 }
 0x2d6   : > { %v4524_v63 = vadd.f32 %v4523_v19, %v4493_v21 }
 0x2d7   : > { %v3895_v53 = vpop.f32.mrf.mxu3 }
 0x2d8   : > { %v3935_v18 = vadd.f32 %v3895_v53, %v3254_v45 }
 0x2da   : > { %v4360_v22 = vadd.f32 %v4320_v60, %v3935_v18  ;;  %v3217_v42 = vpop.f32.mrf.mxu2  ;;  %v2905_v10 = vpop.f32.mrf.mxu1 }
 0x2db   : > { %v3255_v56 = vadd.f32 %v3217_v42, %v2941_v15  ;;  %v2942_v51 = vadd.f32 %v2905_v10, %v7087_v55 }
 0x2dc   : > { %v5622_v38 = vpack.c.bf16 %v4360_v22, %v4359_v30  ;;  %v4455_v25 = vadd.f32 %v4454_v57, %v4360_v22  ;;  %v4494_v62 = vmul.f32 %v4360_v22, %v4360_v22 }
 0x2dd   : > { %v4323_v9 = vpop.f32.mrf.mxu0 }
 0x2de   : > { %v4525_v2 = vadd.f32 %v4524_v63, %v4494_v62  ;;  %5646 = vst [vmem:[%s7166_s27 + $0x68] sm:$0xff] %v5622_v38  }
 0x2df   : > { %v3898_v43 = vpop.f32.mrf.mxu3 }
 0x2e0   : > { %v3936_v32 = vadd.f32 %v3898_v43, %v3255_v56 }
 0x2e2   : > { %v4361_v40 = vadd.f32 %v4323_v9, %v3936_v32  ;;  %v3219_v5 = vpop.f32.mrf.mxu2  ;;  %v2908_v6 = vpop.f32.mrf.mxu1 }
 0x2e3   : > { %v3256_v36 = vadd.f32 %v3219_v5, %v2942_v51  ;;  %v2943_v33 = vadd.f32 %v2908_v6, %v7100_v3 }
 0x2e4   : > { %v4456_v13 = vadd.f32 %v4455_v25, %v4361_v40  ;;  %v4495_v52 = vmul.f32 %v4361_v40, %v4361_v40 }
 0x2e5   : > { %v4325_v29 = vpop.f32.mrf.mxu0 }
 0x2e6   : > { %v4526_v48 = vadd.f32 %v4525_v2, %v4495_v52 }
 0x2e7   : > { %v3900_v34 = vpop.f32.mrf.mxu3 }
 0x2e8   : > { %v3937_v23 = vadd.f32 %v3900_v34, %v3256_v36 }
 0x2ea   : > { %v4362_v50 = vadd.f32 %v4325_v29, %v3937_v23  ;;  %v3222_v61 = vpop.f32.mrf.mxu2  ;;  %v2910_v12 = vpop.f32.mrf.mxu1 }
 0x2eb   : > { %v3257_v4 = vadd.f32 %v3222_v61, %v2943_v33  ;;  %v2944_v46 = vadd.f32 %v2910_v12, %v7122_v39 }
 0x2ec   : > { %v5627_v16 = vpack.c.bf16 %v4362_v50, %v4361_v40  ;;  %v4457_v1 = vadd.f32 %v4456_v13, %v4362_v50  ;;  %v4496_v44 = vmul.f32 %v4362_v50, %v4362_v50 }
 0x2ed   : > { %v4328_v59 = vpop.f32.mrf.mxu0 }
 0x2ee   : > { %v4527_v55 = vadd.f32 %v4526_v48, %v4496_v44  ;;  %5647 = vst [vmem:[%s7166_s27 + $0x70] sm:$0xff] %v5627_v16  }
 0x2ef   : > { %v3903_v49 = vpop.f32.mrf.mxu3 }
 0x2f0   : > { %v3938_v35 = vadd.f32 %v3903_v49, %v3257_v4 }
 0x2f2   : > { %v4363_v58 = vadd.f32 %v4328_v59, %v3938_v35  ;;  %v3224_v27 = vpop.f32.mrf.mxu2 }
 0x2f3   : > { %v3258_v3 = vadd.f32 %v3224_v27, %v2944_v46 }
 0x2f4   : > { %v4458_v41 = vadd.f32 %v4457_v1, %v4363_v58  ;;  %v4497_v24 = vmul.f32 %v4363_v58, %v4363_v58 }
 0x2f5   : > { %v4330_v28 = vpop.f32.mrf.mxu0 }
 0x2f6   : > { %v4528_v47 = vadd.f32 %v4527_v55, %v4497_v24 }
 0x2f7   : > { %v3905_v17 = vpop.f32.mrf.mxu3 }
 0x2f8   : > { %v3939_v37 = vadd.f32 %v3905_v17, %v3258_v3 }
 0x2fa   : > { %v4364_v8 = vadd.f32 %v4330_v28, %v3939_v37 }
 0x2fc   : > { %v5632_v39 = vpack.c.bf16 %v4364_v8, %v4363_v58  ;;  %v4459_v26 = vadd.f32 %v4458_v41, %v4364_v8  ;;  %v4498_v11 = vmul.f32 %v4364_v8, %v4364_v8 }
 0x2fe   : > { %v4460_v0 = vrot.slane %v4459_v26, 4  ;;  %v4529_v19 = vadd.f32 %v4528_v47, %v4498_v11  ;;  %5648 = vst [vmem:[%s7166_s27 + $0x78] sm:$0xff] %v5632_v39  }
 0x2ff   : > { %5805 = shalt.err (!%p5802_p3)
}
 0x300   : > { %s5902_s27 = smov 64   ;;  %s5903_s11 = smov 4   ;;  %v4461_v7 = vadd.f32 %v4460_v0, %v4459_v26  ;;  %v4530_v54 = vrot.slane %v4529_v19, 4 }
 0x301   : > { %5674 = dma.vmem_to_hbm [thread:$0]  (%p5969_p5), %s4559_s5, 2048, %s4561_s6, %s4538_s7, %s5902_s27, %s5902_s27, %s5903_s11  }
 0x302   : > { %v4531_v30 = vadd.f32 %v4530_v54, %v4529_v19  ;;  %v4462_v31 = vrot.slane %v4461_v7, 2  ;;  %s4572_s30 = scalar_lea.hbm %s7449_s3, %s5950_s19  ;;  %s4542_s8 = sand.u32 1, %s5950_s19  }
 0x303   : > { %s4585_s12 = scalar_lea.hbm %s7450_s4, %s5950_s19  ;;  %s200_s13 = scalar_lea.vmem [#allocation4], %s7147_s22 }
 0x304   : > { %v4463_v20 = vadd.f32 %v4462_v31, %v4461_v7  ;;  %v4532_v57 = vrot.slane %v4531_v30, 2  ;;  %s7388_s14 = sshll.u32 %s200_s13, 4  ;;  %s7390_s5 = sshll.u32 %s4572_s30, 4  ;;  %s4575_s14 = int_to_ptr.vmem [resolvable:$true] %s7388_s14  ;;  %s4577_s5 = int_to_ptr.hbm [resolvable:$true] %s7390_s5 }
 0x305   : > { %s206_s6 = scalar_lea.vmem [#allocation6], %s7147_s22  ;;  %s7395_s23 = sshll.u32 %s4585_s12, 4  ;;  %s4590_s23 = int_to_ptr.hbm [resolvable:$true] %s7395_s23 }
 0x306   : > { %v4464_v21 = vrot.slane %v4463_v20, 1  ;;  %v4533_v45 = vadd.f32 %v4532_v57, %v4531_v30  ;;  %s7393_s7 = sshll.u32 %s206_s6, 4  ;;  %s4543_s19 = scalar_lea.sflag [#allocation5], %s4542_s8  ;;  %s4588_s7 = int_to_ptr.vmem [resolvable:$true] %s7393_s7 }
 0x307   : > { %s5820_s27 = sshra.s32 %s4577_s5, 4  ;;  %s5826_s29 = scalar_lea.hbm %s7449_s3, 2  ;;  %s5821_s27 = int_to_ptr.hbm [resolvable:$true] %s5820_s27 }
 0x308   : > { %v4465_v14 = vadd.f32 %v4464_v21, %v4463_v20  ;;  %v4534_v60 = vrot.slane %v4533_v45, 1  ;;  %s5822_s11 = scalar_lea.hbm %s5821_s27, 1  ;;  %p5827_p9 = scmp.lt.s32.totalorder %s5821_s27, %s7449_s3 }
 0x309   : > { %p5823_p4 = scmp.ne.s32.totalorder %s5821_s27, %s5822_s11  ;;  %p5828_p10 = scmp.lt.s32.totalorder %s5826_s29, %s5822_s11 }
 0x30a   : > { %4466 = vst [vmem:[%s200_s13] sm:$0x1] %v4465_v14  ;;  %v4535_v63 = vadd.f32 %v4534_v60, %v4533_v45 }
 0x30b   : > { %p5824_p7 = pnand %p5823_p4, %p5969_p5  ;;  %p5829_p11 = por %p5828_p10, %p5827_p9 }
 0x30d   : > { %p5825_p8 = pneg %p5824_p7 }
 0x30f   : > { %p5830_p12 = pnand %p5829_p11, %p5825_p8 }
 0x311   : > { %5833 = shalt.err (!%p5830_p12)
}
 0x312   : > { %5675 = dma.vmem_to_hbm [thread:$0]  (%p5969_p5), %s4575_s14, 16, %s4577_s5, %s4543_s19   ;;  %4536 = vst [vmem:[%s206_s6] sm:$0x1] %v4535_v63 }
 0x313   : > { %s5848_s8 = sshra.s32 %s4590_s23, 4  ;;  %s5854_s27 = scalar_lea.hbm %s7450_s4, 2  ;;  %s5849_s8 = int_to_ptr.hbm [resolvable:$true] %s5848_s8 }
 0x314   : > { %s5850_s10 = scalar_lea.hbm %s5849_s8, 1  ;;  %p5855_p2 = scmp.lt.s32.totalorder %s5849_s8, %s7450_s4 }
 0x315   : > { %p5851_p13 = scmp.ne.s32.totalorder %s5849_s8, %s5850_s10  ;;  %p5856_p3 = scmp.lt.s32.totalorder %s5854_s27, %s5850_s10 }
 0x317   : > { %p5852_p0 = pnand %p5851_p13, %p5969_p5  ;;  %p5857_p4 = por %p5856_p3, %p5855_p2 }
 0x319   : > { %p5853_p1 = pneg %p5852_p0 }
 0x31b   : > { %p5858_p7 = pnand %p5857_p4, %p5853_p1 }
 0x31d   : > { %5861 = shalt.err (!%p5858_p7)
}
 0x31e   : > { %5676 = dma.vmem_to_hbm [thread:$0]  (%p5969_p5), %s4588_s7, 16, %s4590_s23, %s4543_s19  }
 0x31f PF: > { %p5690_p8 = scmp.ge.s32.totalorder %s5900_s18, 2  ;;  %s4601_s14 = sand.u32 1, %s5888_s15  }
 0x320   : > { %s4602_s5 = scalar_lea.sflag [#allocation3], %s4601_s14 }
 0x321   : > { %p5681_p9 = pnand %p5690_p8, %p5973_p6 }
 0x323   : > { %p5682_p10 = pneg %p5681_p9 }
 0x325   : > { %5879 = dma.done.wait (%p5682_p10), %s4602_s5, 2048  }
 0x326   : > { %5881 = vsyncadd (%p5682_p10), %s4602_s5, 4294965248  ;;  %s4611_s25 = sand.u32 1, %s4702_s20  }
 0x327   : > { %s4612_s6 = scalar_lea.sflag [#allocation5], %s4611_s25 }
 0x328   : > { %5883 = dma.done.wait (%p5682_p10), %s4612_s6, 32  }
 0x329   : > { %5885 = vsyncadd (%p5682_p10), %s4612_s6, 4294967264  ;;  %p18_p5 = scmp.ge.s32.totalorder %s5954_s21, 4   ;;  %s7461_s15 = smov %s5892_s16 }
 0x32a   : > { %s7462_s16 = smov %s5896_s17  ;;  %s7463_s17 = smov %s5967_s24 }
 0x32b   : > { %s7464_s18 = smov %s5954_s21  ;;  %20 = sbr.rel (!%p18_p5) target bundleno = 5 (0x5), region = 97 }
 0x330   :  { %4626 = vsyncpa [#allocation3], 1 }
 0x331   :  { %4628 = vsyncpa [#allocation3 + $0x1], 1 }
 0x332   :  { %4629 = vsyncpa [#allocation5], 1 }
 0x333   :  { %4631 = vsyncpa [#allocation5 + $0x1], 1 }

</bundles_post_ra>
